<compile_context>
chip_gen: v5e
topology: v5e:2x2
jax: 0.10.0
libtpu: 0.0.40
codegen_flags: <defaults>
</compile_context>

<pallas_src>
import functools

import numpy as np
import jax
import jax.numpy as jnp
from jax import lax
from jax.experimental import pallas as pl
from jax.experimental.pallas import tpu as pltpu
from jax.scipy.special import erf as _erf_exact


# ----------------------------- in-kernel helpers -----------------------------

def _gelu_tanh(x):
    """nn.GELU() tanh approximation (|err| ~3e-4, far below bf16 matmul noise).

    One EUP op per element; the exact-erf path needed exp + reciprocal.
    # TODO(synk): switch back to exact erf if reused for training / tight evals.
    """
    c0 = 0.7978845608028654          # sqrt(2/pi)
    return 0.5 * x * (1.0 + jnp.tanh(c0 * (x + 0.044715 * x * x * x)))


# ------------------------------- fused kernel --------------------------------

def _waveblock_kernel(xm_ref, xt_ref, xb_ref, wc_ref, bc_ref, wf_ref, bo_ref,
                      o_ref, pp_ref, *, ww):
    """One (image, row-tile) per grid step; grid = (batch, n_row_tiles).

    xm_ref : (1, Pt, 4C)  bf16   space-to-depth slab of the row tile (Pt = Rt*ww)
    xt_ref : (1, ww, 4C)  bf16   half-res row just above the tile (clamped at r == 0)
    xb_ref : (1, ww, 4C)  bf16   half-res row just below the tile (clamped at last r)
    wc_ref : (4C, Cm)     bf16   fused (reduction o Haar DWT o concat o conv1x1) weight
    bc_ref : (1, Cm)      f32    fused bias
    wf_ref : (9, Cm, 4C)  bf16   half-res 3x3 conv taps (PixelShuffle + BN folded in)
    bo_ref : (1, 4C)      f32    fused conv+BN bias (replicated per sub-pixel)
    o_ref  : (1, Pt, 4C)  bf16   pre-pixel-shuffle output tile
    pp_ref : (Pt+2*ww+16, Cm) bf16 scratch: [8 zeros | top halo | tile | bottom halo | 8 zeros]
    """
    Pt = xm_ref.shape[1]
    Cm = wc_ref.shape[1]
    Co = bo_ref.shape[1]
    base = ww + 8                       # 8-row slack keeps the rx==0 taps sublane aligned
    r = pl.program_id(1)
    n_tiles = pl.num_programs(1)

    wc = wc_ref[...]
    bc = bc_ref[...]

    def stage1_f32(x2d):                # (rows, 4C) bf16 -> (rows, Cm) f32 GELU output
        h = jnp.dot(x2d, wc, preferred_element_type=jnp.float32) + bc
        return _gelu_tanh(h)

    # ---- stage 1: GELU of this tile + recomputed halo rows into the bf16 scratch ----
    pp_ref[base:base + Pt, :] = stage1_f32(xm_ref[0]).astype(pp_ref.dtype)
    # halo rows become the 3x3-conv zero padding at the image top / bottom
    top_on = (r > 0).astype(jnp.float32)
    bot_on = (r < n_tiles - 1).astype(jnp.float32)
    pp_ref[0:8, :] = jnp.zeros((8, Cm), pp_ref.dtype)
    pp_ref[8:base, :] = (stage1_f32(xt_ref[0]) * top_on).astype(pp_ref.dtype)
    pp_ref[base + Pt:base + Pt + ww, :] = (
        stage1_f32(xb_ref[0]) * bot_on).astype(pp_ref.dtype)
    pp_ref[base + Pt + ww:base + Pt + ww + 8, :] = jnp.zeros((8, Cm), pp_ref.dtype)

    # ---- stage 2: 3x3 conv on the half-res grid, nine shifted-slab matmuls ----
    col = lax.broadcasted_iota(jnp.int32, (Pt, 1), 0) % ww      # output pixel column
    ml = (col > 0).astype(pp_ref.dtype)        # tap rx=-1 invalid at image column 0
    mr = (col < (ww - 1)).astype(pp_ref.dtype) # tap rx=+1 invalid at image column ww-1
    acc = jnp.zeros((Pt, Co), jnp.float32)
    for k in range(9):
        ry, rx = k // 3 - 1, k % 3 - 1
        s0 = base + ry * ww + rx
        lhs = pp_ref[s0:s0 + Pt, :]            # bf16, no per-tap f32->bf16 convert pass
        if rx == -1:
            lhs = lhs * ml
        elif rx == 1:
            lhs = lhs * mr
        acc = acc + jnp.dot(lhs, wf_ref[k], preferred_element_type=jnp.float32)
    o_ref[0] = (acc + bo_ref[...]).astype(o_ref.dtype)


# --------------------------------- forward -----------------------------------

def waveblock_forward(x_nchw, params, *, mult=4, row_tile=None,
                      single_buffer_weights=True):
    b, C, h, w = x_nchw.shape
    assert h % 2 == 0 and w % 2 == 0 and C % 4 == 0
    assert mult == 4, "PixelShuffle(2) -> Conv2d(final_dim, ...) requires mult == 4"
    C4, Cm, Co = C // 4, C * mult, 4 * C
    hh, ww = h // 2, w // 2
    P = hh * ww
    # TODO(synk): support half-res widths that are not a multiple of 8 (needs padded rows).
    assert ww % 8 == 0, "half-resolution width must be a multiple of 8"
    f32, bf16 = jnp.float32, jnp.bfloat16

    # ---- row tiling: <= ~1024 half-res pixels per grid step (VMEM headroom on all gens) ----
    if row_tile is None:
        row_tile = hh
        while row_tile % 2 == 0 and row_tile * ww > 1024:
            row_tile //= 2
    assert hh % row_tile == 0, "row_tile must divide the half-res height"
    Rt = row_tile
    Pt = Rt * ww
    n_tiles = hh // Rt

    # ---- fold reduction(1x1) -> Haar DWT -> concat -> conv1x1 into one matmul (glue) ----
    Wred = params["w_red"].reshape(C4, C).T.astype(f32)           # (C, C4)
    bred = params["b_red"].reshape(1, C4).astype(f32)
    W1 = params["w1"].reshape(Cm, C).T.astype(f32)                # (C, Cm); row = cat channel
    # torch concat channel order: [LL_0..LL_{C4-1}, c0_s1, c0_s2, c0_s3, c1_s1, ...]
    W_LL = W1[0:C4]
    W_S1 = W1[C4 + 3 * np.arange(C4) + 0]
    W_S2 = W1[C4 + 3 * np.arange(C4) + 1]
    W_S3 = W1[C4 + 3 * np.arange(C4) + 2]
    W_comb = 0.5 * jnp.concatenate([
        Wred @ (W_LL + W_S1 + W_S2 + W_S3),    # coeff of sub-pixel (0,0)  (A)
        Wred @ (W_LL + W_S1 - W_S2 - W_S3),    # (0,1)  (B)
        Wred @ (W_LL - W_S1 + W_S2 - W_S3),    # (1,0)  (C)
        Wred @ (W_LL - W_S1 - W_S2 + W_S3),    # (1,1)  (D)
    ], axis=0)                                                    # (4C, Cm)
    b_comb = 2.0 * (bred @ W_LL) + params["b1"].reshape(1, Cm)    # bred cancels in detail bands

    # ---- fold BatchNorm(eval) into the 3x3 conv, then fold PixelShuffle into it (glue) ----
    scale = params["gamma"] / jnp.sqrt(params["rvar"] + 1e-5)
    W3bn = params["w3"] * scale[:, None, None, None]              # (C, C, 3, 3)
    b3bn = (params["b3"] - params["rmean"]) * scale + params["beta"]
    # Wf[ry+1, rx+1, ci*4 + si*2 + sj, co*4 + i*2 + j] += W3bn[co, ci, dy+1, dx+1]
    # where (ry, si) = divmod(i+dy, 2), (rx, sj) = divmod(j+dx, 2).
    ci = np.arange(C)
    co = np.arange(C)
    Wf = jnp.zeros((3, 3, Cm, Co), f32)
    for i in range(2):
        for j in range(2):
            for dy in (-1, 0, 1):
                ry, si = divmod(i + dy, 2)
                for dx in (-1, 0, 1):
                    rx, sj = divmod(j + dx, 2)
                    Wf = Wf.at[ry + 1, rx + 1,
                               (ci * 4 + si * 2 + sj)[:, None],
                               (co * 4 + i * 2 + j)[None, :]].add(
                                   W3bn[:, :, dy + 1, dx + 1].T)
    Wf = Wf.reshape(9, Cm, Co)
    b_out = jnp.repeat(b3bn, 4).reshape(1, Co)

    # ---- NCHW -> space-to-depth slab (b, hh*ww, 4C), lanes = [A|B|C|D] (glue) ----
    xh = jnp.transpose(x_nchw, (0, 2, 3, 1)).reshape(b, hh, 2, ww, 2, C)
    x_s2d = jnp.transpose(xh, (0, 1, 3, 2, 4, 5)).reshape(b, P, 4 * C).astype(bf16)

    # ---- specs: main tile + two 1-row halo streams + resident (single-buffer) constants ----
    const_kw = dict(pipeline_mode=pl.Buffered(1)) if single_buffer_weights else {}
    in_specs = [
        pl.BlockSpec((1, Pt, 4 * C), lambda n, r: (n, r, 0)),
        pl.BlockSpec((1, ww, 4 * C),
                     lambda n, r: (n, jnp.maximum(r * Rt - 1, 0), 0)),
        pl.BlockSpec((1, ww, 4 * C),
                     lambda n, r: (n, jnp.minimum((r + 1) * Rt, hh - 1), 0)),
        pl.BlockSpec((4 * C, Cm), lambda n, r: (0, 0), **const_kw),
        pl.BlockSpec((1, Cm), lambda n, r: (0, 0), **const_kw),
        pl.BlockSpec((9, Cm, Co), lambda n, r: (0, 0, 0), **const_kw),
        pl.BlockSpec((1, Co), lambda n, r: (0, 0), **const_kw),
    ]
    out_spec = pl.BlockSpec((1, Pt, Co), lambda n, r: (n, r, 0))

    # ---- explicit VMEM budget (per-tile) with headroom; clamp to a safe range ----
    wbuf = 1 if single_buffer_weights else 2
    vmem_est = (
        2 * (Pt * 4 * C * 2 + 2 * ww * 4 * C * 2 + Pt * Co * 2)          # dbl-buffered act I/O
        + wbuf * ((4 * C * Cm + 9 * Cm * Co) * 2 + (Cm + Co) * 4)        # resident weights
        + (Pt + 2 * ww + 16) * Cm * 2                                    # bf16 GELU scratch
        + Pt * Co * 4                                                    # live f32 accumulator
    )
    vmem_limit = int(min(max(vmem_est * 3 // 2 + (4 << 20), 32 << 20), 56 << 20))

    kernel = functools.partial(_waveblock_kernel, ww=ww)
    out = pl.pallas_call(
        kernel,
        out_shape=jax.ShapeDtypeStruct((b, P, Co), bf16),
        grid=(b, n_tiles),
        in_specs=in_specs,
        out_specs=out_spec,
        scratch_shapes=[pltpu.VMEM((Pt + 2 * ww + 16, Cm), bf16)],
        compiler_params=pltpu.CompilerParams(
            dimension_semantics=("parallel", "arbitrary"),
            vmem_limit_bytes=vmem_limit),
    )(x_s2d, x_s2d, x_s2d, W_comb.astype(bf16), b_comb, Wf.astype(bf16), b_out)

    # ---- PixelShuffle(2) + NHWC -> NCHW in bf16 (pure layout), final cast to f32 ----
    y = out.reshape(b, hh, ww, C, 2, 2)
    y = jnp.transpose(y, (0, 1, 4, 2, 5, 3)).reshape(b, h, w, C)
    return jnp.transpose(y, (0, 3, 1, 2)).astype(jnp.float32)


# --------------------------- pure-JAX reference (f32) -------------------------

def _reference_forward(x_nchw, params, *, mult=4):
    """Unfused f32 reference of the same forward (exact-erf GELU, same Haar convention)."""
    b, C, h, w = x_nchw.shape
    C4, Cm = C // 4, C * mult
    hh, ww = h // 2, w // 2
    x = jnp.transpose(x_nchw, (0, 2, 3, 1)).astype(jnp.float32)
    r = x @ params["w_red"].reshape(C4, C).T + params["b_red"]
    a = r[:, 0::2, 0::2, :]
    bb = r[:, 0::2, 1::2, :]
    c = r[:, 1::2, 0::2, :]
    d = r[:, 1::2, 1::2, :]
    ll = 0.5 * (a + bb + c + d)
    s1 = 0.5 * (a + bb - c - d)
    s2 = 0.5 * (a - bb + c - d)
    s3 = 0.5 * (a - bb - c + d)
    yh = jnp.stack([s1, s2, s3], axis=-1).reshape(b, hh, ww, 3 * C4)
    cat = jnp.concatenate([ll, yh], axis=-1)
    g = cat @ params["w1"].reshape(Cm, C).T + params["b1"]
    g = 0.5 * g * (1.0 + _erf_exact(g * 0.7071067811865476))
    g = g.reshape(b, hh, ww, C, 2, 2)
    g = jnp.transpose(g, (0, 1, 4, 2, 5, 3)).reshape(b, h, w, C)
    gp = jnp.pad(g, ((0, 0), (1, 1), (1, 1), (0, 0)))
    out = jnp.zeros((b, h, w, C), jnp.float32)
    for ky in range(3):
        for kx in range(3):
            out = out + gp[:, ky:ky + h, kx:kx + w, :] @ params["w3"][:, :, ky, kx].T
    out = out + params["b3"]
    scale = params["gamma"] / jnp.sqrt(params["rvar"] + 1e-5)
    out = (out - params["rmean"]) * scale + params["beta"]
    return jnp.transpose(out, (0, 3, 1, 2))


# --------------------------------- params ------------------------------------

def init_params(key, final_dim=16, mult=4):
    """Deterministic parameters in PyTorch layouts (synthetic, not a checkpoint)."""
    C, C4, Cm = final_dim, final_dim // 4, final_dim * mult
    ks = jax.random.split(key, 10)
    u = lambda k, shape, bnd: jax.random.uniform(k, shape, jnp.float32, -bnd, bnd)
    return dict(
        w_red=u(ks[0], (C4, C, 1, 1), 1.0 / np.sqrt(C)),           # Conv2d(C, C/4, 1)
        b_red=u(ks[1], (C4,), 1.0 / np.sqrt(C)),
        w1=u(ks[2], (Cm, C, 1, 1), 1.0 / np.sqrt(C)),              # Conv2d(C, C*mult, 1)
        b1=u(ks[3], (Cm,), 1.0 / np.sqrt(C)),
        w3=u(ks[4], (C, C, 3, 3), 1.0 / np.sqrt(C * 9)),           # Conv2d(C, C, 3, 1, 1)
        b3=u(ks[5], (C,), 1.0 / np.sqrt(C * 9)),
        gamma=jax.random.uniform(ks[6], (C,), jnp.float32, 0.8, 1.2),   # BatchNorm2d(C)
        beta=u(ks[7], (C,), 0.1),
        rmean=u(ks[8], (C,), 0.1),
        rvar=jax.random.uniform(ks[9], (C,), jnp.float32, 0.5, 1.5),
    )


if __name__ == "__main__":
    key = jax.random.PRNGKey(0)
    kx, kp = jax.random.split(key)
    Bn, Cn, Hn, Wn = 2, 16, 16, 16          # final_dim = 16, mult = 4
    x = jax.random.normal(kx, (Bn, Cn, Hn, Wn), jnp.float32)
    params = init_params(kp, final_dim=Cn, mult=4)

    def run(**kw):
        fn = jax.jit(functools.partial(waveblock_forward, mult=4, **kw))
        return jax.block_until_ready(fn(x, params))

    try:
        y = run()                          # auto row tiling (single tile at this size)
        y_tiled = run(row_tile=2)          # force the multi-tile / halo path as well
    except Exception:
        # Fallback for Pallas builds that reject pipeline_mode=pl.Buffered(1).
        y = run(single_buffer_weights=False)
        y_tiled = run(row_tile=2, single_buffer_weights=False)

    y_ref = jax.block_until_ready(jax.jit(
        functools.partial(_reference_forward, mult=4))(x, params))
    ref_scale = float(jnp.max(jnp.abs(y_ref)))
    ref_rms = float(jnp.sqrt(jnp.mean(y_ref ** 2)))

    def check(name, yv):
        assert yv.shape == (Bn, Cn, Hn, Wn), (name, yv.shape)
        assert bool(jnp.all(jnp.isfinite(yv))), name
        err = jnp.abs(yv.astype(jnp.float32) - y_ref)
        max_err = float(jnp.max(err))
        rel_rms = float(jnp.sqrt(jnp.mean(err ** 2))) / ref_rms
        # bf16 matmul operands / bf16 output / tanh-GELU: a few % worst case, <2% RMS
        assert max_err <= 0.05 * ref_scale + 0.05, (name, max_err, ref_scale)
        assert rel_rms <= 0.04, (name, rel_rms)

    check("auto_tile", y)
    check("row_tile=2", y_tiled)

    print("KERNEL_OK")
</pallas_src>

<mosaic_0001>
module attributes {stable_mosaic.version = 11 : i64} {
  func.func @_waveblock_kernel(%arg0: i32, %arg1: i32, %arg2: memref<1x64x64xbf16, #tpu.memory_space<vmem>>, %arg3: memref<1x8x64xbf16, #tpu.memory_space<vmem>>, %arg4: memref<1x8x64xbf16, #tpu.memory_space<vmem>>, %arg5: memref<64x64xbf16, #tpu.memory_space<vmem>>, %arg6: memref<1x64xf32, #tpu.memory_space<vmem>>, %arg7: memref<9x64x64xbf16, #tpu.memory_space<vmem>>, %arg8: memref<1x64xf32, #tpu.memory_space<vmem>>, %arg9: memref<1x64x64xbf16, #tpu.memory_space<vmem>>, %arg10: memref<96x64xbf16, #tpu.memory_space<vmem>>) attributes {dimension_semantics = [#tpu.dimension_semantics<parallel>, #tpu.dimension_semantics<arbitrary>], iteration_bounds = array<i64: 2, 1>, scalar_prefetch = 0 : i64, scratch_operands = 1 : i64, tpu.core_type = #tpu.core_type<tc>, window_params = [{transform_indices = @transform_0, window_bounds = array<i64: 1, 64, 64>}, {transform_indices = @transform_1, window_bounds = array<i64: 1, 8, 64>}, {transform_indices = @transform_2, window_bounds = array<i64: 1, 8, 64>}, {pipeline_mode = #tpu.pipeline_mode<synchronous>, transform_indices = @transform_3, window_bounds = array<i64: 64, 64>}, {pipeline_mode = #tpu.pipeline_mode<synchronous>, transform_indices = @transform_4, window_bounds = array<i64: 1, 64>}, {pipeline_mode = #tpu.pipeline_mode<synchronous>, transform_indices = @transform_5, window_bounds = array<i64: 9, 64, 64>}, {pipeline_mode = #tpu.pipeline_mode<synchronous>, transform_indices = @transform_6, window_bounds = array<i64: 1, 64>}, {transform_indices = @transform_7, window_bounds = array<i64: 1, 64, 64>}]} {
    %c0 = arith.constant 0 : index
    %c0_0 = arith.constant 0 : index
    %0 = vector.load %arg5[%c0, %c0_0] : memref<64x64xbf16, #tpu.memory_space<vmem>>, vector<64x64xbf16>
    %c0_1 = arith.constant 0 : index
    %c0_2 = arith.constant 0 : index
    %1 = vector.load %arg6[%c0_1, %c0_2] : memref<1x64xf32, #tpu.memory_space<vmem>>, vector<1x64xf32>
    %c0_3 = arith.constant 0 : index
    %c0_4 = arith.constant 0 : index
    %c0_5 = arith.constant 0 : index
    %2 = vector.load %arg2[%c0_3, %c0_4, %c0_5] : memref<1x64x64xbf16, #tpu.memory_space<vmem>>, vector<1x64x64xbf16>
    %3 = vector.shape_cast %2 : vector<1x64x64xbf16> to vector<64x64xbf16>
    %cst = arith.constant dense<0.000000e+00> : vector<64x64xf32>
    %4 = tpu.matmul %3, %0, %cst {dimension_numbers = #tpu.dot_dimension_numbers<[1], [0], [0], [1], [0, 0, 1, 1], [], []>} : vector<64x64xbf16>, vector<64x64xbf16>, vector<64x64xf32> -> vector<64x64xf32>
    %5 = vector.broadcast %1 : vector<1x64xf32> to vector<64x64xf32>
    %6 = arith.addf %4, %5 : vector<64x64xf32>
    %cst_6 = arith.constant 5.000000e-01 : f32
    %7 = vector.broadcast %cst_6 : f32 to vector<64x64xf32>
    %8 = arith.mulf %7, %6 : vector<64x64xf32>
    %cst_7 = arith.constant 4.471500e-02 : f32
    %9 = vector.broadcast %cst_7 : f32 to vector<64x64xf32>
    %10 = arith.mulf %9, %6 : vector<64x64xf32>
    %11 = arith.mulf %10, %6 : vector<64x64xf32>
    %12 = arith.mulf %11, %6 : vector<64x64xf32>
    %13 = arith.addf %6, %12 : vector<64x64xf32>
    %cst_8 = arith.constant 0.797884583 : f32
    %14 = vector.broadcast %cst_8 : f32 to vector<64x64xf32>
    %15 = arith.mulf %14, %13 : vector<64x64xf32>
    %16 = math.tanh %15 : vector<64x64xf32>
    %cst_9 = arith.constant 1.000000e+00 : f32
    %17 = vector.broadcast %cst_9 : f32 to vector<64x64xf32>
    %18 = arith.addf %17, %16 : vector<64x64xf32>
    %19 = arith.mulf %8, %18 : vector<64x64xf32>
    %20 = arith.truncf %19 : vector<64x64xf32> to vector<64x64xbf16>
    %c16 = arith.constant 16 : index
    %c0_10 = arith.constant 0 : index
    %21 = vector.load %arg10[%c16, %c0_10] : memref<96x64xbf16, #tpu.memory_space<vmem>>, vector<64x64xbf16>
    tpu.vector_store %arg10[%c16, %c0_10], %20 {strides = array<i32>} : memref<96x64xbf16, #tpu.memory_space<vmem>>, vector<64x64xbf16>,
    %c0_i32 = arith.constant 0 : i32
    %22 = arith.cmpi sgt, %arg1, %c0_i32 : i32
    %23 = arith.extui %22 : i1 to i32
    %24 = arith.sitofp %23 : i32 to f32
    %c0_i32_11 = arith.constant 0 : i32
    %25 = arith.cmpi slt, %arg1, %c0_i32_11 : i32
    %26 = arith.extui %25 : i1 to i32
    %27 = arith.sitofp %26 : i32 to f32
    %cst_12 = arith.constant 0.000000e+00 : bf16
    %28 = vector.broadcast %cst_12 : bf16 to vector<8x64xbf16>
    %c0_13 = arith.constant 0 : index
    %c0_14 = arith.constant 0 : index
    %29 = vector.load %arg10[%c0_13, %c0_14] : memref<96x64xbf16, #tpu.memory_space<vmem>>, vector<8x64xbf16>
    tpu.vector_store %arg10[%c0_13, %c0_14], %28 {strides = array<i32>} : memref<96x64xbf16, #tpu.memory_space<vmem>>, vector<8x64xbf16>,
    %c0_15 = arith.constant 0 : index
    %c0_16 = arith.constant 0 : index
    %c0_17 = arith.constant 0 : index
    %30 = vector.load %arg3[%c0_15, %c0_16, %c0_17] : memref<1x8x64xbf16, #tpu.memory_space<vmem>>, vector<1x8x64xbf16>
    %31 = vector.shape_cast %30 : vector<1x8x64xbf16> to vector<8x64xbf16>
    %cst_18 = arith.constant dense<0.000000e+00> : vector<8x64xf32>
    %32 = tpu.matmul %31, %0, %cst_18 {dimension_numbers = #tpu.dot_dimension_numbers<[1], [0], [0], [1], [0, 0, 1, 1], [], []>} : vector<8x64xbf16>, vector<64x64xbf16>, vector<8x64xf32> -> vector<8x64xf32>
    %33 = vector.broadcast %1 : vector<1x64xf32> to vector<8x64xf32>
    %34 = arith.addf %32, %33 : vector<8x64xf32>
    %cst_19 = arith.constant 5.000000e-01 : f32
    %35 = vector.broadcast %cst_19 : f32 to vector<8x64xf32>
    %36 = arith.mulf %35, %34 : vector<8x64xf32>
    %cst_20 = arith.constant 4.471500e-02 : f32
    %37 = vector.broadcast %cst_20 : f32 to vector<8x64xf32>
    %38 = arith.mulf %37, %34 : vector<8x64xf32>
    %39 = arith.mulf %38, %34 : vector<8x64xf32>
    %40 = arith.mulf %39, %34 : vector<8x64xf32>
    %41 = arith.addf %34, %40 : vector<8x64xf32>
    %cst_21 = arith.constant 0.797884583 : f32
    %42 = vector.broadcast %cst_21 : f32 to vector<8x64xf32>
    %43 = arith.mulf %42, %41 : vector<8x64xf32>
    %44 = math.tanh %43 : vector<8x64xf32>
    %cst_22 = arith.constant 1.000000e+00 : f32
    %45 = vector.broadcast %cst_22 : f32 to vector<8x64xf32>
    %46 = arith.addf %45, %44 : vector<8x64xf32>
    %47 = arith.mulf %36, %46 : vector<8x64xf32>
    %48 = vector.broadcast %24 : f32 to vector<8x64xf32>
    %49 = arith.mulf %47, %48 : vector<8x64xf32>
    %50 = arith.truncf %49 : vector<8x64xf32> to vector<8x64xbf16>
    %c8 = arith.constant 8 : index
    %c0_23 = arith.constant 0 : index
    %51 = vector.load %arg10[%c8, %c0_23] : memref<96x64xbf16, #tpu.memory_space<vmem>>, vector<8x64xbf16>
    tpu.vector_store %arg10[%c8, %c0_23], %50 {strides = array<i32>} : memref<96x64xbf16, #tpu.memory_space<vmem>>, vector<8x64xbf16>,
    %c0_24 = arith.constant 0 : index
    %c0_25 = arith.constant 0 : index
    %c0_26 = arith.constant 0 : index
    %52 = vector.load %arg4[%c0_24, %c0_25, %c0_26] : memref<1x8x64xbf16, #tpu.memory_space<vmem>>, vector<1x8x64xbf16>
    %53 = vector.shape_cast %52 : vector<1x8x64xbf16> to vector<8x64xbf16>
    %cst_27 = arith.constant dense<0.000000e+00> : vector<8x64xf32>
    %54 = tpu.matmul %53, %0, %cst_27 {dimension_numbers = #tpu.dot_dimension_numbers<[1], [0], [0], [1], [0, 0, 1, 1], [], []>} : vector<8x64xbf16>, vector<64x64xbf16>, vector<8x64xf32> -> vector<8x64xf32>
    %55 = vector.broadcast %1 : vector<1x64xf32> to vector<8x64xf32>
    %56 = arith.addf %54, %55 : vector<8x64xf32>
    %cst_28 = arith.constant 5.000000e-01 : f32
    %57 = vector.broadcast %cst_28 : f32 to vector<8x64xf32>
    %58 = arith.mulf %57, %56 : vector<8x64xf32>
    %cst_29 = arith.constant 4.471500e-02 : f32
    %59 = vector.broadcast %cst_29 : f32 to vector<8x64xf32>
    %60 = arith.mulf %59, %56 : vector<8x64xf32>
    %61 = arith.mulf %60, %56 : vector<8x64xf32>
    %62 = arith.mulf %61, %56 : vector<8x64xf32>
    %63 = arith.addf %56, %62 : vector<8x64xf32>
    %cst_30 = arith.constant 0.797884583 : f32
    %64 = vector.broadcast %cst_30 : f32 to vector<8x64xf32>
    %65 = arith.mulf %64, %63 : vector<8x64xf32>
    %66 = math.tanh %65 : vector<8x64xf32>
    %cst_31 = arith.constant 1.000000e+00 : f32
    %67 = vector.broadcast %cst_31 : f32 to vector<8x64xf32>
    %68 = arith.addf %67, %66 : vector<8x64xf32>
    %69 = arith.mulf %58, %68 : vector<8x64xf32>
    %70 = vector.broadcast %27 : f32 to vector<8x64xf32>
    %71 = arith.mulf %69, %70 : vector<8x64xf32>
    %72 = arith.truncf %71 : vector<8x64xf32> to vector<8x64xbf16>
    %c80 = arith.constant 80 : index
    %c0_32 = arith.constant 0 : index
    %73 = vector.load %arg10[%c80, %c0_32] : memref<96x64xbf16, #tpu.memory_space<vmem>>, vector<8x64xbf16>
    tpu.vector_store %arg10[%c80, %c0_32], %72 {strides = array<i32>} : memref<96x64xbf16, #tpu.memory_space<vmem>>, vector<8x64xbf16>,
    %cst_33 = arith.constant 0.000000e+00 : bf16
    %74 = vector.broadcast %cst_33 : bf16 to vector<8x64xbf16>
    %c88 = arith.constant 88 : index
    %c0_34 = arith.constant 0 : index
    %75 = vector.load %arg10[%c88, %c0_34] : memref<96x64xbf16, #tpu.memory_space<vmem>>, vector<8x64xbf16>
    tpu.vector_store %arg10[%c88, %c0_34], %74 {strides = array<i32>} : memref<96x64xbf16, #tpu.memory_space<vmem>>, vector<8x64xbf16>,
    %76 = tpu.iota {dimensions = array<i32: 0>} : vector<64x1xi32>
    %c8_i32 = arith.constant 8 : i32
    %c0_i32_35 = arith.constant 0 : i32
    %77 = arith.cmpi eq, %c8_i32, %c0_i32_35 : i32
    %c1_i32 = arith.constant 1 : i32
    %78 = arith.select %77, %c1_i32, %c8_i32 : i32
    %79 = vector.broadcast %78 : i32 to vector<64x1xi32>
    %80 = arith.remsi %76, %79 : vector<64x1xi32>
    %c0_i32_36 = arith.constant 0 : i32
    %81 = vector.broadcast %c0_i32_36 : i32 to vector<64x1xi32>
    %82 = arith.cmpi ne, %80, %81 : vector<64x1xi32>
    %c0_i32_37 = arith.constant 0 : i32
    %83 = vector.broadcast %c0_i32_37 : i32 to vector<64x1xi32>
    %84 = arith.cmpi slt, %80, %83 : vector<64x1xi32>
    %c0_i32_38 = arith.constant 0 : i32
    %85 = arith.cmpi slt, %78, %c0_i32_38 : i32
    %86 = vector.broadcast %85 : i1 to vector<64x1xi1>
    %87 = vector.broadcast %86 : vector<64x1xi1> to vector<64x1xi1>
    %88 = arith.xori %84, %87 : vector<64x1xi1>
    %89 = arith.andi %88, %82 : vector<64x1xi1>
    %90 = vector.broadcast %78 : i32 to vector<64x1xi32>
    %91 = arith.addi %80, %90 : vector<64x1xi32>
    %92 = arith.select %89, %91, %80 : vector<64x1xi1>, vector<64x1xi32>
    %c0_i32_39 = arith.constant 0 : i32
    %93 = vector.broadcast %c0_i32_39 : i32 to vector<64x1xi32>
    %94 = arith.cmpi sgt, %92, %93 : vector<64x1xi32>
    %95 = arith.extui %94 : vector<64x1xi1> to vector<64x1xi32>
    %96 = arith.sitofp %95 : vector<64x1xi32> to vector<64x1xf32>
    %97 = arith.truncf %96 : vector<64x1xf32> to vector<64x1xbf16>
    %c7_i32 = arith.constant 7 : i32
    %98 = vector.broadcast %c7_i32 : i32 to vector<64x1xi32>
    %99 = arith.cmpi slt, %92, %98 : vector<64x1xi32>
    %100 = arith.extui %99 : vector<64x1xi1> to vector<64x1xi32>
    %101 = arith.sitofp %100 : vector<64x1xi32> to vector<64x1xf32>
    %102 = arith.truncf %101 : vector<64x1xf32> to vector<64x1xbf16>
    %cst_40 = arith.constant 0.000000e+00 : f32
    %103 = vector.broadcast %cst_40 : f32 to vector<64x64xf32>
    %c7 = arith.constant 7 : index
    %c0_41 = arith.constant 0 : index
    %104 = vector.load %arg10[%c7, %c0_41] : memref<96x64xbf16, #tpu.memory_space<vmem>>, vector<64x64xbf16>
    %105 = vector.broadcast %97 : vector<64x1xbf16> to vector<64x64xbf16>
    %106 = arith.mulf %104, %105 : vector<64x64xbf16>
    %c0_42 = arith.constant 0 : index
    %c0_43 = arith.constant 0 : index
    %c0_44 = arith.constant 0 : index
    %107 = vector.load %arg7[%c0_42, %c0_43, %c0_44] : memref<9x64x64xbf16, #tpu.memory_space<vmem>>, vector<1x64x64xbf16>
    %108 = vector.shape_cast %107 : vector<1x64x64xbf16> to vector<64x64xbf16>
    %cst_45 = arith.constant dense<0.000000e+00> : vector<64x64xf32>
    %109 = tpu.matmul %106, %108, %cst_45 {dimension_numbers = #tpu.dot_dimension_numbers<[1], [0], [0], [1], [0, 0, 1, 1], [], []>} : vector<64x64xbf16>, vector<64x64xbf16>, vector<64x64xf32> -> vector<64x64xf32>
    %110 = arith.addf %103, %109 : vector<64x64xf32>
    %c8_46 = arith.constant 8 : index
    %c0_47 = arith.constant 0 : index
    %111 = vector.load %arg10[%c8_46, %c0_47] : memref<96x64xbf16, #tpu.memory_space<vmem>>, vector<64x64xbf16>
    %c1 = arith.constant 1 : index
    %c0_48 = arith.constant 0 : index
    %c0_49 = arith.constant 0 : index
    %112 = vector.load %arg7[%c1, %c0_48, %c0_49] : memref<9x64x64xbf16, #tpu.memory_space<vmem>>, vector<1x64x64xbf16>
    %113 = vector.shape_cast %112 : vector<1x64x64xbf16> to vector<64x64xbf16>
    %cst_50 = arith.constant dense<0.000000e+00> : vector<64x64xf32>
    %114 = tpu.matmul %111, %113, %cst_50 {dimension_numbers = #tpu.dot_dimension_numbers<[1], [0], [0], [1], [0, 0, 1, 1], [], []>} : vector<64x64xbf16>, vector<64x64xbf16>, vector<64x64xf32> -> vector<64x64xf32>
    %115 = arith.addf %110, %114 : vector<64x64xf32>
    %c9 = arith.constant 9 : index
    %c0_51 = arith.constant 0 : index
    %116 = vector.load %arg10[%c9, %c0_51] : memref<96x64xbf16, #tpu.memory_space<vmem>>, vector<64x64xbf16>
    %117 = vector.broadcast %102 : vector<64x1xbf16> to vector<64x64xbf16>
    %118 = arith.mulf %116, %117 : vector<64x64xbf16>
    %c2 = arith.constant 2 : index
    %c0_52 = arith.constant 0 : index
    %c0_53 = arith.constant 0 : index
    %119 = vector.load %arg7[%c2, %c0_52, %c0_53] : memref<9x64x64xbf16, #tpu.memory_space<vmem>>, vector<1x64x64xbf16>
    %120 = vector.shape_cast %119 : vector<1x64x64xbf16> to vector<64x64xbf16>
    %cst_54 = arith.constant dense<0.000000e+00> : vector<64x64xf32>
    %121 = tpu.matmul %118, %120, %cst_54 {dimension_numbers = #tpu.dot_dimension_numbers<[1], [0], [0], [1], [0, 0, 1, 1], [], []>} : vector<64x64xbf16>, vector<64x64xbf16>, vector<64x64xf32> -> vector<64x64xf32>
    %122 = arith.addf %115, %121 : vector<64x64xf32>
    %c15 = arith.constant 15 : index
    %c0_55 = arith.constant 0 : index
    %123 = vector.load %arg10[%c15, %c0_55] : memref<96x64xbf16, #tpu.memory_space<vmem>>, vector<64x64xbf16>
    %124 = vector.broadcast %97 : vector<64x1xbf16> to vector<64x64xbf16>
    %125 = arith.mulf %123, %124 : vector<64x64xbf16>
    %c3 = arith.constant 3 : index
    %c0_56 = arith.constant 0 : index
    %c0_57 = arith.constant 0 : index
    %126 = vector.load %arg7[%c3, %c0_56, %c0_57] : memref<9x64x64xbf16, #tpu.memory_space<vmem>>, vector<1x64x64xbf16>
    %127 = vector.shape_cast %126 : vector<1x64x64xbf16> to vector<64x64xbf16>
    %cst_58 = arith.constant dense<0.000000e+00> : vector<64x64xf32>
    %128 = tpu.matmul %125, %127, %cst_58 {dimension_numbers = #tpu.dot_dimension_numbers<[1], [0], [0], [1], [0, 0, 1, 1], [], []>} : vector<64x64xbf16>, vector<64x64xbf16>, vector<64x64xf32> -> vector<64x64xf32>
    %129 = arith.addf %122, %128 : vector<64x64xf32>
    %c16_59 = arith.constant 16 : index
    %c0_60 = arith.constant 0 : index
    %130 = vector.load %arg10[%c16_59, %c0_60] : memref<96x64xbf16, #tpu.memory_space<vmem>>, vector<64x64xbf16>
    %c4 = arith.constant 4 : index
    %c0_61 = arith.constant 0 : index
    %c0_62 = arith.constant 0 : index
    %131 = vector.load %arg7[%c4, %c0_61, %c0_62] : memref<9x64x64xbf16, #tpu.memory_space<vmem>>, vector<1x64x64xbf16>
    %132 = vector.shape_cast %131 : vector<1x64x64xbf16> to vector<64x64xbf16>
    %cst_63 = arith.constant dense<0.000000e+00> : vector<64x64xf32>
    %133 = tpu.matmul %130, %132, %cst_63 {dimension_numbers = #tpu.dot_dimension_numbers<[1], [0], [0], [1], [0, 0, 1, 1], [], []>} : vector<64x64xbf16>, vector<64x64xbf16>, vector<64x64xf32> -> vector<64x64xf32>
    %134 = arith.addf %129, %133 : vector<64x64xf32>
    %c17 = arith.constant 17 : index
    %c0_64 = arith.constant 0 : index
    %135 = vector.load %arg10[%c17, %c0_64] : memref<96x64xbf16, #tpu.memory_space<vmem>>, vector<64x64xbf16>
    %136 = vector.broadcast %102 : vector<64x1xbf16> to vector<64x64xbf16>
    %137 = arith.mulf %135, %136 : vector<64x64xbf16>
    %c5 = arith.constant 5 : index
    %c0_65 = arith.constant 0 : index
    %c0_66 = arith.constant 0 : index
    %138 = vector.load %arg7[%c5, %c0_65, %c0_66] : memref<9x64x64xbf16, #tpu.memory_space<vmem>>, vector<1x64x64xbf16>
    %139 = vector.shape_cast %138 : vector<1x64x64xbf16> to vector<64x64xbf16>
    %cst_67 = arith.constant dense<0.000000e+00> : vector<64x64xf32>
    %140 = tpu.matmul %137, %139, %cst_67 {dimension_numbers = #tpu.dot_dimension_numbers<[1], [0], [0], [1], [0, 0, 1, 1], [], []>} : vector<64x64xbf16>, vector<64x64xbf16>, vector<64x64xf32> -> vector<64x64xf32>
    %141 = arith.addf %134, %140 : vector<64x64xf32>
    %c23 = arith.constant 23 : index
    %c0_68 = arith.constant 0 : index
    %142 = vector.load %arg10[%c23, %c0_68] : memref<96x64xbf16, #tpu.memory_space<vmem>>, vector<64x64xbf16>
    %143 = vector.broadcast %97 : vector<64x1xbf16> to vector<64x64xbf16>
    %144 = arith.mulf %142, %143 : vector<64x64xbf16>
    %c6 = arith.constant 6 : index
    %c0_69 = arith.constant 0 : index
    %c0_70 = arith.constant 0 : index
    %145 = vector.load %arg7[%c6, %c0_69, %c0_70] : memref<9x64x64xbf16, #tpu.memory_space<vmem>>, vector<1x64x64xbf16>
    %146 = vector.shape_cast %145 : vector<1x64x64xbf16> to vector<64x64xbf16>
    %cst_71 = arith.constant dense<0.000000e+00> : vector<64x64xf32>
    %147 = tpu.matmul %144, %146, %cst_71 {dimension_numbers = #tpu.dot_dimension_numbers<[1], [0], [0], [1], [0, 0, 1, 1], [], []>} : vector<64x64xbf16>, vector<64x64xbf16>, vector<64x64xf32> -> vector<64x64xf32>
    %148 = arith.addf %141, %147 : vector<64x64xf32>
    %c24 = arith.constant 24 : index
    %c0_72 = arith.constant 0 : index
    %149 = vector.load %arg10[%c24, %c0_72] : memref<96x64xbf16, #tpu.memory_space<vmem>>, vector<64x64xbf16>
    %c7_73 = arith.constant 7 : index
    %c0_74 = arith.constant 0 : index
    %c0_75 = arith.constant 0 : index
    %150 = vector.load %arg7[%c7_73, %c0_74, %c0_75] : memref<9x64x64xbf16, #tpu.memory_space<vmem>>, vector<1x64x64xbf16>
    %151 = vector.shape_cast %150 : vector<1x64x64xbf16> to vector<64x64xbf16>
    %cst_76 = arith.constant dense<0.000000e+00> : vector<64x64xf32>
    %152 = tpu.matmul %149, %151, %cst_76 {dimension_numbers = #tpu.dot_dimension_numbers<[1], [0], [0], [1], [0, 0, 1, 1], [], []>} : vector<64x64xbf16>, vector<64x64xbf16>, vector<64x64xf32> -> vector<64x64xf32>
    %153 = arith.addf %148, %152 : vector<64x64xf32>
    %c25 = arith.constant 25 : index
    %c0_77 = arith.constant 0 : index
    %154 = vector.load %arg10[%c25, %c0_77] : memref<96x64xbf16, #tpu.memory_space<vmem>>, vector<64x64xbf16>
    %155 = vector.broadcast %102 : vector<64x1xbf16> to vector<64x64xbf16>
    %156 = arith.mulf %154, %155 : vector<64x64xbf16>
    %c8_78 = arith.constant 8 : index
    %c0_79 = arith.constant 0 : index
    %c0_80 = arith.constant 0 : index
    %157 = vector.load %arg7[%c8_78, %c0_79, %c0_80] : memref<9x64x64xbf16, #tpu.memory_space<vmem>>, vector<1x64x64xbf16>
    %158 = vector.shape_cast %157 : vector<1x64x64xbf16> to vector<64x64xbf16>
    %cst_81 = arith.constant dense<0.000000e+00> : vector<64x64xf32>
    %159 = tpu.matmul %156, %158, %cst_81 {dimension_numbers = #tpu.dot_dimension_numbers<[1], [0], [0], [1], [0, 0, 1, 1], [], []>} : vector<64x64xbf16>, vector<64x64xbf16>, vector<64x64xf32> -> vector<64x64xf32>
    %160 = arith.addf %153, %159 : vector<64x64xf32>
    %c0_82 = arith.constant 0 : index
    %c0_83 = arith.constant 0 : index
    %161 = vector.load %arg8[%c0_82, %c0_83] : memref<1x64xf32, #tpu.memory_space<vmem>>, vector<1x64xf32>
    %162 = vector.broadcast %161 : vector<1x64xf32> to vector<64x64xf32>
    %163 = arith.addf %160, %162 : vector<64x64xf32>
    %164 = arith.truncf %163 : vector<64x64xf32> to vector<64x64xbf16>
    %c0_84 = arith.constant 0 : index
    %c0_85 = arith.constant 0 : index
    %c0_86 = arith.constant 0 : index
    %165 = vector.load %arg9[%c0_84, %c0_85, %c0_86] : memref<1x64x64xbf16, #tpu.memory_space<vmem>>, vector<1x64x64xbf16>
    %166 = vector.shape_cast %165 : vector<1x64x64xbf16> to vector<64x64xbf16>
    %167 = vector.shape_cast %164 : vector<64x64xbf16> to vector<1x64x64xbf16>
    tpu.vector_store %arg9[%c0_84, %c0_85, %c0_86], %167 {strides = array<i32>} : memref<1x64x64xbf16, #tpu.memory_space<vmem>>, vector<1x64x64xbf16>,
    return
  }
  func.func @transform_0(%arg0: i32, %arg1: i32) -> (i32, i32, i32) {
    %c0_i32 = arith.constant 0 : i32
    %c0_i32_0 = arith.constant 0 : i32
    return %arg0, %arg1, %c0_i32 : i32, i32, i32
  }
  func.func @transform_1(%arg0: i32, %arg1: i32) -> (i32, i32, i32) {
    %c8_i32 = arith.constant 8 : i32
    %0 = arith.muli %arg1, %c8_i32 : i32
    %c1_i32 = arith.constant 1 : i32
    %1 = arith.subi %0, %c1_i32 : i32
    %c0_i32 = arith.constant 0 : i32
    %2 = arith.maxsi %1, %c0_i32 : i32
    %c0_i32_0 = arith.constant 0 : i32
    %c0_i32_1 = arith.constant 0 : i32
    return %arg0, %2, %c0_i32_0 : i32, i32, i32
  }
  func.func @transform_2(%arg0: i32, %arg1: i32) -> (i32, i32, i32) {
    %c1_i32 = arith.constant 1 : i32
    %0 = arith.addi %arg1, %c1_i32 : i32
    %c8_i32 = arith.constant 8 : i32
    %1 = arith.muli %0, %c8_i32 : i32
    %c7_i32 = arith.constant 7 : i32
    %2 = arith.minsi %1, %c7_i32 : i32
    %c0_i32 = arith.constant 0 : i32
    %c0_i32_0 = arith.constant 0 : i32
    return %arg0, %2, %c0_i32 : i32, i32, i32
  }
  func.func @transform_3(%arg0: i32, %arg1: i32) -> (i32, i32) {
    %c0_i32 = arith.constant 0 : i32
    %c0_i32_0 = arith.constant 0 : i32
    %c0_i32_1 = arith.constant 0 : i32
    return %c0_i32, %c0_i32_0 : i32, i32
  }
  func.func @transform_4(%arg0: i32, %arg1: i32) -> (i32, i32) {
    %c0_i32 = arith.constant 0 : i32
    %c0_i32_0 = arith.constant 0 : i32
    %c0_i32_1 = arith.constant 0 : i32
    return %c0_i32, %c0_i32_0 : i32, i32
  }
  func.func @transform_5(%arg0: i32, %arg1: i32) -> (i32, i32, i32) {
    %c0_i32 = arith.constant 0 : i32
    %c0_i32_0 = arith.constant 0 : i32
    %c0_i32_1 = arith.constant 0 : i32
    %c0_i32_2 = arith.constant 0 : i32
    return %c0_i32, %c0_i32_0, %c0_i32_1 : i32, i32, i32
  }
  func.func @transform_6(%arg0: i32, %arg1: i32) -> (i32, i32) {
    %c0_i32 = arith.constant 0 : i32
    %c0_i32_0 = arith.constant 0 : i32
    %c0_i32_1 = arith.constant 0 : i32
    return %c0_i32, %c0_i32_0 : i32, i32
  }
  func.func @transform_7(%arg0: i32, %arg1: i32) -> (i32, i32, i32) {
    %c0_i32 = arith.constant 0 : i32
    %c0_i32_0 = arith.constant 0 : i32
    return %arg0, %arg1, %c0_i32 : i32, i32, i32
  }
}

module attributes {stable_mosaic.version = 11 : i64} {
  func.func @_waveblock_kernel(%arg0: i32, %arg1: i32, %arg2: memref<1x64x64xbf16, #tpu.memory_space<vmem>>, %arg3: memref<1x8x64xbf16, #tpu.memory_space<vmem>>, %arg4: memref<1x8x64xbf16, #tpu.memory_space<vmem>>, %arg5: memref<64x64xbf16, #tpu.memory_space<vmem>>, %arg6: memref<1x64xf32, #tpu.memory_space<vmem>>, %arg7: memref<9x64x64xbf16, #tpu.memory_space<vmem>>, %arg8: memref<1x64xf32, #tpu.memory_space<vmem>>, %arg9: memref<1x64x64xbf16, #tpu.memory_space<vmem>>, %arg10: memref<96x64xbf16, #tpu.memory_space<vmem>>) attributes {dimension_semantics = [#tpu.dimension_semantics<parallel>, #tpu.dimension_semantics<arbitrary>], iteration_bounds = array<i64: 2, 1>, scalar_prefetch = 0 : i64, scratch_operands = 1 : i64, tpu.core_type = #tpu.core_type<tc>, window_params = [{transform_indices = @transform_0, window_bounds = array<i64: 1, 64, 64>}, {transform_indices = @transform_1, window_bounds = array<i64: 1, 8, 64>}, {transform_indices = @transform_2, window_bounds = array<i64: 1, 8, 64>}, {pipeline_mode = #tpu.pipeline_mode<synchronous>, transform_indices = @transform_3, window_bounds = array<i64: 64, 64>}, {pipeline_mode = #tpu.pipeline_mode<synchronous>, transform_indices = @transform_4, window_bounds = array<i64: 1, 64>}, {pipeline_mode = #tpu.pipeline_mode<synchronous>, transform_indices = @transform_5, window_bounds = array<i64: 9, 64, 64>}, {pipeline_mode = #tpu.pipeline_mode<synchronous>, transform_indices = @transform_6, window_bounds = array<i64: 1, 64>}, {transform_indices = @transform_7, window_bounds = array<i64: 1, 64, 64>}]} {
    %c0 = arith.constant 0 : index
    %c0_0 = arith.constant 0 : index
    %0 = vector.load %arg5[%c0, %c0_0] : memref<64x64xbf16, #tpu.memory_space<vmem>>, vector<64x64xbf16>
    %c0_1 = arith.constant 0 : index
    %c0_2 = arith.constant 0 : index
    %1 = vector.load %arg6[%c0_1, %c0_2] : memref<1x64xf32, #tpu.memory_space<vmem>>, vector<1x64xf32>
    %c0_3 = arith.constant 0 : index
    %c0_4 = arith.constant 0 : index
    %c0_5 = arith.constant 0 : index
    %2 = vector.load %arg2[%c0_3, %c0_4, %c0_5] : memref<1x64x64xbf16, #tpu.memory_space<vmem>>, vector<1x64x64xbf16>
    %3 = vector.shape_cast %2 : vector<1x64x64xbf16> to vector<64x64xbf16>
    %cst = arith.constant dense<0.000000e+00> : vector<64x64xf32>
    %4 = tpu.matmul %3, %0, %cst {dimension_numbers = #tpu.dot_dimension_numbers<[1], [0], [0], [1], [0, 0, 1, 1], [], []>} : vector<64x64xbf16>, vector<64x64xbf16>, vector<64x64xf32> -> vector<64x64xf32>
    %5 = vector.broadcast %1 : vector<1x64xf32> to vector<64x64xf32>
    %6 = arith.addf %4, %5 : vector<64x64xf32>
    %cst_6 = arith.constant 5.000000e-01 : f32
    %7 = vector.broadcast %cst_6 : f32 to vector<64x64xf32>
    %8 = arith.mulf %7, %6 : vector<64x64xf32>
    %cst_7 = arith.constant 4.471500e-02 : f32
    %9 = vector.broadcast %cst_7 : f32 to vector<64x64xf32>
    %10 = arith.mulf %9, %6 : vector<64x64xf32>
    %11 = arith.mulf %10, %6 : vector<64x64xf32>
    %12 = arith.mulf %11, %6 : vector<64x64xf32>
    %13 = arith.addf %6, %12 : vector<64x64xf32>
    %cst_8 = arith.constant 0.797884583 : f32
    %14 = vector.broadcast %cst_8 : f32 to vector<64x64xf32>
    %15 = arith.mulf %14, %13 : vector<64x64xf32>
    %16 = math.tanh %15 : vector<64x64xf32>
    %cst_9 = arith.constant 1.000000e+00 : f32
    %17 = vector.broadcast %cst_9 : f32 to vector<64x64xf32>
    %18 = arith.addf %17, %16 : vector<64x64xf32>
    %19 = arith.mulf %8, %18 : vector<64x64xf32>
    %20 = arith.truncf %19 : vector<64x64xf32> to vector<64x64xbf16>
    %c16 = arith.constant 16 : index
    %c0_10 = arith.constant 0 : index
    %21 = vector.load %arg10[%c16, %c0_10] : memref<96x64xbf16, #tpu.memory_space<vmem>>, vector<64x64xbf16>
    tpu.vector_store %arg10[%c16, %c0_10], %20 {strides = array<i32>} : memref<96x64xbf16, #tpu.memory_space<vmem>>, vector<64x64xbf16>,
    %c0_i32 = arith.constant 0 : i32
    %22 = arith.cmpi sgt, %arg1, %c0_i32 : i32
    %23 = arith.extui %22 : i1 to i32
    %24 = arith.sitofp %23 : i32 to f32
    %c0_i32_11 = arith.constant 0 : i32
    %25 = arith.cmpi slt, %arg1, %c0_i32_11 : i32
    %26 = arith.extui %25 : i1 to i32
    %27 = arith.sitofp %26 : i32 to f32
    %cst_12 = arith.constant 0.000000e+00 : bf16
    %28 = vector.broadcast %cst_12 : bf16 to vector<8x64xbf16>
    %c0_13 = arith.constant 0 : index
    %c0_14 = arith.constant 0 : index
    %29 = vector.load %arg10[%c0_13, %c0_14] : memref<96x64xbf16, #tpu.memory_space<vmem>>, vector<8x64xbf16>
    tpu.vector_store %arg10[%c0_13, %c0_14], %28 {strides = array<i32>} : memref<96x64xbf16, #tpu.memory_space<vmem>>, vector<8x64xbf16>,
    %c0_15 = arith.constant 0 : index
    %c0_16 = arith.constant 0 : index
    %c0_17 = arith.constant 0 : index
    %30 = vector.load %arg3[%c0_15, %c0_16, %c0_17] : memref<1x8x64xbf16, #tpu.memory_space<vmem>>, vector<1x8x64xbf16>
    %31 = vector.shape_cast %30 : vector<1x8x64xbf16> to vector<8x64xbf16>
    %cst_18 = arith.constant dense<0.000000e+00> : vector<8x64xf32>
    %32 = tpu.matmul %31, %0, %cst_18 {dimension_numbers = #tpu.dot_dimension_numbers<[1], [0], [0], [1], [0, 0, 1, 1], [], []>} : vector<8x64xbf16>, vector<64x64xbf16>, vector<8x64xf32> -> vector<8x64xf32>
    %33 = vector.broadcast %1 : vector<1x64xf32> to vector<8x64xf32>
    %34 = arith.addf %32, %33 : vector<8x64xf32>
    %cst_19 = arith.constant 5.000000e-01 : f32
    %35 = vector.broadcast %cst_19 : f32 to vector<8x64xf32>
    %36 = arith.mulf %35, %34 : vector<8x64xf32>
    %cst_20 = arith.constant 4.471500e-02 : f32
    %37 = vector.broadcast %cst_20 : f32 to vector<8x64xf32>
    %38 = arith.mulf %37, %34 : vector<8x64xf32>
    %39 = arith.mulf %38, %34 : vector<8x64xf32>
    %40 = arith.mulf %39, %34 : vector<8x64xf32>
    %41 = arith.addf %34, %40 : vector<8x64xf32>
    %cst_21 = arith.constant 0.797884583 : f32
    %42 = vector.broadcast %cst_21 : f32 to vector<8x64xf32>
    %43 = arith.mulf %42, %41 : vector<8x64xf32>
    %44 = math.tanh %43 : vector<8x64xf32>
    %cst_22 = arith.constant 1.000000e+00 : f32
    %45 = vector.broadcast %cst_22 : f32 to vector<8x64xf32>
    %46 = arith.addf %45, %44 : vector<8x64xf32>
    %47 = arith.mulf %36, %46 : vector<8x64xf32>
    %48 = vector.broadcast %24 : f32 to vector<8x64xf32>
    %49 = arith.mulf %47, %48 : vector<8x64xf32>
    %50 = arith.truncf %49 : vector<8x64xf32> to vector<8x64xbf16>
    %c8 = arith.constant 8 : index
    %c0_23 = arith.constant 0 : index
    %51 = vector.load %arg10[%c8, %c0_23] : memref<96x64xbf16, #tpu.memory_space<vmem>>, vector<8x64xbf16>
    tpu.vector_store %arg10[%c8, %c0_23], %50 {strides = array<i32>} : memref<96x64xbf16, #tpu.memory_space<vmem>>, vector<8x64xbf16>,
    %c0_24 = arith.constant 0 : index
    %c0_25 = arith.constant 0 : index
    %c0_26 = arith.constant 0 : index
    %52 = vector.load %arg4[%c0_24, %c0_25, %c0_26] : memref<1x8x64xbf16, #tpu.memory_space<vmem>>, vector<1x8x64xbf16>
    %53 = vector.shape_cast %52 : vector<1x8x64xbf16> to vector<8x64xbf16>
    %cst_27 = arith.constant dense<0.000000e+00> : vector<8x64xf32>
    %54 = tpu.matmul %53, %0, %cst_27 {dimension_numbers = #tpu.dot_dimension_numbers<[1], [0], [0], [1], [0, 0, 1, 1], [], []>} : vector<8x64xbf16>, vector<64x64xbf16>, vector<8x64xf32> -> vector<8x64xf32>
    %55 = vector.broadcast %1 : vector<1x64xf32> to vector<8x64xf32>
    %56 = arith.addf %54, %55 : vector<8x64xf32>
    %cst_28 = arith.constant 5.000000e-01 : f32
    %57 = vector.broadcast %cst_28 : f32 to vector<8x64xf32>
    %58 = arith.mulf %57, %56 : vector<8x64xf32>
    %cst_29 = arith.constant 4.471500e-02 : f32
    %59 = vector.broadcast %cst_29 : f32 to vector<8x64xf32>
    %60 = arith.mulf %59, %56 : vector<8x64xf32>
    %61 = arith.mulf %60, %56 : vector<8x64xf32>
    %62 = arith.mulf %61, %56 : vector<8x64xf32>
    %63 = arith.addf %56, %62 : vector<8x64xf32>
    %cst_30 = arith.constant 0.797884583 : f32
    %64 = vector.broadcast %cst_30 : f32 to vector<8x64xf32>
    %65 = arith.mulf %64, %63 : vector<8x64xf32>
    %66 = math.tanh %65 : vector<8x64xf32>
    %cst_31 = arith.constant 1.000000e+00 : f32
    %67 = vector.broadcast %cst_31 : f32 to vector<8x64xf32>
    %68 = arith.addf %67, %66 : vector<8x64xf32>
    %69 = arith.mulf %58, %68 : vector<8x64xf32>
    %70 = vector.broadcast %27 : f32 to vector<8x64xf32>
    %71 = arith.mulf %69, %70 : vector<8x64xf32>
    %72 = arith.truncf %71 : vector<8x64xf32> to vector<8x64xbf16>
    %c80 = arith.constant 80 : index
    %c0_32 = arith.constant 0 : index
    %73 = vector.load %arg10[%c80, %c0_32] : memref<96x64xbf16, #tpu.memory_space<vmem>>, vector<8x64xbf16>
    tpu.vector_store %arg10[%c80, %c0_32], %72 {strides = array<i32>} : memref<96x64xbf16, #tpu.memory_space<vmem>>, vector<8x64xbf16>,
    %cst_33 = arith.constant 0.000000e+00 : bf16
    %74 = vector.broadcast %cst_33 : bf16 to vector<8x64xbf16>
    %c88 = arith.constant 88 : index
    %c0_34 = arith.constant 0 : index
    %75 = vector.load %arg10[%c88, %c0_34] : memref<96x64xbf16, #tpu.memory_space<vmem>>, vector<8x64xbf16>
    tpu.vector_store %arg10[%c88, %c0_34], %74 {strides = array<i32>} : memref<96x64xbf16, #tpu.memory_space<vmem>>, vector<8x64xbf16>,
    %76 = tpu.iota {dimensions = array<i32: 0>} : vector<64x1xi32>
    %c8_i32 = arith.constant 8 : i32
    %c0_i32_35 = arith.constant 0 : i32
    %77 = arith.cmpi eq, %c8_i32, %c0_i32_35 : i32
    %c1_i32 = arith.constant 1 : i32
    %78 = arith.select %77, %c1_i32, %c8_i32 : i32
    %79 = vector.broadcast %78 : i32 to vector<64x1xi32>
    %80 = arith.remsi %76, %79 : vector<64x1xi32>
    %c0_i32_36 = arith.constant 0 : i32
    %81 = vector.broadcast %c0_i32_36 : i32 to vector<64x1xi32>
    %82 = arith.cmpi ne, %80, %81 : vector<64x1xi32>
    %c0_i32_37 = arith.constant 0 : i32
    %83 = vector.broadcast %c0_i32_37 : i32 to vector<64x1xi32>
    %84 = arith.cmpi slt, %80, %83 : vector<64x1xi32>
    %c0_i32_38 = arith.constant 0 : i32
    %85 = arith.cmpi slt, %78, %c0_i32_38 : i32
    %86 = vector.broadcast %85 : i1 to vector<64x1xi1>
    %87 = vector.broadcast %86 : vector<64x1xi1> to vector<64x1xi1>
    %88 = arith.xori %84, %87 : vector<64x1xi1>
    %89 = arith.andi %88, %82 : vector<64x1xi1>
    %90 = vector.broadcast %78 : i32 to vector<64x1xi32>
    %91 = arith.addi %80, %90 : vector<64x1xi32>
    %92 = arith.select %89, %91, %80 : vector<64x1xi1>, vector<64x1xi32>
    %c0_i32_39 = arith.constant 0 : i32
    %93 = vector.broadcast %c0_i32_39 : i32 to vector<64x1xi32>
    %94 = arith.cmpi sgt, %92, %93 : vector<64x1xi32>
    %95 = arith.extui %94 : vector<64x1xi1> to vector<64x1xi32>
    %96 = arith.sitofp %95 : vector<64x1xi32> to vector<64x1xf32>
    %97 = arith.truncf %96 : vector<64x1xf32> to vector<64x1xbf16>
    %c7_i32 = arith.constant 7 : i32
    %98 = vector.broadcast %c7_i32 : i32 to vector<64x1xi32>
    %99 = arith.cmpi slt, %92, %98 : vector<64x1xi32>
    %100 = arith.extui %99 : vector<64x1xi1> to vector<64x1xi32>
    %101 = arith.sitofp %100 : vector<64x1xi32> to vector<64x1xf32>
    %102 = arith.truncf %101 : vector<64x1xf32> to vector<64x1xbf16>
    %cst_40 = arith.constant 0.000000e+00 : f32
    %103 = vector.broadcast %cst_40 : f32 to vector<64x64xf32>
    %c7 = arith.constant 7 : index
    %c0_41 = arith.constant 0 : index
    %104 = vector.load %arg10[%c7, %c0_41] : memref<96x64xbf16, #tpu.memory_space<vmem>>, vector<64x64xbf16>
    %105 = vector.broadcast %97 : vector<64x1xbf16> to vector<64x64xbf16>
    %106 = arith.mulf %104, %105 : vector<64x64xbf16>
    %c0_42 = arith.constant 0 : index
    %c0_43 = arith.constant 0 : index
    %c0_44 = arith.constant 0 : index
    %107 = vector.load %arg7[%c0_42, %c0_43, %c0_44] : memref<9x64x64xbf16, #tpu.memory_space<vmem>>, vector<1x64x64xbf16>
    %108 = vector.shape_cast %107 : vector<1x64x64xbf16> to vector<64x64xbf16>
    %cst_45 = arith.constant dense<0.000000e+00> : vector<64x64xf32>
    %109 = tpu.matmul %106, %108, %cst_45 {dimension_numbers = #tpu.dot_dimension_numbers<[1], [0], [0], [1], [0, 0, 1, 1], [], []>} : vector<64x64xbf16>, vector<64x64xbf16>, vector<64x64xf32> -> vector<64x64xf32>
    %110 = arith.addf %103, %109 : vector<64x64xf32>
    %c8_46 = arith.constant 8 : index
    %c0_47 = arith.constant 0 : index
    %111 = vector.load %arg10[%c8_46, %c0_47] : memref<96x64xbf16, #tpu.memory_space<vmem>>, vector<64x64xbf16>
    %c1 = arith.constant 1 : index
    %c0_48 = arith.constant 0 : index
    %c0_49 = arith.constant 0 : index
    %112 = vector.load %arg7[%c1, %c0_48, %c0_49] : memref<9x64x64xbf16, #tpu.memory_space<vmem>>, vector<1x64x64xbf16>
    %113 = vector.shape_cast %112 : vector<1x64x64xbf16> to vector<64x64xbf16>
    %cst_50 = arith.constant dense<0.000000e+00> : vector<64x64xf32>
    %114 = tpu.matmul %111, %113, %cst_50 {dimension_numbers = #tpu.dot_dimension_numbers<[1], [0], [0], [1], [0, 0, 1, 1], [], []>} : vector<64x64xbf16>, vector<64x64xbf16>, vector<64x64xf32> -> vector<64x64xf32>
    %115 = arith.addf %110, %114 : vector<64x64xf32>
    %c9 = arith.constant 9 : index
    %c0_51 = arith.constant 0 : index
    %116 = vector.load %arg10[%c9, %c0_51] : memref<96x64xbf16, #tpu.memory_space<vmem>>, vector<64x64xbf16>
    %117 = vector.broadcast %102 : vector<64x1xbf16> to vector<64x64xbf16>
    %118 = arith.mulf %116, %117 : vector<64x64xbf16>
    %c2 = arith.constant 2 : index
    %c0_52 = arith.constant 0 : index
    %c0_53 = arith.constant 0 : index
    %119 = vector.load %arg7[%c2, %c0_52, %c0_53] : memref<9x64x64xbf16, #tpu.memory_space<vmem>>, vector<1x64x64xbf16>
    %120 = vector.shape_cast %119 : vector<1x64x64xbf16> to vector<64x64xbf16>
    %cst_54 = arith.constant dense<0.000000e+00> : vector<64x64xf32>
    %121 = tpu.matmul %118, %120, %cst_54 {dimension_numbers = #tpu.dot_dimension_numbers<[1], [0], [0], [1], [0, 0, 1, 1], [], []>} : vector<64x64xbf16>, vector<64x64xbf16>, vector<64x64xf32> -> vector<64x64xf32>
    %122 = arith.addf %115, %121 : vector<64x64xf32>
    %c15 = arith.constant 15 : index
    %c0_55 = arith.constant 0 : index
    %123 = vector.load %arg10[%c15, %c0_55] : memref<96x64xbf16, #tpu.memory_space<vmem>>, vector<64x64xbf16>
    %124 = vector.broadcast %97 : vector<64x1xbf16> to vector<64x64xbf16>
    %125 = arith.mulf %123, %124 : vector<64x64xbf16>
    %c3 = arith.constant 3 : index
    %c0_56 = arith.constant 0 : index
    %c0_57 = arith.constant 0 : index
    %126 = vector.load %arg7[%c3, %c0_56, %c0_57] : memref<9x64x64xbf16, #tpu.memory_space<vmem>>, vector<1x64x64xbf16>
    %127 = vector.shape_cast %126 : vector<1x64x64xbf16> to vector<64x64xbf16>
    %cst_58 = arith.constant dense<0.000000e+00> : vector<64x64xf32>
    %128 = tpu.matmul %125, %127, %cst_58 {dimension_numbers = #tpu.dot_dimension_numbers<[1], [0], [0], [1], [0, 0, 1, 1], [], []>} : vector<64x64xbf16>, vector<64x64xbf16>, vector<64x64xf32> -> vector<64x64xf32>
    %129 = arith.addf %122, %128 : vector<64x64xf32>
    %c16_59 = arith.constant 16 : index
    %c0_60 = arith.constant 0 : index
    %130 = vector.load %arg10[%c16_59, %c0_60] : memref<96x64xbf16, #tpu.memory_space<vmem>>, vector<64x64xbf16>
    %c4 = arith.constant 4 : index
    %c0_61 = arith.constant 0 : index
    %c0_62 = arith.constant 0 : index
    %131 = vector.load %arg7[%c4, %c0_61, %c0_62] : memref<9x64x64xbf16, #tpu.memory_space<vmem>>, vector<1x64x64xbf16>
    %132 = vector.shape_cast %131 : vector<1x64x64xbf16> to vector<64x64xbf16>
    %cst_63 = arith.constant dense<0.000000e+00> : vector<64x64xf32>
    %133 = tpu.matmul %130, %132, %cst_63 {dimension_numbers = #tpu.dot_dimension_numbers<[1], [0], [0], [1], [0, 0, 1, 1], [], []>} : vector<64x64xbf16>, vector<64x64xbf16>, vector<64x64xf32> -> vector<64x64xf32>
    %134 = arith.addf %129, %133 : vector<64x64xf32>
    %c17 = arith.constant 17 : index
    %c0_64 = arith.constant 0 : index
    %135 = vector.load %arg10[%c17, %c0_64] : memref<96x64xbf16, #tpu.memory_space<vmem>>, vector<64x64xbf16>
    %136 = vector.broadcast %102 : vector<64x1xbf16> to vector<64x64xbf16>
    %137 = arith.mulf %135, %136 : vector<64x64xbf16>
    %c5 = arith.constant 5 : index
    %c0_65 = arith.constant 0 : index
    %c0_66 = arith.constant 0 : index
    %138 = vector.load %arg7[%c5, %c0_65, %c0_66] : memref<9x64x64xbf16, #tpu.memory_space<vmem>>, vector<1x64x64xbf16>
    %139 = vector.shape_cast %138 : vector<1x64x64xbf16> to vector<64x64xbf16>
    %cst_67 = arith.constant dense<0.000000e+00> : vector<64x64xf32>
    %140 = tpu.matmul %137, %139, %cst_67 {dimension_numbers = #tpu.dot_dimension_numbers<[1], [0], [0], [1], [0, 0, 1, 1], [], []>} : vector<64x64xbf16>, vector<64x64xbf16>, vector<64x64xf32> -> vector<64x64xf32>
    %141 = arith.addf %134, %140 : vector<64x64xf32>
    %c23 = arith.constant 23 : index
    %c0_68 = arith.constant 0 : index
    %142 = vector.load %arg10[%c23, %c0_68] : memref<96x64xbf16, #tpu.memory_space<vmem>>, vector<64x64xbf16>
    %143 = vector.broadcast %97 : vector<64x1xbf16> to vector<64x64xbf16>
    %144 = arith.mulf %142, %143 : vector<64x64xbf16>
    %c6 = arith.constant 6 : index
    %c0_69 = arith.constant 0 : index
    %c0_70 = arith.constant 0 : index
    %145 = vector.load %arg7[%c6, %c0_69, %c0_70] : memref<9x64x64xbf16, #tpu.memory_space<vmem>>, vector<1x64x64xbf16>
    %146 = vector.shape_cast %145 : vector<1x64x64xbf16> to vector<64x64xbf16>
    %cst_71 = arith.constant dense<0.000000e+00> : vector<64x64xf32>
    %147 = tpu.matmul %144, %146, %cst_71 {dimension_numbers = #tpu.dot_dimension_numbers<[1], [0], [0], [1], [0, 0, 1, 1], [], []>} : vector<64x64xbf16>, vector<64x64xbf16>, vector<64x64xf32> -> vector<64x64xf32>
    %148 = arith.addf %141, %147 : vector<64x64xf32>
    %c24 = arith.constant 24 : index
    %c0_72 = arith.constant 0 : index
    %149 = vector.load %arg10[%c24, %c0_72] : memref<96x64xbf16, #tpu.memory_space<vmem>>, vector<64x64xbf16>
    %c7_73 = arith.constant 7 : index
    %c0_74 = arith.constant 0 : index
    %c0_75 = arith.constant 0 : index
    %150 = vector.load %arg7[%c7_73, %c0_74, %c0_75] : memref<9x64x64xbf16, #tpu.memory_space<vmem>>, vector<1x64x64xbf16>
    %151 = vector.shape_cast %150 : vector<1x64x64xbf16> to vector<64x64xbf16>
    %cst_76 = arith.constant dense<0.000000e+00> : vector<64x64xf32>
    %152 = tpu.matmul %149, %151, %cst_76 {dimension_numbers = #tpu.dot_dimension_numbers<[1], [0], [0], [1], [0, 0, 1, 1], [], []>} : vector<64x64xbf16>, vector<64x64xbf16>, vector<64x64xf32> -> vector<64x64xf32>
    %153 = arith.addf %148, %152 : vector<64x64xf32>
    %c25 = arith.constant 25 : index
    %c0_77 = arith.constant 0 : index
    %154 = vector.load %arg10[%c25, %c0_77] : memref<96x64xbf16, #tpu.memory_space<vmem>>, vector<64x64xbf16>
    %155 = vector.broadcast %102 : vector<64x1xbf16> to vector<64x64xbf16>
    %156 = arith.mulf %154, %155 : vector<64x64xbf16>
    %c8_78 = arith.constant 8 : index
    %c0_79 = arith.constant 0 : index
    %c0_80 = arith.constant 0 : index
    %157 = vector.load %arg7[%c8_78, %c0_79, %c0_80] : memref<9x64x64xbf16, #tpu.memory_space<vmem>>, vector<1x64x64xbf16>
    %158 = vector.shape_cast %157 : vector<1x64x64xbf16> to vector<64x64xbf16>
    %cst_81 = arith.constant dense<0.000000e+00> : vector<64x64xf32>
    %159 = tpu.matmul %156, %158, %cst_81 {dimension_numbers = #tpu.dot_dimension_numbers<[1], [0], [0], [1], [0, 0, 1, 1], [], []>} : vector<64x64xbf16>, vector<64x64xbf16>, vector<64x64xf32> -> vector<64x64xf32>
    %160 = arith.addf %153, %159 : vector<64x64xf32>
    %c0_82 = arith.constant 0 : index
    %c0_83 = arith.constant 0 : index
    %161 = vector.load %arg8[%c0_82, %c0_83] : memref<1x64xf32, #tpu.memory_space<vmem>>, vector<1x64xf32>
    %162 = vector.broadcast %161 : vector<1x64xf32> to vector<64x64xf32>
    %163 = arith.addf %160, %162 : vector<64x64xf32>
    %164 = arith.truncf %163 : vector<64x64xf32> to vector<64x64xbf16>
    %c0_84 = arith.constant 0 : index
    %c0_85 = arith.constant 0 : index
    %c0_86 = arith.constant 0 : index
    %165 = vector.load %arg9[%c0_84, %c0_85, %c0_86] : memref<1x64x64xbf16, #tpu.memory_space<vmem>>, vector<1x64x64xbf16>
    %166 = vector.shape_cast %165 : vector<1x64x64xbf16> to vector<64x64xbf16>
    %167 = vector.shape_cast %164 : vector<64x64xbf16> to vector<1x64x64xbf16>
    tpu.vector_store %arg9[%c0_84, %c0_85, %c0_86], %167 {strides = array<i32>} : memref<1x64x64xbf16, #tpu.memory_space<vmem>>, vector<1x64x64xbf16>,
    return
  }
  func.func @transform_0(%arg0: i32, %arg1: i32) -> (i32, i32, i32) {
    %c0_i32 = arith.constant 0 : i32
    %c0_i32_0 = arith.constant 0 : i32
    return %arg0, %arg1, %c0_i32 : i32, i32, i32
  }
  func.func @transform_1(%arg0: i32, %arg1: i32) -> (i32, i32, i32) {
    %c8_i32 = arith.constant 8 : i32
    %0 = arith.muli %arg1, %c8_i32 : i32
    %c1_i32 = arith.constant 1 : i32
    %1 = arith.subi %0, %c1_i32 : i32
    %c0_i32 = arith.constant 0 : i32
    %2 = arith.maxsi %1, %c0_i32 : i32
    %c0_i32_0 = arith.constant 0 : i32
    %c0_i32_1 = arith.constant 0 : i32
    return %arg0, %2, %c0_i32_0 : i32, i32, i32
  }
  func.func @transform_2(%arg0: i32, %arg1: i32) -> (i32, i32, i32) {
    %c1_i32 = arith.constant 1 : i32
    %0 = arith.addi %arg1, %c1_i32 : i32
    %c8_i32 = arith.constant 8 : i32
    %1 = arith.muli %0, %c8_i32 : i32
    %c7_i32 = arith.constant 7 : i32
    %2 = arith.minsi %1, %c7_i32 : i32
    %c0_i32 = arith.constant 0 : i32
    %c0_i32_0 = arith.constant 0 : i32
    return %arg0, %2, %c0_i32 : i32, i32, i32
  }
  func.func @transform_3(%arg0: i32, %arg1: i32) -> (i32, i32) {
    %c0_i32 = arith.constant 0 : i32
    %c0_i32_0 = arith.constant 0 : i32
    %c0_i32_1 = arith.constant 0 : i32
    return %c0_i32, %c0_i32_0 : i32, i32
  }
  func.func @transform_4(%arg0: i32, %arg1: i32) -> (i32, i32) {
    %c0_i32 = arith.constant 0 : i32
    %c0_i32_0 = arith.constant 0 : i32
    %c0_i32_1 = arith.constant 0 : i32
    return %c0_i32, %c0_i32_0 : i32, i32
  }
  func.func @transform_5(%arg0: i32, %arg1: i32) -> (i32, i32, i32) {
    %c0_i32 = arith.constant 0 : i32
    %c0_i32_0 = arith.constant 0 : i32
    %c0_i32_1 = arith.constant 0 : i32
    %c0_i32_2 = arith.constant 0 : i32
    return %c0_i32, %c0_i32_0, %c0_i32_1 : i32, i32, i32
  }
  func.func @transform_6(%arg0: i32, %arg1: i32) -> (i32, i32) {
    %c0_i32 = arith.constant 0 : i32
    %c0_i32_0 = arith.constant 0 : i32
    %c0_i32_1 = arith.constant 0 : i32
    return %c0_i32, %c0_i32_0 : i32, i32
  }
  func.func @transform_7(%arg0: i32, %arg1: i32) -> (i32, i32, i32) {
    %c0_i32 = arith.constant 0 : i32
    %c0_i32_0 = arith.constant 0 : i32
    return %arg0, %arg1, %c0_i32 : i32, i32, i32
  }
}

</mosaic_0001>

<bundles_post_ra>
// kernel: waveblock_forward.1
= control target key start
LH: loop header
LB: loop body
LE: loop exit
PB: predicated region body
PF: predicated region fallthrough
CT: control target
= control target key end

     0   :  { %s2884_s24 = smov 0   ;;  %s2886_s25 = smov 0   ;;  %s3709_s0 = inlined_call_operand.vmem [shape: bf16[2,64,64], index: 0, kind: input, shape index: {}, may-alias: {0,1,2}]   ;;  %s3710_s1 = inlined_call_operand.vmem [shape: bf16[2,64,64], index: 1, kind: input, shape index: {}, may-alias: {0,1,2}]   ;;  %s3711_s2 = inlined_call_operand.vmem [shape: bf16[2,64,64], index: 2, kind: input, shape index: {}, may-alias: {0,1,2}]   ;;  %s3712_s3 = inlined_call_operand.vmem [shape: bf16[64,64], index: 3, kind: input, shape index: {}]   ;;  %s3713_s4 = inlined_call_operand.vmem [shape: f32[1,64], index: 4, kind: input, shape index: {}]   ;;  %s3714_s5 = inlined_call_operand.vmem [shape: bf16[9,64,64], index: 5, kind: input, shape index: {}]   ;;  %s3715_s6 = inlined_call_operand.vmem [shape: f32[1,64], index: 6, kind: input, shape index: {}]   ;;  %s3716_s7 = inlined_call_operand.vmem [shape: bf16[2,64,64], index: 7, kind: output, shape index: {}]  }
   0x1   :  { %s2888_s26 = smov 0  }
   0x2 LB: > { %s29_s27 = sadd.s32 1, %s2836_s25  ;;  %p2293_p0 = scmp.ge.s32.totalorder %s2840_s26, 1  ;;  %s2840_s26 = sphi %s2888_s26, %s17_s26   ;;  %s2836_s25 = sphi %s2886_s25, %s3746_s25   ;;  %s2832_s24 = sphi %s2884_s24, %s3745_s24  }
   0x3   : > { %p31_p1 = scmp.ge.s32.totalorder %s29_s27, 2  ;;  %p320_p2 = scmp.lt.s32.totalorder %s2840_s26, 3 }
   0x5   : > { %s3748_s27 = smov (%p31_p1, %s29_s27), 0  ;;  %p321_p3 = pnand %p2293_p0, %p320_p2 }
   0x6   : > { %p385_p4 = scmp.lt.s32.totalorder (!%p321_p3), %s2832_s24, 1 }
   0x7   : > { %324 = sbr.rel (%p321_p3) target bundleno = 511 (0x1ff), region = 48 }
   0xc   : > { %v2658_v0 = vld [vmem:[%s3712_s3 + $0x18] sm:$0xff]  ;;  %v2657_v1 = vld [vmem:[%s3712_s3 + $0x10] sm:$0xff]  ;;  %s3750_s24 = smov (!%p385_p4, %s2832_s24), 1  ;;  %v2656_v2 = vld [vmem:[%s3712_s3 + $0x8] sm:$0xff]  ;;  %vm501_vm0 = vcmask 523264   ;;  %v700_v11 = vlaneseq  ;;  %vm623_vm1 = vcmask 519168  }
   0xd   : > { %518 = vmatpush.bf16.msra.mxu0 %v2658_v0  ;;  %2762 = vmatpush.bf16.msra.mxu1 %v2658_v0  ;;  %s2911_s11 = sshll.u32 %s3750_s24, 5  ;;  %v2655_v3 = vld [vmem:[%s3712_s3] sm:$0xff]  ;;  %v2674_v22 = vld [vmem:[%s3714_s5 + $0x38] sm:$0xff]  ;;  %v2842_v26 = vmov 0   ;;  %v2673_v38 = vld [vmem:[%s3714_s5 + $0x30] sm:$0xff]  ;;  %v2843_v43 = vmov 0.0  }
   0xe   : > { %677 = vmatpush.bf16.msra.mxu2 %v2658_v0  ;;  %s2653_s12 = sadd.s32 28, %s2911_s11  ;;  %s392_s17 = scalar_lea.vmem %s3709_s0, %s2911_s11  ;;  %v2937_v10 = vld [vmem:[%s3713_s4] ss:$0 sm:$0xff]  ;;  %v2939_v12 = vshrl.u32 %v700_v11, 7  ;;  %2766 = vmatpush.bf16.msra.mxu3 %v2674_v22  ;;  %638 = vst.msk [vmem:[#allocation2] sm:$0xf] %vm623_vm1, %v2842_v26 }
   0xf   : > { %s421_s20 = scalar_lea.vmem %s3711_s2, %s2653_s12  ;;  %v2659_v4 = vld [vmem:[%s392_s17] sm:$0xff]  ;;  %v2662_v5 = vld [vmem:[%s392_s17 + $0x18] sm:$0xff]  ;;  %s405_s23 = scalar_lea.vmem %s3710_s1, %s2911_s11  ;;  %v2660_v7 = vld [vmem:[%s392_s17 + $0x8] sm:$0xff]  ;;  %699 = vst.msk [vmem:[#allocation2 + $0x2c] sm:$0xf] %vm623_vm1, %v2842_v26  ;;  %vm903_vm6 = vcmask 1046528  }
  0x10   : > { %v669_v6 = vld [vmem:[%s421_s20] sm:$0xf]  ;;  %v2661_v9 = vld [vmem:[%s392_s17 + $0x10] sm:$0xff]  ;;  %v713_v19 = vand.u32 7, %v2939_v12  ;;  %v2949_v27 = vadd.s32 8, %v2939_v12  ;;  %v2959_v32 = vadd.s32 16, %v2939_v12  ;;  %s3653_s29 = scalar_lea.vmem %s3716_s7, %s2911_s11 }
  0x11   : > { %519 = vmatpush.bf16.msra.mxu0 %v2657_v1  ;;  %2763 = vmatpush.bf16.msra.mxu1 %v2657_v1  ;;  %v639_v8 = vld [vmem:[%s405_s23] sm:$0xf]  ;;  %v2962_v33 = vadd.s32 24, %v2939_v12  ;;  %v2672_v50 = vld [vmem:[%s3714_s5 + $0x28] sm:$0xff]  ;;  %v2686_v28 = vld [vmem:[%s3714_s5 + $0x78] sm:$0xff]  ;;  %vm1188_vm11 = vcmask 1040384  }
  0x12   : > { %678 = vmatpush.bf16.msra.mxu2 %v2657_v1  ;;  %vm2953_vm2 = vcmp.gt.s32.totalorder %v713_v19, 0  ;;  %2767 = vmatpush.bf16.msra.mxu3 %v2673_v38  ;;  %v720_v42 = vand.u32 7, %v2949_v27  ;;  %v727_v48 = vand.u32 7, %v2959_v32  ;;  %vm3045_vm7 = vcmp.lt.s32.totalorder %v713_v19, 7  ;;  %v2668_v32 = vld [vmem:[%s3714_s5 + $0x8] sm:$0xff] }
  0x13   : > { %v2340_v44 = vsel %vm2953_vm2, 1.0, %v2843_v43  ;;  %v734_v51 = vand.u32 7, %v2962_v33 }
  0x14   : > { %vm2983_vm3 = vcmp.gt.s32.totalorder %v720_v42, 0  ;;  %v2987_v58 = vrot.slane %v2340_v44, 1  ;;  %vm2991_vm4 = vcmp.gt.s32.totalorder %v727_v48, 0  ;;  %vm3061_vm8 = vcmp.lt.s32.totalorder %v720_v42, 7 }
  0x15   : > { %520 = vmatpush.bf16.msra.mxu0 %v2656_v2  ;;  %2764 = vmatpush.bf16.msra.mxu1 %v2656_v2  ;;  %vm3006_vm5 = vcmp.gt.s32.totalorder %v734_v51, 0  ;;  %vm3067_vm9 = vcmp.lt.s32.totalorder %v727_v48, 7  ;;  %vm3074_vm10 = vcmp.lt.s32.totalorder %v734_v51, 7  ;;  %v2684_v48 = vld [vmem:[%s3714_s5 + $0x68] sm:$0xff]  ;;  %v2349_v11 = vsel %vm3061_vm8, 1.0, %v2843_v43 }
  0x16   : > { %679 = vmatpush.bf16.msra.mxu2 %v2656_v2  ;;  %2768 = vmatpush.bf16.msra.mxu3 %v2672_v50 }
  0x19   : > { %521 = vmatpush.bf16.msra.mxu0 %v2655_v3  ;;  %2765 = vmatpush.bf16.msra.mxu1 %v2655_v3 }
  0x1a   : > { %680 = vmatpush.bf16.msra.mxu2 %v2655_v3 }
  0x1c   : > { %2334 = vmatmul.msk.bf16.vlgmr.msra.gmra.mxu0 %vm501_vm0, %v2659_v4  ;;  %2337 = vmatmul.msk.bf16.vlgmr.msra.gmra.mxu1 %vm501_vm0, %v2662_v5 }
  0x1d   : > { %647 = vmatpush.bf16.msrb.mxu1 %v2658_v0  ;;  %2339 = vmatmul.msk.bf16.vlgmr.msra.gmra.mxu2 %vm501_vm0, %v669_v6  ;;  %v2671_v6 = vld [vmem:[%s3714_s5 + $0x20] sm:$0xff] }
  0x1e   : > { %1019 = vmatpush.bf16.msrb.mxu2 %v2674_v22  ;;  %2769 = vmatpush.bf16.msra.mxu3 %v2671_v6 }
  0x1f   : > { %1457 = vmatpush.bf16.msrb.mxu0 %v2686_v28 }
  0x21   : > { %648 = vmatpush.bf16.msrb.mxu1 %v2657_v1 }
  0x22   : > { %1020 = vmatpush.bf16.msrb.mxu2 %v2673_v38  ;;  %v2685_v38 = vld [vmem:[%s3714_s5 + $0x70] sm:$0xff] }
  0x23   : > { %1458 = vmatpush.bf16.msrb.mxu0 %v2685_v38 }
  0x25   : > { %649 = vmatpush.bf16.msrb.mxu1 %v2656_v2 }
  0x26   : > { %1021 = vmatpush.bf16.msrb.mxu2 %v2672_v50 }
  0x27   : > { %1459 = vmatpush.bf16.msrb.mxu0 %v2684_v48 }
  0x29   : > { %650 = vmatpush.bf16.msrb.mxu1 %v2655_v3 }
  0x2a   : > { %1022 = vmatpush.bf16.msrb.mxu2 %v2671_v6  ;;  %v2680_v6 = vld [vmem:[%s3714_s5 + $0x50] sm:$0xff] }
  0x2c   : > { %2335 = vmatmul.msk.bf16.gmra.mxu0 %vm501_vm0, %v2660_v7  ;;  %2338 = vmatmul.msk.bf16.vlgmr.msrb.gmra.mxu1 %vm501_vm0, %v639_v8 }
  0x3c   : > { %2336 = vmatmul.msk.bf16.gmra.mxu0 %vm501_vm0, %v2661_v9 }
  0x99   : > { %v523_v13 = vpop.f32.mrf.mxu0  ;;  %v538_v14 = vpop.f32.mrf.mxu1 }
  0x9a   : > { %v524_v15 = vadd.f32 %v2937_v10, %v523_v13  ;;  %v539_v16 = vadd.f32 %v2937_v10, %v538_v14 }
  0x9c   : > { %v551_v17 = vmul.f32 0.044715, %v524_v15  ;;  %v557_v18 = vmul.f32 0.044715, %v539_v16  ;;  %v543_v49 = vmul.f32 0.5, %v524_v15  ;;  %v549_v55 = vmul.f32 0.5, %v539_v16 }
  0x9e   : > { %v559_v20 = vmul.f32 %v551_v17, %v524_v15  ;;  %v565_v21 = vmul.f32 %v557_v18, %v539_v16  ;;  %v3018_v17 = vsel %vm2991_vm4, 1.0, %v2843_v43  ;;  %vm1044_vm4 = vsmask.f32 4352 }
  0xa0   : > { %v567_v23 = vmul.f32 %v559_v20, %v524_v15  ;;  %v573_v24 = vmul.f32 %v565_v21, %v539_v16  ;;  %v682_v25 = vpop.f32.mrf.mxu2 }
  0xa1   : > { %v683_v29 = vadd.f32 %v2937_v10, %v682_v25  ;;  %v525_v30 = vpop.f32.mrf.mxu0  ;;  %v540_v31 = vpop.f32.mrf.mxu1 }
  0xa2   : > { %v575_v34 = vadd.f32 %v567_v23, %v524_v15  ;;  %v581_v35 = vadd.f32 %v573_v24, %v539_v16  ;;  %v526_v36 = vadd.f32 %v2937_v10, %v525_v30  ;;  %v541_v37 = vadd.f32 %v2937_v10, %v540_v31  ;;  %v2670_v23 = vld [vmem:[%s3714_s5 + $0x18] sm:$0xff] }
  0xa3   : > { %v687_v39 = vmul.f32 0.044715, %v683_v29  ;;  %v2979_v56 = vmul.f32 0.5, %v683_v29  ;;  %v3013_v16 = vsel %vm2983_vm3, 1.0, %v2843_v43  ;;  %1129 = vmatpush.bf16.msra.mxu1 %v2670_v23 }
  0xa4   : > { %v583_v40 = vmul.f32 0.7978846, %v575_v34  ;;  %v589_v41 = vmul.f32 0.7978846, %v581_v35  ;;  %v552_v46 = vmul.f32 0.044715, %v526_v36 }
  0xa5   : > { %v688_v45 = vmul.f32 %v687_v39, %v683_v29  ;;  %v558_v47 = vmul.f32 0.044715, %v541_v37  ;;  %v2995_v2 = vmul.f32 0.5, %v526_v36  ;;  %v2997_v3 = vmul.f32 0.5, %v541_v37  ;;  %v2681_v39 = vld [vmem:[%s3714_s5 + $0x58] sm:$0xff] }
  0xa6   : > { %2798 = vtanh.f32 %v583_v40  ;;  %v560_v53 = vmul.f32 %v552_v46, %v526_v36  ;;  %v905_v31 = vrot.slane %v3013_v16, 1  ;;  %1313 = vmatpush.bf16.msra.mxu2 %v2681_v39 }
  0xa7   : > { %2800 = vtanh.f32 %v589_v41  ;;  %v689_v52 = vmul.f32 %v688_v45, %v683_v29  ;;  %v566_v54 = vmul.f32 %v558_v47, %v541_v37  ;;  %v907_v45 = vrot.slane %v3018_v17, 1  ;;  %v2678_v47 = vld [vmem:[%s3714_s5 + $0x40] sm:$0xff] }
  0xa8   : > { %v684_v59 = vpop.f32.mrf.mxu2  ;;  %v568_v61 = vmul.f32 %v560_v53, %v526_v36  ;;  %v3090_v33 = vsel %vm903_vm6, %v2987_v58, %v905_v31 }
  0xa9   : > { %v690_v60 = vadd.f32 %v689_v52, %v683_v29  ;;  %v574_v62 = vmul.f32 %v566_v54, %v541_v37  ;;  %v528_v63 = vpop.f32.mrf.mxu0  ;;  %v652_v0 = vpop.f32.mrf.mxu1  ;;  %v3029_v29 = vsel %vm3006_vm5, 1.0, %v2843_v43  ;;  %v3052_v54 = vld [vmem:[#allocation2] sm:$0x8]  ;;  %vm1236_vm5 = vsmask.f32 7424 }
  0xaa   : > { %v529_v4 = vadd.f32 %v2937_v10, %v528_v63  ;;  %v653_v5 = vadd.f32 %v2937_v10, %v652_v0  ;;  %v576_v8 = vadd.f32 %v568_v61, %v526_v36  ;;  %v909_v46 = vrot.slane %v3029_v29, 1  ;;  %1314 = vmatpush.bf16.msra.mxu2 %v2680_v6 }
  0xab   : > { %v691_v7 = vmul.f32 0.7978846, %v690_v60  ;;  %v582_v9 = vadd.f32 %v574_v62, %v541_v37  ;;  %v2669_v37 = vld [vmem:[%s3714_s5 + $0x10] sm:$0xff]  ;;  %v878_v1 = vunpack.c.l.bf16 %v3052_v54  ;;  %v3195_v6 = vadd.s32 48, %v2939_v12 }
  0xac   : > { %v2799_v13 = vpop.eup %2798  ;;  %v553_v14 = vmul.f32 0.044715, %v529_v4  ;;  %v657_v15 = vmul.f32 0.044715, %v653_v5  ;;  %v584_v21 = vmul.f32 0.7978846, %v576_v8  ;;  %1130 = vmatpush.bf16.msra.mxu1 %v2669_v37 }
  0xad   : > { %v2801_v18 = vpop.eup %2800  ;;  %v599_v20 = vadd.f32 1.0, %v2799_v13  ;;  %2802 = vtanh.f32 %v691_v7  ;;  %v590_v22 = vmul.f32 0.7978846, %v582_v9  ;;  %v3055_v57 = vmul.f32 0.5, %v529_v4 }
  0xae   : > { %v605_v24 = vadd.f32 1.0, %v2801_v18  ;;  %v561_v25 = vmul.f32 %v553_v14, %v529_v4  ;;  %v658_v26 = vmul.f32 %v657_v15, %v653_v5  ;;  %2804 = vtanh.f32 %v584_v21  ;;  %v2667_v14 = vld [vmem:[%s3714_s5] sm:$0xff]  ;;  %v2679_v18 = vld [vmem:[%s3714_s5 + $0x48] sm:$0xff] }
  0xaf   : > { %v607_v30 = vmul.f32 %v599_v20, %v543_v49  ;;  %2806 = vtanh.f32 %v590_v22  ;;  %v3057_v59 = vmul.f32 0.5, %v653_v5  ;;  %v2348_v7 = vsel %vm3045_vm7, 1.0, %v2843_v43  ;;  %v2683_v15 = vld [vmem:[%s3714_s5 + $0x60] sm:$0xff]  ;;  %1315 = vmatpush.bf16.msra.mxu2 %v2679_v18 }
  0xb0   : > { %v613_v34 = vmul.f32 %v605_v24, %v549_v55  ;;  %v569_v35 = vmul.f32 %v561_v25, %v529_v4  ;;  %v659_v36 = vmul.f32 %v658_v26, %v653_v5  ;;  %1131 = vmatpush.bf16.msra.mxu1 %v2668_v32  ;;  %v2350_v20 = vsel %vm3067_vm9, 1.0, %v2843_v43  ;;  %1460 = vmatpush.bf16.msrb.mxu0 %v2683_v15  ;;  %v2688_v32 = vld [vmem:[%s3714_s5 + $0x88] sm:$0xff] }
  0xb1   : > { %v615_v40 = vpack.c.bf16 %v607_v30, %v607_v30  ;;  %v530_v41 = vpop.f32.mrf.mxu0  ;;  %v654_v44 = vpop.f32.mrf.mxu1  ;;  %v3123_v24 = vrot.slane %v2348_v7, 7  ;;  %v1190_v30 = vrot.slane %v2349_v11, 7  ;;  %v3157_v16 = vmul.f32 %v2987_v58, %v878_v1 }
  0xb2   : > { %v621_v49 = vpack.c.bf16 %v613_v34, %v613_v34  ;;  %v577_v50 = vadd.f32 %v569_v35, %v529_v4  ;;  %v660_v52 = vadd.f32 %v659_v36, %v653_v5  ;;  %v3050_v53 = vadd.f32 %v2937_v10, %v530_v41  ;;  %v2690_v36 = vld [vmem:[%s3714_s5 + $0x98] sm:$0xff] }
  0xb3   : > { %v2803_v55 = vpop.eup %2802  ;;  %624 = vst.msk [vmem:[#allocation2 + $0x8] sm:$0xf] %vm623_vm1, %v615_v40  ;;  %v2689_v40 = vld [vmem:[%s3714_s5 + $0x90] sm:$0xff]  ;;  %v3143_v41 = vsel %vm903_vm6, %v905_v31, %v907_v45  ;;  %v3150_v44 = vsel %vm903_vm6, %v907_v45, %v909_v46  ;;  %1559 = vmatpush.bf16.msrb.mxu3 %v2690_v36  ;;  %v705_v31 = vadd.s32 32, %v2939_v12  ;;  %v3167_v60 = vsel %vm1188_vm11, %v3123_v24, %v1190_v30 }
  0xb4   : > { %630 = vst.msk [vmem:[#allocation2 + $0x20] sm:$0xf] %vm623_vm1, %v621_v49  ;;  %v693_v61 = vadd.f32 1.0, %v2803_v55  ;;  %v585_v62 = vmul.f32 0.7978846, %v577_v50  ;;  %v2805_v27 = vpop.eup %2804  ;;  %1132 = vmatpush.bf16.msra.mxu1 %v2667_v14  ;;  %v546_v45 = vmul.f32 0.5, %v3050_v53  ;;  %1316 = vmatpush.bf16.msra.mxu2 %v2678_v47 }
  0xb5   : > { %v661_v42 = vmul.f32 0.7978846, %v660_v52  ;;  %v554_v0 = vmul.f32 0.044715, %v3050_v53  ;;  %v2807_v51 = vpop.eup %2806  ;;  %v600_v5 = vadd.f32 1.0, %v2805_v27  ;;  %v706_v55 = vadd.s32 40, %v2939_v12 }
  0xb6   : > { %v694_v4 = vmul.f32 %v693_v61, %v2979_v56  ;;  %2808 = vtanh.f32 %v585_v62  ;;  %v606_v8 = vadd.f32 1.0, %v2807_v51  ;;  %v741_v61 = vand.u32 7, %v705_v31 }
  0xb7   : > { %2810 = vtanh.f32 %v661_v42  ;;  %v562_v9 = vmul.f32 %v554_v0, %v3050_v53  ;;  %v608_v13 = vmul.f32 %v600_v5, %v2995_v2  ;;  %v3119_v2 = vsel %vm3074_vm10, 1.0, %v2843_v43  ;;  %1560 = vmatpush.bf16.msrb.mxu3 %v2689_v40 }
  0xb8   : > { %v696_v56 = vmul.f32 0.0, %v694_v4  ;;  %v614_v21 = vmul.f32 %v606_v8, %v2997_v3  ;;  %v1192_v3 = vrot.slane %v2350_v20, 7  ;;  %v1194_v37 = vrot.slane %v3119_v2, 7 }
  0xb9   : > { %v570_v22 = vmul.f32 %v562_v9, %v3050_v53  ;;  %v533_v23 = vpop.f32.mrf.mxu0  ;;  %v616_v26 = vpack.c.bf16 %v608_v13, %v608_v13  ;;  %vm809_vm12 = vcmp.gt.s32.totalorder %v741_v61, 0  ;;  %vm3182_vm13 = vcmp.lt.s32.totalorder %v741_v61, 7 }
  0xba   : > { %v697_v25 = vpack.c.bf16 %v696_v56, %v696_v56  ;;  %v3126_v28 = vadd.f32 %v2937_v10, %v533_v23  ;;  %v622_v34 = vpack.c.bf16 %v614_v21, %v614_v21  ;;  %v3172_v27 = vsel %vm1188_vm11, %v1190_v30, %v1192_v3 }
  0xbb   : > { %v578_v35 = vadd.f32 %v570_v22, %v3050_v53  ;;  %625 = vst.msk [vmem:[#allocation2 + $0xc] sm:$0xf] %vm623_vm1, %v616_v26  ;;  %v748_v53 = vand.u32 7, %v706_v55  ;;  %v2344_v4 = vsel %vm809_vm12, 1.0, %v2843_v43  ;;  %v3198_v7 = vadd.s32 56, %v2939_v12  ;;  %1561 = vmatpush.bf16.msrb.mxu3 %v2688_v32 }
  0xbc   : > { %v2809_v38 = vpop.eup %2808  ;;  %698 = vst.msk [vmem:[#allocation2 + $0x28] sm:$0xf] %vm623_vm1, %v697_v25  ;;  %v555_v39 = vmul.f32 0.044715, %v3126_v28  ;;  %v911_v18 = vrot.slane %v2344_v4, 1  ;;  %v2352_v12 = vsel %vm3182_vm13, 1.0, %v2843_v43 }
  0xbd   : > { %v2811_v49 = vpop.eup %2810  ;;  %v601_v50 = vadd.f32 1.0, %v2809_v38  ;;  %v586_v52 = vmul.f32 0.7978846, %v578_v35  ;;  %631 = vst.msk [vmem:[#allocation2 + $0x24] sm:$0xf] %vm623_vm1, %v622_v34  ;;  %vm810_vm14 = vcmp.gt.s32.totalorder %v748_v53, 0 }
  0xbe   : > { %v663_v17 = vadd.f32 1.0, %v2811_v49  ;;  %v563_v54 = vmul.f32 %v555_v39, %v3126_v28  ;;  %vm3190_vm15 = vcmp.lt.s32.totalorder %v748_v53, 7  ;;  %v547_v23 = vmul.f32 0.5, %v3126_v28 }
  0xbf   : > { %v609_v19 = vmul.f32 %v601_v50, %v3055_v57  ;;  %2812 = vtanh.f32 %v586_v52  ;;  %v3177_v57 = vsel %vm1188_vm11, %v1192_v3, %v1194_v37  ;;  %v3216_v22 = vsel %vm3190_vm15, 1.0, %v2843_v43 }
  0xc0   : > { %v664_v62 = vmul.f32 %v663_v17, %v3057_v59  ;;  %v571_v63 = vmul.f32 %v563_v54, %v3126_v28  ;;  %v755_v30 = vand.u32 7, %v3195_v6  ;;  %v762_v3 = vand.u32 7, %v3198_v7  ;;  %v2701_v7 = vld [vmem:[%s3714_s5 + $0xd0] sm:$0xff] }
  0xc1   : > { %v617_v42 = vpack.c.bf16 %v609_v19, %v609_v19  ;;  %v535_v0 = vpop.f32.mrf.mxu0  ;;  %v1196_v40 = vrot.slane %v2352_v12, 7  ;;  %v3233_v31 = vsel %vm903_vm6, %v909_v46, %v911_v18 }
  0xc2   : > { %v666_v48 = vmul.f32 0.0, %v664_v62  ;;  %v579_v1 = vadd.f32 %v571_v63, %v3126_v28  ;;  %v536_v51 = vadd.f32 %v2937_v10, %v535_v0  ;;  %v3200_v56 = vld [vmem:[#allocation2 + $0x8] sm:$0xff]   ;;  %v3203_v10 = vsel %vm810_vm14, 1.0, %v2843_v43 }
  0xc3   : > { %626 = vst.msk [vmem:[#allocation2 + $0x10] sm:$0xf] %vm623_vm1, %v617_v42  ;;  %v2713_v14 = vunpack.c.l.bf16 %v3200_v56  ;;  %v3207_v15 = vunpack.c.h.bf16 %v3200_v56  ;;  %v913_v36 = vrot.slane %v3203_v10, 1  ;;  %v1198_v28 = vrot.slane %v3216_v22, 7  ;;  %v2704_v56 = vld [vmem:[%s3714_s5 + $0xe8] sm:$0xff] }
  0xc4   : > { %v667_v8 = vpack.c.bf16 %v666_v48, %v666_v48  ;;  %v587_v9 = vmul.f32 0.7978846, %v579_v1  ;;  %v556_v11 = vmul.f32 0.044715, %v536_v51  ;;  %v3227_v38 = vmul.f32 0.5, %v536_v51 }
  0xc5   : > { %v2813_v13 = vpop.eup %2812  ;;  %v930_v25 = vmul.f32 %v2713_v14, %v3143_v41  ;;  %v931_v26 = vmul.f32 %v3207_v15, %v3150_v44  ;;  %v3238_v17 = vsel %vm903_vm6, %v911_v18, %v913_v36  ;;  %v3245_v29 = vsel %vm1188_vm11, %v1194_v37, %v1196_v40  ;;  %v2702_v18 = vld [vmem:[%s3714_s5 + $0xd8] sm:$0xff] }
  0xc6   : > { %668 = vst.msk [vmem:[#allocation2 + $0x4] sm:$0xf] %vm623_vm1, %v667_v8  ;;  %v602_v20 = vadd.f32 1.0, %v2813_v13  ;;  %2814 = vtanh.f32 %v587_v9  ;;  %v564_v21 = vmul.f32 %v556_v11, %v536_v51  ;;  %vm3249_vm2 = vcmp.gt.s32.totalorder %v755_v30, 0  ;;  %v2687_v13 = vld [vmem:[%s3714_s5 + $0x80] sm:$0xff] }
  0xc7   : > { %v938_v39 = vpack.c.bf16 %v931_v26, %v930_v25  ;;  %vm3255_vm3 = vcmp.gt.s32.totalorder %v762_v3, 0  ;;  %v3263_v37 = vsel %vm1188_vm11, %v1196_v40, %v1198_v28  ;;  %1562 = vmatpush.bf16.msrb.mxu3 %v2687_v13  ;;  %vm3298_vm7 = vcmp.lt.s32.totalorder %v755_v30, 7  ;;  %v3308_v30 = vld [vmem:[#allocation2 + $0x20] sm:$0xff]  }
  0xc8   : > { %v610_v34 = vmul.f32 %v602_v20, %v546_v45  ;;  %v572_v35 = vmul.f32 %v564_v21, %v536_v51  ;;  %vm3340_vm8 = vcmp.lt.s32.totalorder %v762_v3, 7 }
  0xc9   : > { %v1054_v45 = vshrl.u32 %v938_v39, 16  ;;  %v1057_v54 = vshll.u32 %v938_v39, 16 }
  0xca   : > { %v618_v47 = vpack.c.bf16 %v610_v34, %v610_v34  ;;  %v580_v49 = vadd.f32 %v572_v35, %v536_v51  ;;  %v2664_v50 = vld [vmem:[#allocation2 + $0xc] sm:$0xff] }
  0xcb   : > { %v1156_v52 = vld [vmem:[#allocation2 + $0xc] sm:$0xff]   ;;  %2397 = vmatmul.msk.bf16.vlgmr.msra.gmra.mxu3 %vm501_vm0, %v2664_v50  ;;  %v1056_v32 = vrot.slane %v1054_v45, 3  ;;  %v1059_v8 = vrot.slane %v1057_v54, 4  ;;  %v3285_v45 = vsel %vm3249_vm2, 1.0, %v2843_v43  ;;  %v2347_v54 = vsel %vm3255_vm3, 1.0, %v2843_v43 }
  0xcc   : > { %v1165_v55 = vunpack.c.l.bf16 %v1156_v52  ;;  %v1166_v19 = vunpack.c.h.bf16 %v1156_v52  ;;  %v2815_v61 = vpop.eup %2814  ;;  %627 = vst.msk [vmem:[#allocation2 + $0x14] sm:$0xf] %vm623_vm1, %v618_v47  ;;  %v588_v62 = vmul.f32 0.7978846, %v580_v49 }
  0xcd   : > { %v603_v53 = vadd.f32 1.0, %v2815_v61  ;;  %v2663_v42 = vld [vmem:[#allocation2 + $0x4] sm:$0xff] }
  0xce   : > { %v870_v0 = vld [vmem:[#allocation2 + $0x4] sm:$0xff]   ;;  %v1352_v2 = vmul.f32 %v1165_v55, %v3143_v41  ;;  %2816 = vtanh.f32 %v588_v62  ;;  %v1353_v51 = vmul.f32 %v1166_v19, %v3150_v44  ;;  %2396 = vmatmul.msk.bf16.vlgmr.msrb.gmra.mxu2 %vm501_vm0, %v2663_v42  ;;  %v1215_v35 = vmul.f32 %v3172_v27, %v1165_v55 }
  0xcf   : > { %v879_v59 = vunpack.c.l.bf16 %v870_v0  ;;  %v1164_v48 = vunpack.c.h.bf16 %v870_v0  ;;  %v1346_v1 = vld [vmem:[#allocation2 + $0x4] sm:$0x8]  ;;  %v611_v5 = vmul.f32 %v603_v53, %v547_v23  ;;  %v1216_v49 = vmul.f32 %v3177_v57, %v1166_v19  ;;  %1853 = vmatpush.bf16.msrb.mxu2 %v2702_v18 }
  0xd0   : > { %v1154_v4 = vld [vmem:[#allocation2 + $0x4] sm:$0xf]  ;;  %v1348_v9 = vunpack.c.l.bf16 %v1346_v1  ;;  %v1360_v21 = vpack.c.bf16 %v1353_v51, %v1352_v2  ;;  %v3292_v1 = vor.u32 %v1059_v8, %v1056_v32 }
  0xd1   : > { %v1163_v11 = vunpack.c.l.bf16 %v1154_v4  ;;  %v929_v12 = vmul.f32 %v3090_v33, %v879_v59  ;;  %v1351_v20 = vmul.f32 %v1164_v48, %v3090_v33  ;;  %v1214_v23 = vmul.f32 %v3167_v60, %v1164_v48 }
  0xd2   : > { %v619_v25 = vpack.c.bf16 %v611_v5, %v611_v5  ;;  %v1350_v26 = vmul.f32 %v1348_v9, %v2987_v58  ;;  %v1382_v40 = vshrl.u32 %v1360_v21, 16  ;;  %v1385_v47 = vshll.u32 %v1360_v21, 16 }
  0xd3   : > { %v1213_v34 = vmul.f32 %v3123_v24, %v1163_v11  ;;  %v937_v39 = vpack.c.bf16 %v929_v12, %v3157_v16  ;;  %v3290_v2 = vpack.c.bf16 %v1216_v49, %v1215_v35  ;;  %v2753_v59 = vld [vmem:[#allocation2 + $0x10] sm:$0xff]   ;;  %1854 = vmatpush.bf16.msrb.mxu2 %v2701_v7  ;;  %v1742_v7 = vld [vmem:[#allocation2 + $0x8] sm:$0x8] }
  0xd4   : > { %628 = vst.msk [vmem:[#allocation2 + $0x18] sm:$0xf] %vm623_vm1, %v619_v25  ;;  %v1359_v50 = vpack.c.bf16 %v1351_v20, %v1350_v26  ;;  %v2817_v55 = vpop.eup %2816  ;;  %v1384_v62 = vrot.slane %v1382_v40, 3  ;;  %v1387_v53 = vrot.slane %v1385_v47, 4  ;;  %v3304_v12 = vunpack.c.l.bf16 %v2753_v59 }
  0xd5   : > { %v1222_v52 = vpack.c.bf16 %v1214_v23, %v1213_v34  ;;  %v1046_v16 = vshrl.u32 %v937_v39, 16  ;;  %v1049_v61 = vshll.u32 %v937_v39, 16  ;;  %v604_v19 = vadd.f32 1.0, %v2817_v55 }
  0xd6   : > { %v1374_v42 = vshrl.u32 %v1359_v50, 16  ;;  %v1377_v0 = vshll.u32 %v1359_v50, 16  ;;  %v3294_v51 = vor.u32 %v1387_v53, %v1384_v62  ;;  %v1245_v18 = vshll.u32 %v3290_v2, 16 }
  0xd7   : > { %v1048_v48 = vrot.slane %v1046_v16, 3  ;;  %v1051_v46 = vrot.slane %v1049_v61, 4  ;;  %v612_v4 = vmul.f32 %v604_v19, %v3227_v38  ;;  %v1240_v11 = vshll.u32 %v1222_v52, 16  ;;  %v2697_v16 = vld [vmem:[%s3714_s5 + $0xb8] sm:$0xff] }
  0xd8   : > { %v1376_v5 = vrot.slane %v1374_v42, 3  ;;  %v1379_v9 = vrot.slane %v1377_v0, 4  ;;  %v3306_v32 = vunpack.c.h.bf16 %v2753_v59  ;;  %v1238_v21 = vshrl.u32 %v1222_v52, 16  ;;  %v2710_v61 = vld [vmem:[%s3714_s5 + $0x118] sm:$0xff]  ;;  %1709 = vmatpush.bf16.msrb.mxu1 %v2697_v16 }
  0xd9   : > { %v1052_v13 = vor.u32 %v1051_v46, %v1048_v48  ;;  %v620_v8 = vpack.c.bf16 %v612_v4, %v612_v4  ;;  %v1242_v6 = vrot.slane %v1240_v11, 1  ;;  %v3312_v25 = vrot.slane %v1245_v18, 1  ;;  %2105 = vmatpush.bf16.msra.mxu3 %v2710_v61  ;;  %v2706_v4 = vld [vmem:[%s3714_s5 + $0xf8] sm:$0xff] }
  0xda   : > { %v1380_v20 = vor.u32 %v1379_v9, %v1376_v5  ;;  %v932_v26 = vmul.f32 %v3304_v12, %v3233_v31  ;;  %v933_v34 = vmul.f32 %v3306_v32, %v3238_v17  ;;  %v915_v52 = vrot.slane %v3285_v45, 1  ;;  %1955 = vmatpush.bf16.msra.mxu0 %v2706_v4  ;;  %v1162_v4 = vld [vmem:[#allocation2 + $0x24] sm:$0x1] }
  0xdb   : > { %v1061_v23 = vsel %vm1044_vm4, %v1052_v13, %v3292_v1  ;;  %v2665_v38 = vld [vmem:[#allocation2 + $0x14] sm:$0xff]  ;;  %629 = vst.msk [vmem:[#allocation2 + $0x1c] sm:$0xf] %vm623_vm1, %v620_v8  ;;  %v1243_v40 = vor.u32 %v1242_v6, %v1238_v21  ;;  %v3325_v55 = vrot.slane %v2347_v54, 1  ;;  %v886_v62 = vunpack.c.l.bf16 %v3308_v30 }
  0xdc   : > { %v1158_v35 = vld [vmem:[#allocation2 + $0x14] sm:$0xff]   ;;  %2416 = vmatmul.msk.bf16.vlgmr.msra.gmra.mxu1 %vm501_vm0, %v1061_v23  ;;  %v1389_v39 = vsel %vm1044_vm4, %v1380_v20, %v3294_v51  ;;  %2398 = vmatmul.msk.bf16.gmra.mxu3 %vm501_vm0, %v2665_v38  ;;  %v939_v50 = vpack.c.bf16 %v933_v34, %v932_v26  ;;  %v3356_v3 = vsel %vm903_vm6, %v913_v36, %v915_v52  ;;  %v2354_v13 = vsel %vm3298_vm7, 1.0, %v2843_v43 }
  0xdd   : > { %v1167_v47 = vunpack.c.l.bf16 %v1158_v35  ;;  %v1168_v49 = vunpack.c.h.bf16 %v1158_v35  ;;  %2472 = vmatmul.msk.bf16.vlgmr.msrb.gmra.mxu0 %vm501_vm0, %v1389_v39  ;;  %v1248_v53 = vsel %vm1236_vm5, %v1243_v40, %v3312_v25  ;;  %v3360_v5 = vsel %vm903_vm6, %v915_v52, %v3325_v55 }
  0xde   : > { %v1063_v54 = vshrl.u32 %v939_v50, 16  ;;  %v1066_v0 = vshll.u32 %v939_v50, 16  ;;  %2444 = vmatmul.msk.bf16.vlgmr.msra.gmra.mxu2 %vm501_vm0, %v1248_v53  ;;  %v2355_v18 = vsel %vm3340_vm8, 1.0, %v2843_v43  ;;  %v936_v6 = vmul.f32 %v3325_v55, %v886_v62 }
  0xdf   : > { %v1354_v19 = vmul.f32 %v1167_v47, %v3233_v31  ;;  %v1355_v42 = vmul.f32 %v1168_v49, %v3238_v17  ;;  %v1217_v59 = vmul.f32 %v3245_v29, %v1167_v47  ;;  %v1218_v48 = vmul.f32 %v3263_v37, %v1168_v49 }
  0xe0   : > { %v1065_v10 = vrot.slane %v1063_v54, 3  ;;  %v1068_v8 = vrot.slane %v1066_v0, 4  ;;  %v1200_v39 = vrot.slane %v2354_v13, 7  ;;  %v3375_v43 = vrot.slane %v2355_v18, 7  ;;  %v2709_v18 = vld [vmem:[%s3714_s5 + $0x110] sm:$0xff] }
  0xe1   : > { %v1361_v46 = vpack.c.bf16 %v1355_v42, %v1354_v19  ;;  %v3368_v36 = vpack.c.bf16 %v1218_v48, %v1217_v59  ;;  %v941_v42 = vpack.c.bf16 %v936_v6, %v936_v6  ;;  %v1249_v48 = vshrl.u32 %v3290_v2, 16  ;;  %v2696_v2 = vld [vmem:[%s3714_s5 + $0xb0] sm:$0xff]  ;;  %2106 = vmatpush.bf16.msra.mxu3 %v2709_v18 }
  0xe2   : > { %v2754_v20 = vld [vmem:[#allocation2 + $0x18] sm:$0xff]   ;;  %v3381_v49 = vor.u32 %v1068_v8, %v1065_v10  ;;  %v3391_v53 = vsel %vm1188_vm11, %v1198_v28, %v1200_v39  ;;  %v3395_v19 = vsel %vm1188_vm11, %v1200_v39, %v3375_v43  ;;  %v1349_v8 = vunpack.c.h.bf16 %v3308_v30  ;;  %1710 = vmatpush.bf16.msrb.mxu1 %v2696_v2 }
  0xe3   : > { %v1391_v9 = vshrl.u32 %v1361_v46, 16  ;;  %v1394_v11 = vshll.u32 %v1361_v46, 16  ;;  %v1160_v21 = vld [vmem:[#allocation2 + $0x1c] sm:$0xff]   ;;  %v3371_v26 = vunpack.c.l.bf16 %v2754_v20  ;;  %v3373_v63 = vunpack.c.h.bf16 %v2754_v20 }
  0xe4   : > { %v1169_v34 = vunpack.c.l.bf16 %v1160_v21  ;;  %v1170_v35 = vunpack.c.h.bf16 %v1160_v21  ;;  %v1253_v50 = vshll.u32 %v3368_v36, 16  ;;  %v1070_v0 = vsel %vm1044_vm4, %v3292_v1, %v3381_v49  ;;  %v2666_v59 = vld [vmem:[#allocation2 + $0x1c] sm:$0xff] }
  0xe5   : > { %v1393_v23 = vrot.slane %v1391_v9, 3  ;;  %v1396_v38 = vrot.slane %v1394_v11, 4  ;;  %v934_v40 = vmul.f32 %v3371_v26, %v3356_v3  ;;  %v935_v47 = vmul.f32 %v3373_v63, %v3360_v5 }
  0xe6   : > { %v1356_v52 = vmul.f32 %v1169_v34, %v3356_v3  ;;  %v1357_v16 = vmul.f32 %v1170_v35, %v3360_v5  ;;  %v1219_v45 = vmul.f32 %v3391_v53, %v1169_v34  ;;  %v1220_v54 = vmul.f32 %v3395_v19, %v1170_v35  ;;  %v2695_v34 = vld [vmem:[%s3714_s5 + $0xa8] sm:$0xff] }
  0xe7   : > { %v3386_v61 = vor.u32 %v1396_v38, %v1393_v23  ;;  %v940_v62 = vpack.c.bf16 %v935_v47, %v934_v40  ;;  %v1255_v22 = vrot.slane %v1253_v50, 1  ;;  %v1251_v9 = vor.u32 %v1249_v48, %v3312_v25  ;;  %v2705_v38 = vld [vmem:[%s3714_s5 + $0xf0] sm:$0xff]  ;;  %v2700_v50 = vld [vmem:[%s3714_s5 + $0xc8] sm:$0xff]  ;;  %1711 = vmatpush.bf16.msrb.mxu1 %v2695_v34 }
  0xe8   : > { %v1362_v46 = vpack.c.bf16 %v1357_v16, %v1356_v52  ;;  %v1081_v13 = vshrl.u32 %v941_v42, 16  ;;  %v1084_v10 = vshll.u32 %v941_v42, 16  ;;  %v1744_v6 = vunpack.c.l.bf16 %v1742_v7  ;;  %1956 = vmatpush.bf16.msra.mxu0 %v2705_v38  ;;  %1855 = vmatpush.bf16.msrb.mxu2 %v2700_v50 }
  0xe9   : > { %v1398_v28 = vsel %vm1044_vm4, %v3294_v51, %v3386_v61  ;;  %v1072_v1 = vshrl.u32 %v940_v62, 16  ;;  %v1075_v11 = vshll.u32 %v940_v62, 16  ;;  %v3416_v51 = vpack.c.bf16 %v1220_v54, %v1219_v45  ;;  %v2694_v45 = vld [vmem:[%s3714_s5 + $0xa0] sm:$0xff] }
  0xea   : > { %v1256_v20 = vsel %vm1236_vm5, %v1251_v9, %v1255_v22  ;;  %v1400_v21 = vshrl.u32 %v1362_v46, 16  ;;  %v1403_v25 = vshll.u32 %v1362_v46, 16  ;;  %v1171_v23 = vunpack.c.l.bf16 %v1162_v4 }
  0xeb   : > { %v1610_v30 = vmul.f32 %v2713_v14, %v3123_v24  ;;  %v1074_v35 = vrot.slane %v1072_v1, 3  ;;  %v1077_v39 = vrot.slane %v1075_v11, 4  ;;  %v1257_v40 = vshrl.u32 %v3368_v36, 16  ;;  %1712 = vmatpush.bf16.msrb.mxu1 %v2694_v45 }
  0xec   : > { %2417 = vmatmul.msk.bf16.gmra.mxu1 %vm501_vm0, %v1070_v0  ;;  %2399 = vmatmul.msk.bf16.gmra.mxu3 %vm501_vm0, %v2666_v59  ;;  %v3431_v47 = vrot.slane %v1081_v13, 3  ;;  %v1261_v52 = vshll.u32 %v3416_v51, 16  ;;  %v3437_v16 = vrot.slane %v1084_v10, 4  ;;  %v1358_v62 = vmul.f32 %v1349_v8, %v3325_v55  ;;  %v2758_v59 = vld [vmem:[#allocation2 + $0x20] sm:$0xff]  }
  0xed   : > { %2473 = vmatmul.msk.bf16.gmra.mxu0 %vm501_vm0, %v1398_v28  ;;  %v1611_v14 = vmul.f32 %v3207_v15, %v3167_v60  ;;  %v1402_v36 = vrot.slane %v1400_v21, 3  ;;  %v1405_v42 = vrot.slane %v1403_v25, 4  ;;  %v1746_v54 = vmul.f32 %v1744_v6, %v2987_v58 }
  0xee   : > { %2445 = vmatmul.msk.bf16.gmra.mxu2 %vm501_vm0, %v1256_v20  ;;  %v1747_v0 = vmul.f32 %v3207_v15, %v3090_v33  ;;  %v1221_v48 = vmul.f32 %v3375_v43, %v1171_v23  ;;  %v1748_v28 = vmul.f32 %v3304_v12, %v3143_v41  ;;  %v1749_v4 = vmul.f32 %v3306_v32, %v3150_v44  ;;  %v2703_v33 = vld [vmem:[%s3714_s5 + $0xe0] sm:$0xff] }
  0xef   : > { %v3452_v46 = vpack.c.bf16 %v1611_v14, %v1610_v30  ;;  %v3458_v7 = vor.u32 %v1077_v39, %v1074_v35  ;;  %v1259_v9 = vor.u32 %v1257_v40, %v1255_v22  ;;  %v1263_v11 = vrot.slane %v1261_v52, 1  ;;  %1957 = vmatpush.bf16.msra.mxu0 %v2704_v56  ;;  %v1988_v39 = vld [vmem:[#allocation2 + $0xc] sm:$0xf] }
  0xf0   : > { %v1755_v1 = vpack.c.bf16 %v1747_v0, %v1746_v54  ;;  %v1087_v58 = vor.u32 %v3437_v16, %v3431_v47  ;;  %v1756_v15 = vpack.c.bf16 %v1749_v4, %v1748_v28  ;;  %v3465_v13 = vunpack.c.l.bf16 %v2758_v59  ;;  %v2675_v40 = vld [vmem:[#allocation2 + $0x8] sm:$0xff]  ;;  %v2707_v16 = vld [vmem:[%s3714_s5 + $0x100] sm:$0xff] }
  0xf1   : > { %v3467_v41 = vor.u32 %v1405_v42, %v1402_v36  ;;  %v1363_v2 = vpack.c.bf16 %v1358_v62, %v1358_v62  ;;  %v1226_v22 = vpack.c.bf16 %v1221_v48, %v1221_v48  ;;  %v1265_v10 = vshrl.u32 %v3416_v51, 16  ;;  %v2708_v42 = vld [vmem:[%s3714_s5 + $0x108] sm:$0xff] }
  0xf2   : > { %v1770_v44 = vshrl.u32 %v1755_v1, 16  ;;  %v1773_v18 = vshll.u32 %v1755_v1, 16  ;;  %v1778_v8 = vshrl.u32 %v1756_v15, 16  ;;  %v1781_v20 = vshll.u32 %v1756_v15, 16  ;;  %2107 = vmatpush.bf16.msra.mxu3 %v2708_v42 }
  0xf3   : > { %v1079_v21 = vsel %vm1044_vm4, %v3381_v49, %v3458_v7  ;;  %v3473_v23 = vunpack.c.h.bf16 %v2758_v59  ;;  %v1264_v38 = vsel %vm1236_vm5, %v1259_v9, %v1263_v11  ;;  %1958 = vmatpush.bf16.msra.mxu0 %v2703_v33  ;;  %v1616_v35 = vmul.f32 %v3465_v13, %v3391_v53 }
  0xf4   : > { %v1772_v25 = vrot.slane %v1770_v44, 3  ;;  %v1775_v6 = vrot.slane %v1773_v18, 4  ;;  %v1780_v34 = vrot.slane %v1778_v8, 3  ;;  %v1783_v30 = vrot.slane %v1781_v20, 4 }
  0xf5   : > { %v1407_v51 = vsel %vm1044_vm4, %v3386_v61, %v3467_v41  ;;  %v1409_v50 = vshrl.u32 %v1363_v2, 16  ;;  %v1412_v49 = vshll.u32 %v1363_v2, 16  ;;  %v1750_v52 = vmul.f32 %v3371_v26, %v3233_v31  ;;  %v2699_v31 = vld [vmem:[%s3714_s5 + $0xc0] sm:$0xff] }
  0xf6   : > { %v1776_v62 = vor.u32 %v1775_v6, %v1772_v25  ;;  %v1784_v56 = vor.u32 %v1783_v30, %v1780_v34  ;;  %v1751_v14 = vmul.f32 %v3373_v63, %v3238_v17  ;;  %v1617_v36 = vmul.f32 %v3473_v23, %v3395_v19  ;;  %1856 = vmatpush.bf16.msrb.mxu2 %v2699_v31 }
  0xf7   : > { %v3490_v61 = vor.u32 %v1265_v10, %v1263_v11  ;;  %v1997_v45 = vunpack.c.l.bf16 %v1988_v39  ;;  %v2007_v17 = vmul.f32 %v3304_v12, %v3167_v60  ;;  %v2008_v54 = vmul.f32 %v3306_v32, %v3172_v27  ;;  %v1600_v11 = vld [vmem:[#allocation2 + $0x28] sm:$0x1]  ;;  %2108 = vmatpush.bf16.msra.mxu3 %v2707_v16 }
  0xf8   : > { %v3503_v0 = vsel %vm1044_vm4, %v1776_v62, %v1784_v56  ;;  %v1757_v59 = vpack.c.bf16 %v1751_v14, %v1750_v52  ;;  %v1622_v48 = vpack.c.bf16 %v1617_v36, %v1616_v35  ;;  %v1752_v28 = vmul.f32 %v3465_v13, %v3356_v3  ;;  %v1996_v14 = vld [vmem:[#allocation2 + $0x2c] sm:$0x1] }
  0xf9   : > { %v3507_v4 = vshll.u32 %v1226_v22, 16  ;;  %v2006_v9 = vmul.f32 %v1997_v45, %v3123_v24  ;;  %v2009_v60 = vmul.f32 %v3371_v26, %v3177_v57  ;;  %v1753_v1 = vmul.f32 %v3473_v23, %v3360_v5 }
  0xfa   : > { %v1411_v33 = vrot.slane %v1409_v50, 3  ;;  %v1787_v15 = vshrl.u32 %v1757_v59, 16  ;;  %v1790_v2 = vshll.u32 %v1757_v59, 16  ;;  %v1657_v44 = vshll.u32 %v1622_v48, 16 }
  0xfb   : > { %v1612_v3 = vmul.f32 %v3304_v12, %v3172_v27  ;;  %v2015_v18 = vpack.c.bf16 %v2007_v17, %v2006_v9  ;;  %v3517_v22 = vpack.c.bf16 %v2009_v60, %v2008_v54  ;;  %v1758_v24 = vpack.c.bf16 %v1753_v1, %v1752_v28  ;;  %v1743_v12 = vld [vmem:[#allocation2 + $0x28] sm:$0xf] }
  0xfc   : > { %2418 = vmatmul.msk.bf16.gmra.mxu1 %vm501_vm0, %v1079_v21  ;;  %2516 = vmatmul.msk.bf16.vlgmr.msrb.gmra.mxu3 %vm501_vm0, %v2675_v40  ;;  %v1414_v10 = vrot.slane %v1412_v49, 4  ;;  %v1789_v8 = vrot.slane %v1787_v15, 3  ;;  %v1792_v20 = vrot.slane %v1790_v2, 4  ;;  %v1609_v21 = vunpack.c.l.bf16 %v1600_v11  ;;  %v1995_v49 = vld [vmem:[#allocation2 + $0x28] sm:$0xf]  ;;  %v2676_v2 = vld [vmem:[#allocation2 + $0x10] sm:$0xff] }
  0xfd   : > { %2474 = vmatmul.msk.bf16.gmra.mxu0 %vm501_vm0, %v1407_v51  ;;  %v1613_v5 = vmul.f32 %v3306_v32, %v3177_v57  ;;  %v3521_v25 = vrot.slane %v1657_v44, 1  ;;  %v2032_v6 = vshll.u32 %v2015_v18, 16  ;;  %v2030_v30 = vshrl.u32 %v2015_v18, 16 }
  0xfe   : > { %2446 = vmatmul.msk.bf16.gmra.mxu2 %vm501_vm0, %v1264_v38  ;;  %v2037_v38 = vshll.u32 %v3517_v22, 16  ;;  %v1793_v34 = vor.u32 %v1792_v20, %v1789_v8  ;;  %v1796_v35 = vshrl.u32 %v1758_v24, 16  ;;  %v1799_v27 = vshll.u32 %v1758_v24, 16 }
  0xff   : > { %v2034_v39 = vrot.slane %v2032_v6, 1  ;;  %v1618_v40 = vmul.f32 %v1609_v21, %v3375_v43  ;;  %v1661_v50 = vshrl.u32 %v1622_v48, 16  ;;  %v1415_v52 = vor.u32 %v1414_v10, %v1411_v33 }
 0x100   : > { %v2039_v51 = vrot.slane %v2037_v38, 1  ;;  %v3526_v62 = vsel %vm1044_vm4, %v1784_v56, %v1793_v34  ;;  %v1798_v57 = vrot.slane %v1796_v35, 3  ;;  %v1801_v32 = vrot.slane %v1799_v27, 4 }
 0x101   : > { %v2035_v36 = vor.u32 %v2034_v39, %v2030_v30  ;;  %v1623_v31 = vpack.c.bf16 %v1618_v40, %v1618_v40  ;;  %v1663_v42 = vor.u32 %v1661_v50, %v3521_v25  ;;  %v2010_v45 = vmul.f32 %v3373_v63, %v3245_v29 }
 0x102   : > { %v1802_v17 = vor.u32 %v1801_v32, %v1798_v57  ;;  %v2011_v54 = vmul.f32 %v3465_v13, %v3263_v37  ;;  %v1745_v59 = vunpack.c.l.bf16 %v1743_v12  ;;  %v2004_v48 = vunpack.c.l.bf16 %v1995_v49 }
 0x103   : > { %v3534_v28 = vsel %vm1236_vm5, %v2035_v36, %v2039_v51  ;;  %v1665_v56 = vshll.u32 %v1623_v31, 16  ;;  %v2012_v9 = vmul.f32 %v3473_v23, %v3391_v53  ;;  %v2005_v60 = vunpack.c.l.bf16 %v1996_v14  ;;  %v2691_v31 = vld [vmem:[#allocation2 + $0xc] sm:$0xff] }
 0x104   : > { %v3539_v1 = vsel %vm1044_vm4, %v1793_v34, %v1802_v17  ;;  %v2017_v11 = vpack.c.bf16 %v2011_v54, %v2010_v45  ;;  %v1754_v33 = vmul.f32 %v1745_v59, %v3325_v55  ;;  %v2013_v15 = vmul.f32 %v2004_v48, %v3395_v19 }
 0x105   : > { %v1088_v13 = vsel %vm1044_vm4, %v3458_v7, %v1087_v58  ;;  %v1271_v44 = vrot.slane %v3507_v4, 1  ;;  %v1667_v18 = vrot.slane %v1665_v56, 1  ;;  %v2014_v53 = vmul.f32 %v2005_v60, %v3375_v43  ;;  %v2693_v60 = vld [vmem:[#allocation2 + $0x1c] sm:$0xff] }
 0x106   : > { %v1416_v23 = vsel %vm1044_vm4, %v3467_v41, %v1415_v52  ;;  %v2045_v55 = vshll.u32 %v2017_v11, 16  ;;  %v1759_v24 = vpack.c.bf16 %v1754_v33, %v1754_v33  ;;  %v2018_v19 = vpack.c.bf16 %v2013_v15, %v2012_v9 }
 0x107   : > { %v1620_v47 = vpack.c.bf16 %v1613_v5, %v1612_v3  ;;  %v1668_v7 = vsel %vm1236_vm5, %v1663_v42, %v1667_v18  ;;  %v2041_v43 = vshrl.u32 %v3517_v22, 16  ;;  %v2019_v58 = vpack.c.bf16 %v2014_v53, %v2014_v53  ;;  %v2677_v42 = vld [vmem:[#allocation2 + $0x18] sm:$0xff] }
 0x108   : > { %v1272_v41 = vsel %vm1236_vm5, %v3490_v61, %v1271_v44  ;;  %v2047_v4 = vrot.slane %v2045_v55, 1  ;;  %v1805_v10 = vshrl.u32 %v1759_v24, 16  ;;  %v1808_v8 = vshll.u32 %v1759_v24, 16 }
 0x109   : > { %v2043_v20 = vor.u32 %v2041_v43, %v2039_v51  ;;  %v2053_v21 = vshll.u32 %v2018_v19, 16  ;;  %v2057_v6 = vshrl.u32 %v2018_v19, 16  ;;  %v2061_v3 = vshll.u32 %v2019_v58, 16 }
 0x10a   : > { %v1807_v5 = vrot.slane %v1805_v10, 3  ;;  %v1810_v38 = vrot.slane %v1808_v8, 4  ;;  %v2049_v34 = vshrl.u32 %v2017_v11, 16  ;;  %v1636_v30 = vshll.u32 %v3452_v46, 16  ;;  %v2698_v11 = vld [vmem:[#allocation2 + $0x24] sm:$0xff] }
 0x10b   : > { %v2048_v22 = vsel %vm1236_vm5, %v2043_v20, %v2047_v4  ;;  %v2055_v35 = vrot.slane %v2053_v21, 1  ;;  %v2063_v27 = vrot.slane %v2061_v3, 1  ;;  %v1641_v39 = vshll.u32 %v1620_v47, 16 }
 0x10c   : > { %2419 = vmatmul.msk.bf16.gmra.mxu1 %vm501_vm0, %v1088_v13  ;;  %2517 = vmatmul.msk.bf16.gmra.mxu3 %vm501_vm0, %v2676_v2  ;;  %v1811_v61 = vor.u32 %v1810_v38, %v1807_v5  ;;  %v2051_v12 = vor.u32 %v2049_v34, %v2047_v4  ;;  %v1638_v50 = vrot.slane %v1636_v30, 1  ;;  %v1634_v57 = vshrl.u32 %v3452_v46, 16 }
 0x10d   : > { %2475 = vmatmul.msk.bf16.gmra.mxu0 %vm501_vm0, %v1416_v23  ;;  %v2059_v40 = vor.u32 %v2057_v6, %v2055_v35  ;;  %v1643_v32 = vrot.slane %v1641_v39, 1  ;;  %v1614_v45 = vmul.f32 %v3371_v26, %v3245_v29  ;;  %v1615_v54 = vmul.f32 %v3373_v63, %v3263_v37  ;;  %v2692_v29 = vld [vmem:[#allocation2 + $0x14] sm:$0xff]  ;;  %v2682_v26 = vld [vmem:[#allocation2 + $0x20] sm:$0xff] }
 0x10e   : > { %2447 = vmatmul.msk.bf16.gmra.mxu2 %vm501_vm0, %v1272_v41  ;;  %v1812_v51 = vsel %vm1044_vm4, %v1802_v17, %v1811_v61  ;;  %v2056_v49 = vsel %vm1236_vm5, %v2051_v12, %v2055_v35  ;;  %v1639_v14 = vor.u32 %v1638_v50, %v1634_v57  ;;  %v1645_v59 = vshrl.u32 %v1620_v47, 16 }
 0x10f   : > { %v2064_v52 = vsel %vm1236_vm5, %v2059_v40, %v2063_v27  ;;  %v1621_v17 = vpack.c.bf16 %v1615_v54, %v1614_v45 }
 0x110   : > { %v1644_v36 = vsel %vm1236_vm5, %v1639_v14, %v1643_v32  ;;  %v1647_v56 = vor.u32 %v1645_v59, %v1643_v32 }
 0x111   : > { %v1649_v46 = vshll.u32 %v1621_v17, 16  ;;  %v1653_v37 = vshrl.u32 %v1621_v17, 16 }
 0x113   : > { %v1651_v48 = vrot.slane %v1649_v46, 1 }
 0x115   : > { %v1652_v9 = vsel %vm1236_vm5, %v1647_v56, %v1651_v48  ;;  %v1655_v63 = vor.u32 %v1653_v37, %v1651_v48 }
 0x11c   : > { %2544 = vmatmul.msk.bf16.vlgmr.msrb.gmra.mxu1 %vm501_vm0, %v1644_v36  ;;  %2518 = vmatmul.msk.bf16.gmra.mxu3 %vm501_vm0, %v2677_v42 }
 0x11d   : > { %2616 = vmatmul.msk.bf16.vlgmr.msra.gmra.mxu0 %vm501_vm0, %v2691_v31 }
 0x11e   : > { %2572 = vmatmul.msk.bf16.vlgmr.msrb.gmra.mxu2 %vm501_vm0, %v3503_v0  ;;  %v1660_v0 = vsel %vm1236_vm5, %v1655_v63, %v3521_v25  ;;  %v3646_v63 = vld [vmem:[%s3715_s6] ss:$0 sm:$0xff] }
 0x12c   : > { %2545 = vmatmul.msk.bf16.gmra.mxu1 %vm501_vm0, %v1652_v9  ;;  %2519 = vmatmul.msk.bf16.gmra.mxu3 %vm501_vm0, %v2682_v26 }
 0x12d   : > { %2617 = vmatmul.msk.bf16.gmra.mxu0 %vm501_vm0, %v2692_v29 }
 0x12e   : > { %2573 = vmatmul.msk.bf16.gmra.mxu2 %vm501_vm0, %v3526_v62 }
 0x13c   : > { %2546 = vmatmul.msk.bf16.gmra.mxu1 %vm501_vm0, %v1660_v0  ;;  %2644 = vmatmul.msk.bf16.vlgmr.msra.gmra.mxu3 %vm501_vm0, %v3534_v28 }
 0x13d   : > { %2618 = vmatmul.msk.bf16.gmra.mxu0 %vm501_vm0, %v2693_v60 }
 0x13e   : > { %2574 = vmatmul.msk.bf16.gmra.mxu2 %vm501_vm0, %v3539_v1 }
 0x14c   : > { %2547 = vmatmul.msk.bf16.gmra.mxu1 %vm501_vm0, %v1668_v7  ;;  %2645 = vmatmul.msk.bf16.gmra.mxu3 %vm501_vm0, %v2048_v22 }
 0x14d   : > { %2619 = vmatmul.msk.bf16.gmra.mxu0 %vm501_vm0, %v2698_v11 }
 0x14e   : > { %2575 = vmatmul.msk.bf16.gmra.mxu2 %vm501_vm0, %v1812_v51  ;;  %v1029_v25 = vpop.f32.mrf.mxu3 }
 0x151   : > { %v1024_v62 = vpop.f32.mrf.mxu2 }
 0x156   : > { %v3597_v33 = vpop.f32.mrf.mxu3 }
 0x159   : > { %v1134_v15 = vpop.f32.mrf.mxu1  ;;  %v1026_v13 = vpop.f32.mrf.mxu2 }
 0x15a   : > { %v1462_v28 = vpop.f32.mrf.mxu0  ;;  %v1135_v50 = vadd.f32 %v1134_v15, %v1024_v62 }
 0x15c   : > { %2646 = vmatmul.msk.bf16.gmra.mxu3 %vm501_vm0, %v2056_v49 }
 0x15f   : > { %v3600_v2 = vpop.f32.mrf.mxu3 }
 0x161   : > { %v1136_v1 = vpop.f32.mrf.mxu1  ;;  %v1318_v44 = vpop.f32.mrf.mxu2 }
 0x162   : > { %v1464_v53 = vpop.f32.mrf.mxu0  ;;  %v1338_v57 = vadd.f32 %v1318_v44, %v1135_v50  ;;  %v1137_v31 = vadd.f32 %v1136_v1, %v1026_v13 }
 0x164   : > { %v1482_v36 = vadd.f32 %v1462_v28, %v1338_v57 }
 0x167   : > { %v3602_v18 = vpop.f32.mrf.mxu3 }
 0x169   : > { %v1320_v23 = vpop.f32.mrf.mxu2  ;;  %v1139_v55 = vpop.f32.mrf.mxu1 }
 0x16a   : > { %v1467_v47 = vpop.f32.mrf.mxu0  ;;  %v1339_v54 = vadd.f32 %v1320_v23, %v1137_v31  ;;  %v1140_v29 = vadd.f32 %v1139_v55, %v1029_v25 }
 0x16c   : > { %2647 = vmatmul.msk.bf16.gmra.mxu3 %vm501_vm0, %v2064_v52  ;;  %v1483_v56 = vadd.f32 %v1464_v53, %v1339_v54 }
 0x16f   : > { %v3605_v24 = vpop.f32.mrf.mxu3 }
 0x171   : > { %v1323_v19 = vpop.f32.mrf.mxu2  ;;  %v1141_v16 = vpop.f32.mrf.mxu1 }
 0x172   : > { %v3609_v58 = vpop.f32.mrf.mxu0  ;;  %v1340_v60 = vadd.f32 %v1323_v19, %v1140_v29  ;;  %v1142_v53 = vadd.f32 %v1141_v16, %v3597_v33 }
 0x174   : > { %v1484_v25 = vadd.f32 %v1467_v47, %v1340_v60 }
 0x177   : > { %v3607_v7 = vpop.f32.mrf.mxu3 }
 0x179   : > { %v1325_v43 = vpop.f32.mrf.mxu2  ;;  %v3611_v41 = vpop.f32.mrf.mxu1 }
 0x17a   : > { %v3615_v8 = vpop.f32.mrf.mxu0  ;;  %v1145_v33 = vadd.f32 %v3611_v41, %v3600_v2 }
 0x17f   : > { %v1564_v4 = vpop.f32.mrf.mxu3 }
 0x180   : > { %v1584_v42 = vadd.f32 %v1564_v4, %v1482_v36 }
 0x181   : > { %v3613_v10 = vpop.f32.mrf.mxu2  ;;  %v3617_v21 = vpop.f32.mrf.mxu1 }
 0x182   : > { %v3621_v5 = vpop.f32.mrf.mxu0  ;;  %v1147_v2 = vadd.f32 %v3617_v21, %v3602_v18 }
 0x187   : > { %v1566_v20 = vpop.f32.mrf.mxu3 }
 0x188   : > { %v1585_v26 = vadd.f32 %v1566_v20, %v1483_v56  ;;  %v1341_v20 = vadd.f32 %v1325_v43, %v1142_v53  ;;  %v1342_v43 = vadd.f32 %v3613_v10, %v1145_v33 }
 0x189   : > { %v3619_v6 = vpop.f32.mrf.mxu2  ;;  %v3623_v38 = vpop.f32.mrf.mxu1 }
 0x18a   : > { %v3627_v22 = vpop.f32.mrf.mxu0  ;;  %v1485_v57 = vadd.f32 %v3609_v58, %v1341_v20  ;;  %v1343_v56 = vadd.f32 %v3619_v6, %v1147_v2  ;;  %v1150_v21 = vadd.f32 %v3623_v38, %v3605_v24 }
 0x18c   : > { %v1487_v60 = vadd.f32 %v3621_v5, %v1343_v56 }
 0x18f   : > { %v1569_v3 = vpop.f32.mrf.mxu3 }
 0x190   : > { %v1586_v23 = vadd.f32 %v1569_v3, %v1484_v25 }
 0x191   : > { %v3625_v34 = vpop.f32.mrf.mxu2  ;;  %v3629_v35 = vpop.f32.mrf.mxu1 }
 0x192   : > { %v3635_v12 = vpop.f32.mrf.mxu0  ;;  %v1152_v38 = vadd.f32 %v3629_v35, %v3607_v7 }
 0x197   : > { %v1571_v30 = vpop.f32.mrf.mxu3 }
 0x198   : > { %v1587_v16 = vadd.f32 %v1571_v30, %v1485_v57 }
 0x199   : > { %v3631_v27 = vpop.f32.mrf.mxu2  ;;  %v1714_v39 = vpop.f32.mrf.mxu1 }
 0x19a   : > { %v1960_v49 = vpop.f32.mrf.mxu0  ;;  %v1734_v17 = vadd.f32 %v1714_v39, %v1584_v42 }
 0x19f   : > { %v3633_v61 = vpop.f32.mrf.mxu3 }
 0x1a1   : > { %v1858_v51 = vpop.f32.mrf.mxu2  ;;  %v1716_v32 = vpop.f32.mrf.mxu1 }
 0x1a2   : > { %v1962_v46 = vpop.f32.mrf.mxu0  ;;  %v1878_v59 = vadd.f32 %v1858_v51, %v1734_v17  ;;  %v1735_v11 = vadd.f32 %v1716_v32, %v1585_v26 }
 0x1a4   : > { %v1980_v37 = vadd.f32 %v1960_v49, %v1878_v59 }
 0x1a7   : > { %v3637_v40 = vpop.f32.mrf.mxu3 }
 0x1a9   : > { %v1860_v14 = vpop.f32.mrf.mxu2  ;;  %v1719_v48 = vpop.f32.mrf.mxu1 }
 0x1aa   : > { %v1879_v15 = vadd.f32 %v1860_v14, %v1735_v11  ;;  %v1965_v28 = vpop.f32.mrf.mxu0  ;;  %v1736_v39 = vadd.f32 %v1719_v48, %v1586_v23 }
 0x1ac   : > { %v1981_v55 = vadd.f32 %v1962_v46, %v1879_v15  ;;  %v1486_v46 = vadd.f32 %v3615_v8, %v1342_v43 }
 0x1ae   : > { %v1588_v41 = vadd.f32 %v3633_v61, %v1486_v46  ;;  %v1589_v61 = vadd.f32 %v3637_v40, %v1487_v60 }
 0x1af   : > { %v3639_v52 = vpop.f32.mrf.mxu3 }
 0x1b1   : > { %v1863_v9 = vpop.f32.mrf.mxu2  ;;  %v1721_v44 = vpop.f32.mrf.mxu1 }
 0x1b2   : > { %v1880_v50 = vadd.f32 %v1863_v9, %v1736_v39  ;;  %v1967_v32 = vpop.f32.mrf.mxu0  ;;  %v1737_v31 = vadd.f32 %v1721_v44, %v1587_v16 }
 0x1b4   : > { %v1982_v3 = vadd.f32 %v1965_v28, %v1880_v50 }
 0x1b7   : > { %v3641_v45 = vpop.f32.mrf.mxu3 }
 0x1b9   : > { %v1865_v19 = vpop.f32.mrf.mxu2  ;;  %v1724_v14 = vpop.f32.mrf.mxu1 }
 0x1ba   : > { %v1881_v17 = vadd.f32 %v1865_v19, %v1737_v31  ;;  %v1970_v48 = vpop.f32.mrf.mxu0  ;;  %v1738_v9 = vadd.f32 %v1724_v14, %v1588_v41 }
 0x1bc   : > { %v1983_v30 = vadd.f32 %v1967_v32, %v1881_v17 }
 0x1bf   : > { %v2110_v0 = vpop.f32.mrf.mxu3 }
 0x1c0   : > { %v2130_v62 = vadd.f32 %v2110_v0, %v1980_v37 }
 0x1c1   : > { %v1868_v54 = vpop.f32.mrf.mxu2  ;;  %v1726_v26 = vpop.f32.mrf.mxu1 }
 0x1c2   : > { %v2142_v13 = vadd.f32 %v3646_v63, %v2130_v62  ;;  %v1882_v37 = vadd.f32 %v1868_v54, %v1738_v9  ;;  %v1344_v62 = vadd.f32 %v3625_v34, %v1150_v21  ;;  %v1739_v15 = vadd.f32 %v1726_v26, %v1589_v61  ;;  %v1972_v28 = vpop.f32.mrf.mxu0 }
 0x1c4   : > { %v2150_v1 = vpack.c.bf16 %v2142_v13, %v2142_v13  ;;  %v1984_v11 = vadd.f32 %v1970_v48, %v1882_v37  ;;  %v1488_v44 = vadd.f32 %v3627_v22, %v1344_v62 }
 0x1c6   : > { %2158 = vst.msk [vmem:[%s3653_s29] sm:$0xf] %vm623_vm1, %v2150_v1  ;;  %v1590_v40 = vadd.f32 %v3639_v52, %v1488_v44 }
 0x1c7   : > { %v2112_v4 = vpop.f32.mrf.mxu3 }
 0x1c8   : > { %v2131_v51 = vadd.f32 %v2112_v4, %v1981_v55  ;;  %v1345_v55 = vadd.f32 %v3631_v27, %v1152_v38 }
 0x1c9   : > { %v1870_v0 = vpop.f32.mrf.mxu2  ;;  %v1729_v5 = vpop.f32.mrf.mxu1 }
 0x1ca   : > { %v2143_v49 = vadd.f32 %v3646_v63, %v2131_v51  ;;  %v1883_v25 = vadd.f32 %v1870_v0, %v1739_v15  ;;  %v1740_v19 = vadd.f32 %v1729_v5, %v1590_v40  ;;  %v1975_v22 = vpop.f32.mrf.mxu0  ;;  %v1489_v51 = vadd.f32 %v3635_v12, %v1345_v55 }
 0x1cc   : > { %v2151_v47 = vpack.c.bf16 %v2143_v49, %v2143_v49  ;;  %v1985_v34 = vadd.f32 %v1972_v28, %v1883_v25  ;;  %v1591_v7 = vadd.f32 %v3641_v45, %v1489_v51 }
 0x1ce   : > { %2159 = vst.msk [vmem:[%s3653_s29 + $0x4] sm:$0xf] %vm623_vm1, %v2151_v47 }
 0x1cf   : > { %v2115_v36 = vpop.f32.mrf.mxu3 }
 0x1d0   : > { %v2132_v42 = vadd.f32 %v2115_v36, %v1982_v3 }
 0x1d1   : > { %v1873_v24 = vpop.f32.mrf.mxu2  ;;  %v1731_v49 = vpop.f32.mrf.mxu1 }
 0x1d2   : > { %v2144_v58 = vadd.f32 %v3646_v63, %v2132_v42  ;;  %v1884_v20 = vadd.f32 %v1873_v24, %v1740_v19  ;;  %v1741_v27 = vadd.f32 %v1731_v49, %v1591_v7  ;;  %v1977_v3 = vpop.f32.mrf.mxu0 }
 0x1d4   : > { %v2152_v59 = vpack.c.bf16 %v2144_v58, %v2144_v58  ;;  %v1986_v35 = vadd.f32 %v1975_v22, %v1884_v20 }
 0x1d6   : > { %2160 = vst.msk [vmem:[%s3653_s29 + $0x8] sm:$0xf] %vm623_vm1, %v2152_v59 }
 0x1d7   : > { %v2117_v10 = vpop.f32.mrf.mxu3 }
 0x1d8   : > { %v2133_v29 = vadd.f32 %v2117_v10, %v1983_v30 }
 0x1d9   : > { %v1875_v52 = vpop.f32.mrf.mxu2 }
 0x1da   : > { %v2145_v8 = vadd.f32 %v3646_v63, %v2133_v29  ;;  %v1885_v32 = vadd.f32 %v1875_v52, %v1741_v27 }
 0x1dc   : > { %v2153_v18 = vpack.c.bf16 %v2145_v8, %v2145_v8  ;;  %v1987_v12 = vadd.f32 %v1977_v3, %v1885_v32 }
 0x1de   : > { %2161 = vst.msk [vmem:[%s3653_s29 + $0xc] sm:$0xf] %vm623_vm1, %v2153_v18 }
 0x1df   : > { %v2120_v6 = vpop.f32.mrf.mxu3 }
 0x1e0   : > { %v2134_v13 = vadd.f32 %v2120_v6, %v1984_v11 }
 0x1e2   : > { %v2146_v1 = vadd.f32 %v3646_v63, %v2134_v13 }
 0x1e4   : > { %v2154_v53 = vpack.c.bf16 %v2146_v1, %v2146_v1 }
 0x1e6   : > { %2162 = vst.msk [vmem:[%s3653_s29 + $0x10] sm:$0xf] %vm623_vm1, %v2154_v53 }
 0x1e7   : > { %v2122_v23 = vpop.f32.mrf.mxu3 }
 0x1e8   : > { %v2135_v4 = vadd.f32 %v2122_v23, %v1985_v34 }
 0x1ea   : > { %v2147_v39 = vadd.f32 %v3646_v63, %v2135_v4 }
 0x1ec   : > { %v2155_v50 = vpack.c.bf16 %v2147_v39, %v2147_v39 }
 0x1ee   : > { %2163 = vst.msk [vmem:[%s3653_s29 + $0x14] sm:$0xf] %vm623_vm1, %v2155_v50 }
 0x1ef   : > { %v2125_v57 = vpop.f32.mrf.mxu3 }
 0x1f0   : > { %v2136_v47 = vadd.f32 %v2125_v57, %v1986_v35 }
 0x1f2   : > { %v2148_v33 = vadd.f32 %v3646_v63, %v2136_v47 }
 0x1f4   : > { %v2156_v16 = vpack.c.bf16 %v2148_v33, %v2148_v33 }
 0x1f6   : > { %2164 = vst.msk [vmem:[%s3653_s29 + $0x18] sm:$0xf] %vm623_vm1, %v2156_v16 }
 0x1f7   : > { %v2127_v14 = vpop.f32.mrf.mxu3 }
 0x1f8   : > { %v2137_v36 = vadd.f32 %v2127_v14, %v1987_v12 }
 0x1fa   : > { %v2149_v45 = vadd.f32 %v3646_v63, %v2137_v36 }
 0x1fc   : > { %v2157_v43 = vpack.c.bf16 %v2149_v45, %v2149_v45 }
 0x1fe   : > { %2165 = vst.msk [vmem:[%s3653_s29 + $0x1c] sm:$0xf] %vm623_vm1, %v2157_v43 }
 0x1ff PF: > { %s17_s26 = sadd.s32 1, %s2840_s26   ;;  %s3745_s24 = smov %s2836_s25 }
 0x200   : > { %p14_p5 = scmp.ge.s32.totalorder %s17_s26, 4   ;;  %s3746_s25 = smov %s3748_s27 }
 0x202   :  { %16 = sbr.rel (!%p14_p5) target bundleno = 2 (0x2), region = 92 }

// kernel: waveblock_forward.1
= control target key start
LH: loop header
LB: loop body
LE: loop exit
PB: predicated region body
PF: predicated region fallthrough
CT: control target
= control target key end

     0   :  { %s2884_s24 = smov 0   ;;  %s2886_s25 = smov 0   ;;  %s3709_s0 = inlined_call_operand.vmem [shape: bf16[2,64,64], index: 0, kind: input, shape index: {}, may-alias: {0,1,2}]   ;;  %s3710_s1 = inlined_call_operand.vmem [shape: bf16[2,64,64], index: 1, kind: input, shape index: {}, may-alias: {0,1,2}]   ;;  %s3711_s2 = inlined_call_operand.vmem [shape: bf16[2,64,64], index: 2, kind: input, shape index: {}, may-alias: {0,1,2}]   ;;  %s3712_s3 = inlined_call_operand.vmem [shape: bf16[64,64], index: 3, kind: input, shape index: {}]   ;;  %s3713_s4 = inlined_call_operand.vmem [shape: f32[1,64], index: 4, kind: input, shape index: {}]   ;;  %s3714_s5 = inlined_call_operand.vmem [shape: bf16[9,64,64], index: 5, kind: input, shape index: {}]   ;;  %s3715_s6 = inlined_call_operand.vmem [shape: f32[1,64], index: 6, kind: input, shape index: {}]   ;;  %s3716_s7 = inlined_call_operand.vmem [shape: bf16[2,64,64], index: 7, kind: output, shape index: {}]  }
   0x1   :  { %s2888_s26 = smov 0  }
   0x2 LB: > { %s29_s27 = sadd.s32 1, %s2836_s25  ;;  %p2293_p0 = scmp.ge.s32.totalorder %s2840_s26, 1  ;;  %s2840_s26 = sphi %s2888_s26, %s17_s26   ;;  %s2836_s25 = sphi %s2886_s25, %s3746_s25   ;;  %s2832_s24 = sphi %s2884_s24, %s3745_s24  }
   0x3   : > { %p31_p1 = scmp.ge.s32.totalorder %s29_s27, 2  ;;  %p320_p2 = scmp.lt.s32.totalorder %s2840_s26, 3 }
   0x5   : > { %s3748_s27 = smov (%p31_p1, %s29_s27), 0  ;;  %p321_p3 = pnand %p2293_p0, %p320_p2 }
   0x6   : > { %p385_p4 = scmp.lt.s32.totalorder (!%p321_p3), %s2832_s24, 1 }
   0x7   : > { %324 = sbr.rel (%p321_p3) target bundleno = 511 (0x1ff), region = 48 }
   0xc   : > { %v2658_v0 = vld [vmem:[%s3712_s3 + $0x18] sm:$0xff]  ;;  %v2657_v1 = vld [vmem:[%s3712_s3 + $0x10] sm:$0xff]  ;;  %s3750_s24 = smov (!%p385_p4, %s2832_s24), 1  ;;  %v2656_v2 = vld [vmem:[%s3712_s3 + $0x8] sm:$0xff]  ;;  %vm501_vm0 = vcmask 523264   ;;  %v700_v11 = vlaneseq  ;;  %vm623_vm1 = vcmask 519168  }
   0xd   : > { %518 = vmatpush.bf16.msra.mxu0 %v2658_v0  ;;  %2762 = vmatpush.bf16.msra.mxu1 %v2658_v0  ;;  %s2911_s11 = sshll.u32 %s3750_s24, 5  ;;  %v2655_v3 = vld [vmem:[%s3712_s3] sm:$0xff]  ;;  %v2674_v22 = vld [vmem:[%s3714_s5 + $0x38] sm:$0xff]  ;;  %v2842_v26 = vmov 0   ;;  %v2673_v38 = vld [vmem:[%s3714_s5 + $0x30] sm:$0xff]  ;;  %v2843_v43 = vmov 0.0  }
   0xe   : > { %677 = vmatpush.bf16.msra.mxu2 %v2658_v0  ;;  %s2653_s12 = sadd.s32 28, %s2911_s11  ;;  %s392_s17 = scalar_lea.vmem %s3709_s0, %s2911_s11  ;;  %v2937_v10 = vld [vmem:[%s3713_s4] ss:$0 sm:$0xff]  ;;  %v2939_v12 = vshrl.u32 %v700_v11, 7  ;;  %2766 = vmatpush.bf16.msra.mxu3 %v2674_v22  ;;  %638 = vst.msk [vmem:[#allocation2] sm:$0xf] %vm623_vm1, %v2842_v26 }
   0xf   : > { %s421_s20 = scalar_lea.vmem %s3711_s2, %s2653_s12  ;;  %v2659_v4 = vld [vmem:[%s392_s17] sm:$0xff]  ;;  %v2662_v5 = vld [vmem:[%s392_s17 + $0x18] sm:$0xff]  ;;  %s405_s23 = scalar_lea.vmem %s3710_s1, %s2911_s11  ;;  %v2660_v7 = vld [vmem:[%s392_s17 + $0x8] sm:$0xff]  ;;  %699 = vst.msk [vmem:[#allocation2 + $0x2c] sm:$0xf] %vm623_vm1, %v2842_v26  ;;  %vm903_vm6 = vcmask 1046528  }
  0x10   : > { %v669_v6 = vld [vmem:[%s421_s20] sm:$0xf]  ;;  %v2661_v9 = vld [vmem:[%s392_s17 + $0x10] sm:$0xff]  ;;  %v713_v19 = vand.u32 7, %v2939_v12  ;;  %v2949_v27 = vadd.s32 8, %v2939_v12  ;;  %v2959_v32 = vadd.s32 16, %v2939_v12  ;;  %s3653_s29 = scalar_lea.vmem %s3716_s7, %s2911_s11 }
  0x11   : > { %519 = vmatpush.bf16.msra.mxu0 %v2657_v1  ;;  %2763 = vmatpush.bf16.msra.mxu1 %v2657_v1  ;;  %v639_v8 = vld [vmem:[%s405_s23] sm:$0xf]  ;;  %v2962_v33 = vadd.s32 24, %v2939_v12  ;;  %v2672_v50 = vld [vmem:[%s3714_s5 + $0x28] sm:$0xff]  ;;  %v2686_v28 = vld [vmem:[%s3714_s5 + $0x78] sm:$0xff]  ;;  %vm1188_vm11 = vcmask 1040384  }
  0x12   : > { %678 = vmatpush.bf16.msra.mxu2 %v2657_v1  ;;  %vm2953_vm2 = vcmp.gt.s32.totalorder %v713_v19, 0  ;;  %2767 = vmatpush.bf16.msra.mxu3 %v2673_v38  ;;  %v720_v42 = vand.u32 7, %v2949_v27  ;;  %v727_v48 = vand.u32 7, %v2959_v32  ;;  %vm3045_vm7 = vcmp.lt.s32.totalorder %v713_v19, 7  ;;  %v2668_v32 = vld [vmem:[%s3714_s5 + $0x8] sm:$0xff] }
  0x13   : > { %v2340_v44 = vsel %vm2953_vm2, 1.0, %v2843_v43  ;;  %v734_v51 = vand.u32 7, %v2962_v33 }
  0x14   : > { %vm2983_vm3 = vcmp.gt.s32.totalorder %v720_v42, 0  ;;  %v2987_v58 = vrot.slane %v2340_v44, 1  ;;  %vm2991_vm4 = vcmp.gt.s32.totalorder %v727_v48, 0  ;;  %vm3061_vm8 = vcmp.lt.s32.totalorder %v720_v42, 7 }
  0x15   : > { %520 = vmatpush.bf16.msra.mxu0 %v2656_v2  ;;  %2764 = vmatpush.bf16.msra.mxu1 %v2656_v2  ;;  %vm3006_vm5 = vcmp.gt.s32.totalorder %v734_v51, 0  ;;  %vm3067_vm9 = vcmp.lt.s32.totalorder %v727_v48, 7  ;;  %vm3074_vm10 = vcmp.lt.s32.totalorder %v734_v51, 7  ;;  %v2684_v48 = vld [vmem:[%s3714_s5 + $0x68] sm:$0xff]  ;;  %v2349_v11 = vsel %vm3061_vm8, 1.0, %v2843_v43 }
  0x16   : > { %679 = vmatpush.bf16.msra.mxu2 %v2656_v2  ;;  %2768 = vmatpush.bf16.msra.mxu3 %v2672_v50 }
  0x19   : > { %521 = vmatpush.bf16.msra.mxu0 %v2655_v3  ;;  %2765 = vmatpush.bf16.msra.mxu1 %v2655_v3 }
  0x1a   : > { %680 = vmatpush.bf16.msra.mxu2 %v2655_v3 }
  0x1c   : > { %2334 = vmatmul.msk.bf16.vlgmr.msra.gmra.mxu0 %vm501_vm0, %v2659_v4  ;;  %2337 = vmatmul.msk.bf16.vlgmr.msra.gmra.mxu1 %vm501_vm0, %v2662_v5 }
  0x1d   : > { %647 = vmatpush.bf16.msrb.mxu1 %v2658_v0  ;;  %2339 = vmatmul.msk.bf16.vlgmr.msra.gmra.mxu2 %vm501_vm0, %v669_v6  ;;  %v2671_v6 = vld [vmem:[%s3714_s5 + $0x20] sm:$0xff] }
  0x1e   : > { %1019 = vmatpush.bf16.msrb.mxu2 %v2674_v22  ;;  %2769 = vmatpush.bf16.msra.mxu3 %v2671_v6 }
  0x1f   : > { %1457 = vmatpush.bf16.msrb.mxu0 %v2686_v28 }
  0x21   : > { %648 = vmatpush.bf16.msrb.mxu1 %v2657_v1 }
  0x22   : > { %1020 = vmatpush.bf16.msrb.mxu2 %v2673_v38  ;;  %v2685_v38 = vld [vmem:[%s3714_s5 + $0x70] sm:$0xff] }
  0x23   : > { %1458 = vmatpush.bf16.msrb.mxu0 %v2685_v38 }
  0x25   : > { %649 = vmatpush.bf16.msrb.mxu1 %v2656_v2 }
  0x26   : > { %1021 = vmatpush.bf16.msrb.mxu2 %v2672_v50 }
  0x27   : > { %1459 = vmatpush.bf16.msrb.mxu0 %v2684_v48 }
  0x29   : > { %650 = vmatpush.bf16.msrb.mxu1 %v2655_v3 }
  0x2a   : > { %1022 = vmatpush.bf16.msrb.mxu2 %v2671_v6  ;;  %v2680_v6 = vld [vmem:[%s3714_s5 + $0x50] sm:$0xff] }
  0x2c   : > { %2335 = vmatmul.msk.bf16.gmra.mxu0 %vm501_vm0, %v2660_v7  ;;  %2338 = vmatmul.msk.bf16.vlgmr.msrb.gmra.mxu1 %vm501_vm0, %v639_v8 }
  0x3c   : > { %2336 = vmatmul.msk.bf16.gmra.mxu0 %vm501_vm0, %v2661_v9 }
  0x99   : > { %v523_v13 = vpop.f32.mrf.mxu0  ;;  %v538_v14 = vpop.f32.mrf.mxu1 }
  0x9a   : > { %v524_v15 = vadd.f32 %v2937_v10, %v523_v13  ;;  %v539_v16 = vadd.f32 %v2937_v10, %v538_v14 }
  0x9c   : > { %v551_v17 = vmul.f32 0.044715, %v524_v15  ;;  %v557_v18 = vmul.f32 0.044715, %v539_v16  ;;  %v543_v49 = vmul.f32 0.5, %v524_v15  ;;  %v549_v55 = vmul.f32 0.5, %v539_v16 }
  0x9e   : > { %v559_v20 = vmul.f32 %v551_v17, %v524_v15  ;;  %v565_v21 = vmul.f32 %v557_v18, %v539_v16  ;;  %v3018_v17 = vsel %vm2991_vm4, 1.0, %v2843_v43  ;;  %vm1044_vm4 = vsmask.f32 4352 }
  0xa0   : > { %v567_v23 = vmul.f32 %v559_v20, %v524_v15  ;;  %v573_v24 = vmul.f32 %v565_v21, %v539_v16  ;;  %v682_v25 = vpop.f32.mrf.mxu2 }
  0xa1   : > { %v683_v29 = vadd.f32 %v2937_v10, %v682_v25  ;;  %v525_v30 = vpop.f32.mrf.mxu0  ;;  %v540_v31 = vpop.f32.mrf.mxu1 }
  0xa2   : > { %v575_v34 = vadd.f32 %v567_v23, %v524_v15  ;;  %v581_v35 = vadd.f32 %v573_v24, %v539_v16  ;;  %v526_v36 = vadd.f32 %v2937_v10, %v525_v30  ;;  %v541_v37 = vadd.f32 %v2937_v10, %v540_v31  ;;  %v2670_v23 = vld [vmem:[%s3714_s5 + $0x18] sm:$0xff] }
  0xa3   : > { %v687_v39 = vmul.f32 0.044715, %v683_v29  ;;  %v2979_v56 = vmul.f32 0.5, %v683_v29  ;;  %v3013_v16 = vsel %vm2983_vm3, 1.0, %v2843_v43  ;;  %1129 = vmatpush.bf16.msra.mxu1 %v2670_v23 }
  0xa4   : > { %v583_v40 = vmul.f32 0.7978846, %v575_v34  ;;  %v589_v41 = vmul.f32 0.7978846, %v581_v35  ;;  %v552_v46 = vmul.f32 0.044715, %v526_v36 }
  0xa5   : > { %v688_v45 = vmul.f32 %v687_v39, %v683_v29  ;;  %v558_v47 = vmul.f32 0.044715, %v541_v37  ;;  %v2995_v2 = vmul.f32 0.5, %v526_v36  ;;  %v2997_v3 = vmul.f32 0.5, %v541_v37  ;;  %v2681_v39 = vld [vmem:[%s3714_s5 + $0x58] sm:$0xff] }
  0xa6   : > { %2798 = vtanh.f32 %v583_v40  ;;  %v560_v53 = vmul.f32 %v552_v46, %v526_v36  ;;  %v905_v31 = vrot.slane %v3013_v16, 1  ;;  %1313 = vmatpush.bf16.msra.mxu2 %v2681_v39 }
  0xa7   : > { %2800 = vtanh.f32 %v589_v41  ;;  %v689_v52 = vmul.f32 %v688_v45, %v683_v29  ;;  %v566_v54 = vmul.f32 %v558_v47, %v541_v37  ;;  %v907_v45 = vrot.slane %v3018_v17, 1  ;;  %v2678_v47 = vld [vmem:[%s3714_s5 + $0x40] sm:$0xff] }
  0xa8   : > { %v684_v59 = vpop.f32.mrf.mxu2  ;;  %v568_v61 = vmul.f32 %v560_v53, %v526_v36  ;;  %v3090_v33 = vsel %vm903_vm6, %v2987_v58, %v905_v31 }
  0xa9   : > { %v690_v60 = vadd.f32 %v689_v52, %v683_v29  ;;  %v574_v62 = vmul.f32 %v566_v54, %v541_v37  ;;  %v528_v63 = vpop.f32.mrf.mxu0  ;;  %v652_v0 = vpop.f32.mrf.mxu1  ;;  %v3029_v29 = vsel %vm3006_vm5, 1.0, %v2843_v43  ;;  %v3052_v54 = vld [vmem:[#allocation2] sm:$0x8]  ;;  %vm1236_vm5 = vsmask.f32 7424 }
  0xaa   : > { %v529_v4 = vadd.f32 %v2937_v10, %v528_v63  ;;  %v653_v5 = vadd.f32 %v2937_v10, %v652_v0  ;;  %v576_v8 = vadd.f32 %v568_v61, %v526_v36  ;;  %v909_v46 = vrot.slane %v3029_v29, 1  ;;  %1314 = vmatpush.bf16.msra.mxu2 %v2680_v6 }
  0xab   : > { %v691_v7 = vmul.f32 0.7978846, %v690_v60  ;;  %v582_v9 = vadd.f32 %v574_v62, %v541_v37  ;;  %v2669_v37 = vld [vmem:[%s3714_s5 + $0x10] sm:$0xff]  ;;  %v878_v1 = vunpack.c.l.bf16 %v3052_v54  ;;  %v3195_v6 = vadd.s32 48, %v2939_v12 }
  0xac   : > { %v2799_v13 = vpop.eup %2798  ;;  %v553_v14 = vmul.f32 0.044715, %v529_v4  ;;  %v657_v15 = vmul.f32 0.044715, %v653_v5  ;;  %v584_v21 = vmul.f32 0.7978846, %v576_v8  ;;  %1130 = vmatpush.bf16.msra.mxu1 %v2669_v37 }
  0xad   : > { %v2801_v18 = vpop.eup %2800  ;;  %v599_v20 = vadd.f32 1.0, %v2799_v13  ;;  %2802 = vtanh.f32 %v691_v7  ;;  %v590_v22 = vmul.f32 0.7978846, %v582_v9  ;;  %v3055_v57 = vmul.f32 0.5, %v529_v4 }
  0xae   : > { %v605_v24 = vadd.f32 1.0, %v2801_v18  ;;  %v561_v25 = vmul.f32 %v553_v14, %v529_v4  ;;  %v658_v26 = vmul.f32 %v657_v15, %v653_v5  ;;  %2804 = vtanh.f32 %v584_v21  ;;  %v2667_v14 = vld [vmem:[%s3714_s5] sm:$0xff]  ;;  %v2679_v18 = vld [vmem:[%s3714_s5 + $0x48] sm:$0xff] }
  0xaf   : > { %v607_v30 = vmul.f32 %v599_v20, %v543_v49  ;;  %2806 = vtanh.f32 %v590_v22  ;;  %v3057_v59 = vmul.f32 0.5, %v653_v5  ;;  %v2348_v7 = vsel %vm3045_vm7, 1.0, %v2843_v43  ;;  %v2683_v15 = vld [vmem:[%s3714_s5 + $0x60] sm:$0xff]  ;;  %1315 = vmatpush.bf16.msra.mxu2 %v2679_v18 }
  0xb0   : > { %v613_v34 = vmul.f32 %v605_v24, %v549_v55  ;;  %v569_v35 = vmul.f32 %v561_v25, %v529_v4  ;;  %v659_v36 = vmul.f32 %v658_v26, %v653_v5  ;;  %1131 = vmatpush.bf16.msra.mxu1 %v2668_v32  ;;  %v2350_v20 = vsel %vm3067_vm9, 1.0, %v2843_v43  ;;  %1460 = vmatpush.bf16.msrb.mxu0 %v2683_v15  ;;  %v2688_v32 = vld [vmem:[%s3714_s5 + $0x88] sm:$0xff] }
  0xb1   : > { %v615_v40 = vpack.c.bf16 %v607_v30, %v607_v30  ;;  %v530_v41 = vpop.f32.mrf.mxu0  ;;  %v654_v44 = vpop.f32.mrf.mxu1  ;;  %v3123_v24 = vrot.slane %v2348_v7, 7  ;;  %v1190_v30 = vrot.slane %v2349_v11, 7  ;;  %v3157_v16 = vmul.f32 %v2987_v58, %v878_v1 }
  0xb2   : > { %v621_v49 = vpack.c.bf16 %v613_v34, %v613_v34  ;;  %v577_v50 = vadd.f32 %v569_v35, %v529_v4  ;;  %v660_v52 = vadd.f32 %v659_v36, %v653_v5  ;;  %v3050_v53 = vadd.f32 %v2937_v10, %v530_v41  ;;  %v2690_v36 = vld [vmem:[%s3714_s5 + $0x98] sm:$0xff] }
  0xb3   : > { %v2803_v55 = vpop.eup %2802  ;;  %624 = vst.msk [vmem:[#allocation2 + $0x8] sm:$0xf] %vm623_vm1, %v615_v40  ;;  %v2689_v40 = vld [vmem:[%s3714_s5 + $0x90] sm:$0xff]  ;;  %v3143_v41 = vsel %vm903_vm6, %v905_v31, %v907_v45  ;;  %v3150_v44 = vsel %vm903_vm6, %v907_v45, %v909_v46  ;;  %1559 = vmatpush.bf16.msrb.mxu3 %v2690_v36  ;;  %v705_v31 = vadd.s32 32, %v2939_v12  ;;  %v3167_v60 = vsel %vm1188_vm11, %v3123_v24, %v1190_v30 }
  0xb4   : > { %630 = vst.msk [vmem:[#allocation2 + $0x20] sm:$0xf] %vm623_vm1, %v621_v49  ;;  %v693_v61 = vadd.f32 1.0, %v2803_v55  ;;  %v585_v62 = vmul.f32 0.7978846, %v577_v50  ;;  %v2805_v27 = vpop.eup %2804  ;;  %1132 = vmatpush.bf16.msra.mxu1 %v2667_v14  ;;  %v546_v45 = vmul.f32 0.5, %v3050_v53  ;;  %1316 = vmatpush.bf16.msra.mxu2 %v2678_v47 }
  0xb5   : > { %v661_v42 = vmul.f32 0.7978846, %v660_v52  ;;  %v554_v0 = vmul.f32 0.044715, %v3050_v53  ;;  %v2807_v51 = vpop.eup %2806  ;;  %v600_v5 = vadd.f32 1.0, %v2805_v27  ;;  %v706_v55 = vadd.s32 40, %v2939_v12 }
  0xb6   : > { %v694_v4 = vmul.f32 %v693_v61, %v2979_v56  ;;  %2808 = vtanh.f32 %v585_v62  ;;  %v606_v8 = vadd.f32 1.0, %v2807_v51  ;;  %v741_v61 = vand.u32 7, %v705_v31 }
  0xb7   : > { %2810 = vtanh.f32 %v661_v42  ;;  %v562_v9 = vmul.f32 %v554_v0, %v3050_v53  ;;  %v608_v13 = vmul.f32 %v600_v5, %v2995_v2  ;;  %v3119_v2 = vsel %vm3074_vm10, 1.0, %v2843_v43  ;;  %1560 = vmatpush.bf16.msrb.mxu3 %v2689_v40 }
  0xb8   : > { %v696_v56 = vmul.f32 0.0, %v694_v4  ;;  %v614_v21 = vmul.f32 %v606_v8, %v2997_v3  ;;  %v1192_v3 = vrot.slane %v2350_v20, 7  ;;  %v1194_v37 = vrot.slane %v3119_v2, 7 }
  0xb9   : > { %v570_v22 = vmul.f32 %v562_v9, %v3050_v53  ;;  %v533_v23 = vpop.f32.mrf.mxu0  ;;  %v616_v26 = vpack.c.bf16 %v608_v13, %v608_v13  ;;  %vm809_vm12 = vcmp.gt.s32.totalorder %v741_v61, 0  ;;  %vm3182_vm13 = vcmp.lt.s32.totalorder %v741_v61, 7 }
  0xba   : > { %v697_v25 = vpack.c.bf16 %v696_v56, %v696_v56  ;;  %v3126_v28 = vadd.f32 %v2937_v10, %v533_v23  ;;  %v622_v34 = vpack.c.bf16 %v614_v21, %v614_v21  ;;  %v3172_v27 = vsel %vm1188_vm11, %v1190_v30, %v1192_v3 }
  0xbb   : > { %v578_v35 = vadd.f32 %v570_v22, %v3050_v53  ;;  %625 = vst.msk [vmem:[#allocation2 + $0xc] sm:$0xf] %vm623_vm1, %v616_v26  ;;  %v748_v53 = vand.u32 7, %v706_v55  ;;  %v2344_v4 = vsel %vm809_vm12, 1.0, %v2843_v43  ;;  %v3198_v7 = vadd.s32 56, %v2939_v12  ;;  %1561 = vmatpush.bf16.msrb.mxu3 %v2688_v32 }
  0xbc   : > { %v2809_v38 = vpop.eup %2808  ;;  %698 = vst.msk [vmem:[#allocation2 + $0x28] sm:$0xf] %vm623_vm1, %v697_v25  ;;  %v555_v39 = vmul.f32 0.044715, %v3126_v28  ;;  %v911_v18 = vrot.slane %v2344_v4, 1  ;;  %v2352_v12 = vsel %vm3182_vm13, 1.0, %v2843_v43 }
  0xbd   : > { %v2811_v49 = vpop.eup %2810  ;;  %v601_v50 = vadd.f32 1.0, %v2809_v38  ;;  %v586_v52 = vmul.f32 0.7978846, %v578_v35  ;;  %631 = vst.msk [vmem:[#allocation2 + $0x24] sm:$0xf] %vm623_vm1, %v622_v34  ;;  %vm810_vm14 = vcmp.gt.s32.totalorder %v748_v53, 0 }
  0xbe   : > { %v663_v17 = vadd.f32 1.0, %v2811_v49  ;;  %v563_v54 = vmul.f32 %v555_v39, %v3126_v28  ;;  %vm3190_vm15 = vcmp.lt.s32.totalorder %v748_v53, 7  ;;  %v547_v23 = vmul.f32 0.5, %v3126_v28 }
  0xbf   : > { %v609_v19 = vmul.f32 %v601_v50, %v3055_v57  ;;  %2812 = vtanh.f32 %v586_v52  ;;  %v3177_v57 = vsel %vm1188_vm11, %v1192_v3, %v1194_v37  ;;  %v3216_v22 = vsel %vm3190_vm15, 1.0, %v2843_v43 }
  0xc0   : > { %v664_v62 = vmul.f32 %v663_v17, %v3057_v59  ;;  %v571_v63 = vmul.f32 %v563_v54, %v3126_v28  ;;  %v755_v30 = vand.u32 7, %v3195_v6  ;;  %v762_v3 = vand.u32 7, %v3198_v7  ;;  %v2701_v7 = vld [vmem:[%s3714_s5 + $0xd0] sm:$0xff] }
  0xc1   : > { %v617_v42 = vpack.c.bf16 %v609_v19, %v609_v19  ;;  %v535_v0 = vpop.f32.mrf.mxu0  ;;  %v1196_v40 = vrot.slane %v2352_v12, 7  ;;  %v3233_v31 = vsel %vm903_vm6, %v909_v46, %v911_v18 }
  0xc2   : > { %v666_v48 = vmul.f32 0.0, %v664_v62  ;;  %v579_v1 = vadd.f32 %v571_v63, %v3126_v28  ;;  %v536_v51 = vadd.f32 %v2937_v10, %v535_v0  ;;  %v3200_v56 = vld [vmem:[#allocation2 + $0x8] sm:$0xff]   ;;  %v3203_v10 = vsel %vm810_vm14, 1.0, %v2843_v43 }
  0xc3   : > { %626 = vst.msk [vmem:[#allocation2 + $0x10] sm:$0xf] %vm623_vm1, %v617_v42  ;;  %v2713_v14 = vunpack.c.l.bf16 %v3200_v56  ;;  %v3207_v15 = vunpack.c.h.bf16 %v3200_v56  ;;  %v913_v36 = vrot.slane %v3203_v10, 1  ;;  %v1198_v28 = vrot.slane %v3216_v22, 7  ;;  %v2704_v56 = vld [vmem:[%s3714_s5 + $0xe8] sm:$0xff] }
  0xc4   : > { %v667_v8 = vpack.c.bf16 %v666_v48, %v666_v48  ;;  %v587_v9 = vmul.f32 0.7978846, %v579_v1  ;;  %v556_v11 = vmul.f32 0.044715, %v536_v51  ;;  %v3227_v38 = vmul.f32 0.5, %v536_v51 }
  0xc5   : > { %v2813_v13 = vpop.eup %2812  ;;  %v930_v25 = vmul.f32 %v2713_v14, %v3143_v41  ;;  %v931_v26 = vmul.f32 %v3207_v15, %v3150_v44  ;;  %v3238_v17 = vsel %vm903_vm6, %v911_v18, %v913_v36  ;;  %v3245_v29 = vsel %vm1188_vm11, %v1194_v37, %v1196_v40  ;;  %v2702_v18 = vld [vmem:[%s3714_s5 + $0xd8] sm:$0xff] }
  0xc6   : > { %668 = vst.msk [vmem:[#allocation2 + $0x4] sm:$0xf] %vm623_vm1, %v667_v8  ;;  %v602_v20 = vadd.f32 1.0, %v2813_v13  ;;  %2814 = vtanh.f32 %v587_v9  ;;  %v564_v21 = vmul.f32 %v556_v11, %v536_v51  ;;  %vm3249_vm2 = vcmp.gt.s32.totalorder %v755_v30, 0  ;;  %v2687_v13 = vld [vmem:[%s3714_s5 + $0x80] sm:$0xff] }
  0xc7   : > { %v938_v39 = vpack.c.bf16 %v931_v26, %v930_v25  ;;  %vm3255_vm3 = vcmp.gt.s32.totalorder %v762_v3, 0  ;;  %v3263_v37 = vsel %vm1188_vm11, %v1196_v40, %v1198_v28  ;;  %1562 = vmatpush.bf16.msrb.mxu3 %v2687_v13  ;;  %vm3298_vm7 = vcmp.lt.s32.totalorder %v755_v30, 7  ;;  %v3308_v30 = vld [vmem:[#allocation2 + $0x20] sm:$0xff]  }
  0xc8   : > { %v610_v34 = vmul.f32 %v602_v20, %v546_v45  ;;  %v572_v35 = vmul.f32 %v564_v21, %v536_v51  ;;  %vm3340_vm8 = vcmp.lt.s32.totalorder %v762_v3, 7 }
  0xc9   : > { %v1054_v45 = vshrl.u32 %v938_v39, 16  ;;  %v1057_v54 = vshll.u32 %v938_v39, 16 }
  0xca   : > { %v618_v47 = vpack.c.bf16 %v610_v34, %v610_v34  ;;  %v580_v49 = vadd.f32 %v572_v35, %v536_v51  ;;  %v2664_v50 = vld [vmem:[#allocation2 + $0xc] sm:$0xff] }
  0xcb   : > { %v1156_v52 = vld [vmem:[#allocation2 + $0xc] sm:$0xff]   ;;  %2397 = vmatmul.msk.bf16.vlgmr.msra.gmra.mxu3 %vm501_vm0, %v2664_v50  ;;  %v1056_v32 = vrot.slane %v1054_v45, 3  ;;  %v1059_v8 = vrot.slane %v1057_v54, 4  ;;  %v3285_v45 = vsel %vm3249_vm2, 1.0, %v2843_v43  ;;  %v2347_v54 = vsel %vm3255_vm3, 1.0, %v2843_v43 }
  0xcc   : > { %v1165_v55 = vunpack.c.l.bf16 %v1156_v52  ;;  %v1166_v19 = vunpack.c.h.bf16 %v1156_v52  ;;  %v2815_v61 = vpop.eup %2814  ;;  %627 = vst.msk [vmem:[#allocation2 + $0x14] sm:$0xf] %vm623_vm1, %v618_v47  ;;  %v588_v62 = vmul.f32 0.7978846, %v580_v49 }
  0xcd   : > { %v603_v53 = vadd.f32 1.0, %v2815_v61  ;;  %v2663_v42 = vld [vmem:[#allocation2 + $0x4] sm:$0xff] }
  0xce   : > { %v870_v0 = vld [vmem:[#allocation2 + $0x4] sm:$0xff]   ;;  %v1352_v2 = vmul.f32 %v1165_v55, %v3143_v41  ;;  %2816 = vtanh.f32 %v588_v62  ;;  %v1353_v51 = vmul.f32 %v1166_v19, %v3150_v44  ;;  %2396 = vmatmul.msk.bf16.vlgmr.msrb.gmra.mxu2 %vm501_vm0, %v2663_v42  ;;  %v1215_v35 = vmul.f32 %v3172_v27, %v1165_v55 }
  0xcf   : > { %v879_v59 = vunpack.c.l.bf16 %v870_v0  ;;  %v1164_v48 = vunpack.c.h.bf16 %v870_v0  ;;  %v1346_v1 = vld [vmem:[#allocation2 + $0x4] sm:$0x8]  ;;  %v611_v5 = vmul.f32 %v603_v53, %v547_v23  ;;  %v1216_v49 = vmul.f32 %v3177_v57, %v1166_v19  ;;  %1853 = vmatpush.bf16.msrb.mxu2 %v2702_v18 }
  0xd0   : > { %v1154_v4 = vld [vmem:[#allocation2 + $0x4] sm:$0xf]  ;;  %v1348_v9 = vunpack.c.l.bf16 %v1346_v1  ;;  %v1360_v21 = vpack.c.bf16 %v1353_v51, %v1352_v2  ;;  %v3292_v1 = vor.u32 %v1059_v8, %v1056_v32 }
  0xd1   : > { %v1163_v11 = vunpack.c.l.bf16 %v1154_v4  ;;  %v929_v12 = vmul.f32 %v3090_v33, %v879_v59  ;;  %v1351_v20 = vmul.f32 %v1164_v48, %v3090_v33  ;;  %v1214_v23 = vmul.f32 %v3167_v60, %v1164_v48 }
  0xd2   : > { %v619_v25 = vpack.c.bf16 %v611_v5, %v611_v5  ;;  %v1350_v26 = vmul.f32 %v1348_v9, %v2987_v58  ;;  %v1382_v40 = vshrl.u32 %v1360_v21, 16  ;;  %v1385_v47 = vshll.u32 %v1360_v21, 16 }
  0xd3   : > { %v1213_v34 = vmul.f32 %v3123_v24, %v1163_v11  ;;  %v937_v39 = vpack.c.bf16 %v929_v12, %v3157_v16  ;;  %v3290_v2 = vpack.c.bf16 %v1216_v49, %v1215_v35  ;;  %v2753_v59 = vld [vmem:[#allocation2 + $0x10] sm:$0xff]   ;;  %1854 = vmatpush.bf16.msrb.mxu2 %v2701_v7  ;;  %v1742_v7 = vld [vmem:[#allocation2 + $0x8] sm:$0x8] }
  0xd4   : > { %628 = vst.msk [vmem:[#allocation2 + $0x18] sm:$0xf] %vm623_vm1, %v619_v25  ;;  %v1359_v50 = vpack.c.bf16 %v1351_v20, %v1350_v26  ;;  %v2817_v55 = vpop.eup %2816  ;;  %v1384_v62 = vrot.slane %v1382_v40, 3  ;;  %v1387_v53 = vrot.slane %v1385_v47, 4  ;;  %v3304_v12 = vunpack.c.l.bf16 %v2753_v59 }
  0xd5   : > { %v1222_v52 = vpack.c.bf16 %v1214_v23, %v1213_v34  ;;  %v1046_v16 = vshrl.u32 %v937_v39, 16  ;;  %v1049_v61 = vshll.u32 %v937_v39, 16  ;;  %v604_v19 = vadd.f32 1.0, %v2817_v55 }
  0xd6   : > { %v1374_v42 = vshrl.u32 %v1359_v50, 16  ;;  %v1377_v0 = vshll.u32 %v1359_v50, 16  ;;  %v3294_v51 = vor.u32 %v1387_v53, %v1384_v62  ;;  %v1245_v18 = vshll.u32 %v3290_v2, 16 }
  0xd7   : > { %v1048_v48 = vrot.slane %v1046_v16, 3  ;;  %v1051_v46 = vrot.slane %v1049_v61, 4  ;;  %v612_v4 = vmul.f32 %v604_v19, %v3227_v38  ;;  %v1240_v11 = vshll.u32 %v1222_v52, 16  ;;  %v2697_v16 = vld [vmem:[%s3714_s5 + $0xb8] sm:$0xff] }
  0xd8   : > { %v1376_v5 = vrot.slane %v1374_v42, 3  ;;  %v1379_v9 = vrot.slane %v1377_v0, 4  ;;  %v3306_v32 = vunpack.c.h.bf16 %v2753_v59  ;;  %v1238_v21 = vshrl.u32 %v1222_v52, 16  ;;  %v2710_v61 = vld [vmem:[%s3714_s5 + $0x118] sm:$0xff]  ;;  %1709 = vmatpush.bf16.msrb.mxu1 %v2697_v16 }
  0xd9   : > { %v1052_v13 = vor.u32 %v1051_v46, %v1048_v48  ;;  %v620_v8 = vpack.c.bf16 %v612_v4, %v612_v4  ;;  %v1242_v6 = vrot.slane %v1240_v11, 1  ;;  %v3312_v25 = vrot.slane %v1245_v18, 1  ;;  %2105 = vmatpush.bf16.msra.mxu3 %v2710_v61  ;;  %v2706_v4 = vld [vmem:[%s3714_s5 + $0xf8] sm:$0xff] }
  0xda   : > { %v1380_v20 = vor.u32 %v1379_v9, %v1376_v5  ;;  %v932_v26 = vmul.f32 %v3304_v12, %v3233_v31  ;;  %v933_v34 = vmul.f32 %v3306_v32, %v3238_v17  ;;  %v915_v52 = vrot.slane %v3285_v45, 1  ;;  %1955 = vmatpush.bf16.msra.mxu0 %v2706_v4  ;;  %v1162_v4 = vld [vmem:[#allocation2 + $0x24] sm:$0x1] }
  0xdb   : > { %v1061_v23 = vsel %vm1044_vm4, %v1052_v13, %v3292_v1  ;;  %v2665_v38 = vld [vmem:[#allocation2 + $0x14] sm:$0xff]  ;;  %629 = vst.msk [vmem:[#allocation2 + $0x1c] sm:$0xf] %vm623_vm1, %v620_v8  ;;  %v1243_v40 = vor.u32 %v1242_v6, %v1238_v21  ;;  %v3325_v55 = vrot.slane %v2347_v54, 1  ;;  %v886_v62 = vunpack.c.l.bf16 %v3308_v30 }
  0xdc   : > { %v1158_v35 = vld [vmem:[#allocation2 + $0x14] sm:$0xff]   ;;  %2416 = vmatmul.msk.bf16.vlgmr.msra.gmra.mxu1 %vm501_vm0, %v1061_v23  ;;  %v1389_v39 = vsel %vm1044_vm4, %v1380_v20, %v3294_v51  ;;  %2398 = vmatmul.msk.bf16.gmra.mxu3 %vm501_vm0, %v2665_v38  ;;  %v939_v50 = vpack.c.bf16 %v933_v34, %v932_v26  ;;  %v3356_v3 = vsel %vm903_vm6, %v913_v36, %v915_v52  ;;  %v2354_v13 = vsel %vm3298_vm7, 1.0, %v2843_v43 }
  0xdd   : > { %v1167_v47 = vunpack.c.l.bf16 %v1158_v35  ;;  %v1168_v49 = vunpack.c.h.bf16 %v1158_v35  ;;  %2472 = vmatmul.msk.bf16.vlgmr.msrb.gmra.mxu0 %vm501_vm0, %v1389_v39  ;;  %v1248_v53 = vsel %vm1236_vm5, %v1243_v40, %v3312_v25  ;;  %v3360_v5 = vsel %vm903_vm6, %v915_v52, %v3325_v55 }
  0xde   : > { %v1063_v54 = vshrl.u32 %v939_v50, 16  ;;  %v1066_v0 = vshll.u32 %v939_v50, 16  ;;  %2444 = vmatmul.msk.bf16.vlgmr.msra.gmra.mxu2 %vm501_vm0, %v1248_v53  ;;  %v2355_v18 = vsel %vm3340_vm8, 1.0, %v2843_v43  ;;  %v936_v6 = vmul.f32 %v3325_v55, %v886_v62 }
  0xdf   : > { %v1354_v19 = vmul.f32 %v1167_v47, %v3233_v31  ;;  %v1355_v42 = vmul.f32 %v1168_v49, %v3238_v17  ;;  %v1217_v59 = vmul.f32 %v3245_v29, %v1167_v47  ;;  %v1218_v48 = vmul.f32 %v3263_v37, %v1168_v49 }
  0xe0   : > { %v1065_v10 = vrot.slane %v1063_v54, 3  ;;  %v1068_v8 = vrot.slane %v1066_v0, 4  ;;  %v1200_v39 = vrot.slane %v2354_v13, 7  ;;  %v3375_v43 = vrot.slane %v2355_v18, 7  ;;  %v2709_v18 = vld [vmem:[%s3714_s5 + $0x110] sm:$0xff] }
  0xe1   : > { %v1361_v46 = vpack.c.bf16 %v1355_v42, %v1354_v19  ;;  %v3368_v36 = vpack.c.bf16 %v1218_v48, %v1217_v59  ;;  %v941_v42 = vpack.c.bf16 %v936_v6, %v936_v6  ;;  %v1249_v48 = vshrl.u32 %v3290_v2, 16  ;;  %v2696_v2 = vld [vmem:[%s3714_s5 + $0xb0] sm:$0xff]  ;;  %2106 = vmatpush.bf16.msra.mxu3 %v2709_v18 }
  0xe2   : > { %v2754_v20 = vld [vmem:[#allocation2 + $0x18] sm:$0xff]   ;;  %v3381_v49 = vor.u32 %v1068_v8, %v1065_v10  ;;  %v3391_v53 = vsel %vm1188_vm11, %v1198_v28, %v1200_v39  ;;  %v3395_v19 = vsel %vm1188_vm11, %v1200_v39, %v3375_v43  ;;  %v1349_v8 = vunpack.c.h.bf16 %v3308_v30  ;;  %1710 = vmatpush.bf16.msrb.mxu1 %v2696_v2 }
  0xe3   : > { %v1391_v9 = vshrl.u32 %v1361_v46, 16  ;;  %v1394_v11 = vshll.u32 %v1361_v46, 16  ;;  %v1160_v21 = vld [vmem:[#allocation2 + $0x1c] sm:$0xff]   ;;  %v3371_v26 = vunpack.c.l.bf16 %v2754_v20  ;;  %v3373_v63 = vunpack.c.h.bf16 %v2754_v20 }
  0xe4   : > { %v1169_v34 = vunpack.c.l.bf16 %v1160_v21  ;;  %v1170_v35 = vunpack.c.h.bf16 %v1160_v21  ;;  %v1253_v50 = vshll.u32 %v3368_v36, 16  ;;  %v1070_v0 = vsel %vm1044_vm4, %v3292_v1, %v3381_v49  ;;  %v2666_v59 = vld [vmem:[#allocation2 + $0x1c] sm:$0xff] }
  0xe5   : > { %v1393_v23 = vrot.slane %v1391_v9, 3  ;;  %v1396_v38 = vrot.slane %v1394_v11, 4  ;;  %v934_v40 = vmul.f32 %v3371_v26, %v3356_v3  ;;  %v935_v47 = vmul.f32 %v3373_v63, %v3360_v5 }
  0xe6   : > { %v1356_v52 = vmul.f32 %v1169_v34, %v3356_v3  ;;  %v1357_v16 = vmul.f32 %v1170_v35, %v3360_v5  ;;  %v1219_v45 = vmul.f32 %v3391_v53, %v1169_v34  ;;  %v1220_v54 = vmul.f32 %v3395_v19, %v1170_v35  ;;  %v2695_v34 = vld [vmem:[%s3714_s5 + $0xa8] sm:$0xff] }
  0xe7   : > { %v3386_v61 = vor.u32 %v1396_v38, %v1393_v23  ;;  %v940_v62 = vpack.c.bf16 %v935_v47, %v934_v40  ;;  %v1255_v22 = vrot.slane %v1253_v50, 1  ;;  %v1251_v9 = vor.u32 %v1249_v48, %v3312_v25  ;;  %v2705_v38 = vld [vmem:[%s3714_s5 + $0xf0] sm:$0xff]  ;;  %v2700_v50 = vld [vmem:[%s3714_s5 + $0xc8] sm:$0xff]  ;;  %1711 = vmatpush.bf16.msrb.mxu1 %v2695_v34 }
  0xe8   : > { %v1362_v46 = vpack.c.bf16 %v1357_v16, %v1356_v52  ;;  %v1081_v13 = vshrl.u32 %v941_v42, 16  ;;  %v1084_v10 = vshll.u32 %v941_v42, 16  ;;  %v1744_v6 = vunpack.c.l.bf16 %v1742_v7  ;;  %1956 = vmatpush.bf16.msra.mxu0 %v2705_v38  ;;  %1855 = vmatpush.bf16.msrb.mxu2 %v2700_v50 }
  0xe9   : > { %v1398_v28 = vsel %vm1044_vm4, %v3294_v51, %v3386_v61  ;;  %v1072_v1 = vshrl.u32 %v940_v62, 16  ;;  %v1075_v11 = vshll.u32 %v940_v62, 16  ;;  %v3416_v51 = vpack.c.bf16 %v1220_v54, %v1219_v45  ;;  %v2694_v45 = vld [vmem:[%s3714_s5 + $0xa0] sm:$0xff] }
  0xea   : > { %v1256_v20 = vsel %vm1236_vm5, %v1251_v9, %v1255_v22  ;;  %v1400_v21 = vshrl.u32 %v1362_v46, 16  ;;  %v1403_v25 = vshll.u32 %v1362_v46, 16  ;;  %v1171_v23 = vunpack.c.l.bf16 %v1162_v4 }
  0xeb   : > { %v1610_v30 = vmul.f32 %v2713_v14, %v3123_v24  ;;  %v1074_v35 = vrot.slane %v1072_v1, 3  ;;  %v1077_v39 = vrot.slane %v1075_v11, 4  ;;  %v1257_v40 = vshrl.u32 %v3368_v36, 16  ;;  %1712 = vmatpush.bf16.msrb.mxu1 %v2694_v45 }
  0xec   : > { %2417 = vmatmul.msk.bf16.gmra.mxu1 %vm501_vm0, %v1070_v0  ;;  %2399 = vmatmul.msk.bf16.gmra.mxu3 %vm501_vm0, %v2666_v59  ;;  %v3431_v47 = vrot.slane %v1081_v13, 3  ;;  %v1261_v52 = vshll.u32 %v3416_v51, 16  ;;  %v3437_v16 = vrot.slane %v1084_v10, 4  ;;  %v1358_v62 = vmul.f32 %v1349_v8, %v3325_v55  ;;  %v2758_v59 = vld [vmem:[#allocation2 + $0x20] sm:$0xff]  }
  0xed   : > { %2473 = vmatmul.msk.bf16.gmra.mxu0 %vm501_vm0, %v1398_v28  ;;  %v1611_v14 = vmul.f32 %v3207_v15, %v3167_v60  ;;  %v1402_v36 = vrot.slane %v1400_v21, 3  ;;  %v1405_v42 = vrot.slane %v1403_v25, 4  ;;  %v1746_v54 = vmul.f32 %v1744_v6, %v2987_v58 }
  0xee   : > { %2445 = vmatmul.msk.bf16.gmra.mxu2 %vm501_vm0, %v1256_v20  ;;  %v1747_v0 = vmul.f32 %v3207_v15, %v3090_v33  ;;  %v1221_v48 = vmul.f32 %v3375_v43, %v1171_v23  ;;  %v1748_v28 = vmul.f32 %v3304_v12, %v3143_v41  ;;  %v1749_v4 = vmul.f32 %v3306_v32, %v3150_v44  ;;  %v2703_v33 = vld [vmem:[%s3714_s5 + $0xe0] sm:$0xff] }
  0xef   : > { %v3452_v46 = vpack.c.bf16 %v1611_v14, %v1610_v30  ;;  %v3458_v7 = vor.u32 %v1077_v39, %v1074_v35  ;;  %v1259_v9 = vor.u32 %v1257_v40, %v1255_v22  ;;  %v1263_v11 = vrot.slane %v1261_v52, 1  ;;  %1957 = vmatpush.bf16.msra.mxu0 %v2704_v56  ;;  %v1988_v39 = vld [vmem:[#allocation2 + $0xc] sm:$0xf] }
  0xf0   : > { %v1755_v1 = vpack.c.bf16 %v1747_v0, %v1746_v54  ;;  %v1087_v58 = vor.u32 %v3437_v16, %v3431_v47  ;;  %v1756_v15 = vpack.c.bf16 %v1749_v4, %v1748_v28  ;;  %v3465_v13 = vunpack.c.l.bf16 %v2758_v59  ;;  %v2675_v40 = vld [vmem:[#allocation2 + $0x8] sm:$0xff]  ;;  %v2707_v16 = vld [vmem:[%s3714_s5 + $0x100] sm:$0xff] }
  0xf1   : > { %v3467_v41 = vor.u32 %v1405_v42, %v1402_v36  ;;  %v1363_v2 = vpack.c.bf16 %v1358_v62, %v1358_v62  ;;  %v1226_v22 = vpack.c.bf16 %v1221_v48, %v1221_v48  ;;  %v1265_v10 = vshrl.u32 %v3416_v51, 16  ;;  %v2708_v42 = vld [vmem:[%s3714_s5 + $0x108] sm:$0xff] }
  0xf2   : > { %v1770_v44 = vshrl.u32 %v1755_v1, 16  ;;  %v1773_v18 = vshll.u32 %v1755_v1, 16  ;;  %v1778_v8 = vshrl.u32 %v1756_v15, 16  ;;  %v1781_v20 = vshll.u32 %v1756_v15, 16  ;;  %2107 = vmatpush.bf16.msra.mxu3 %v2708_v42 }
  0xf3   : > { %v1079_v21 = vsel %vm1044_vm4, %v3381_v49, %v3458_v7  ;;  %v3473_v23 = vunpack.c.h.bf16 %v2758_v59  ;;  %v1264_v38 = vsel %vm1236_vm5, %v1259_v9, %v1263_v11  ;;  %1958 = vmatpush.bf16.msra.mxu0 %v2703_v33  ;;  %v1616_v35 = vmul.f32 %v3465_v13, %v3391_v53 }
  0xf4   : > { %v1772_v25 = vrot.slane %v1770_v44, 3  ;;  %v1775_v6 = vrot.slane %v1773_v18, 4  ;;  %v1780_v34 = vrot.slane %v1778_v8, 3  ;;  %v1783_v30 = vrot.slane %v1781_v20, 4 }
  0xf5   : > { %v1407_v51 = vsel %vm1044_vm4, %v3386_v61, %v3467_v41  ;;  %v1409_v50 = vshrl.u32 %v1363_v2, 16  ;;  %v1412_v49 = vshll.u32 %v1363_v2, 16  ;;  %v1750_v52 = vmul.f32 %v3371_v26, %v3233_v31  ;;  %v2699_v31 = vld [vmem:[%s3714_s5 + $0xc0] sm:$0xff] }
  0xf6   : > { %v1776_v62 = vor.u32 %v1775_v6, %v1772_v25  ;;  %v1784_v56 = vor.u32 %v1783_v30, %v1780_v34  ;;  %v1751_v14 = vmul.f32 %v3373_v63, %v3238_v17  ;;  %v1617_v36 = vmul.f32 %v3473_v23, %v3395_v19  ;;  %1856 = vmatpush.bf16.msrb.mxu2 %v2699_v31 }
  0xf7   : > { %v3490_v61 = vor.u32 %v1265_v10, %v1263_v11  ;;  %v1997_v45 = vunpack.c.l.bf16 %v1988_v39  ;;  %v2007_v17 = vmul.f32 %v3304_v12, %v3167_v60  ;;  %v2008_v54 = vmul.f32 %v3306_v32, %v3172_v27  ;;  %v1600_v11 = vld [vmem:[#allocation2 + $0x28] sm:$0x1]  ;;  %2108 = vmatpush.bf16.msra.mxu3 %v2707_v16 }
  0xf8   : > { %v3503_v0 = vsel %vm1044_vm4, %v1776_v62, %v1784_v56  ;;  %v1757_v59 = vpack.c.bf16 %v1751_v14, %v1750_v52  ;;  %v1622_v48 = vpack.c.bf16 %v1617_v36, %v1616_v35  ;;  %v1752_v28 = vmul.f32 %v3465_v13, %v3356_v3  ;;  %v1996_v14 = vld [vmem:[#allocation2 + $0x2c] sm:$0x1] }
  0xf9   : > { %v3507_v4 = vshll.u32 %v1226_v22, 16  ;;  %v2006_v9 = vmul.f32 %v1997_v45, %v3123_v24  ;;  %v2009_v60 = vmul.f32 %v3371_v26, %v3177_v57  ;;  %v1753_v1 = vmul.f32 %v3473_v23, %v3360_v5 }
  0xfa   : > { %v1411_v33 = vrot.slane %v1409_v50, 3  ;;  %v1787_v15 = vshrl.u32 %v1757_v59, 16  ;;  %v1790_v2 = vshll.u32 %v1757_v59, 16  ;;  %v1657_v44 = vshll.u32 %v1622_v48, 16 }
  0xfb   : > { %v1612_v3 = vmul.f32 %v3304_v12, %v3172_v27  ;;  %v2015_v18 = vpack.c.bf16 %v2007_v17, %v2006_v9  ;;  %v3517_v22 = vpack.c.bf16 %v2009_v60, %v2008_v54  ;;  %v1758_v24 = vpack.c.bf16 %v1753_v1, %v1752_v28  ;;  %v1743_v12 = vld [vmem:[#allocation2 + $0x28] sm:$0xf] }
  0xfc   : > { %2418 = vmatmul.msk.bf16.gmra.mxu1 %vm501_vm0, %v1079_v21  ;;  %2516 = vmatmul.msk.bf16.vlgmr.msrb.gmra.mxu3 %vm501_vm0, %v2675_v40  ;;  %v1414_v10 = vrot.slane %v1412_v49, 4  ;;  %v1789_v8 = vrot.slane %v1787_v15, 3  ;;  %v1792_v20 = vrot.slane %v1790_v2, 4  ;;  %v1609_v21 = vunpack.c.l.bf16 %v1600_v11  ;;  %v1995_v49 = vld [vmem:[#allocation2 + $0x28] sm:$0xf]  ;;  %v2676_v2 = vld [vmem:[#allocation2 + $0x10] sm:$0xff] }
  0xfd   : > { %2474 = vmatmul.msk.bf16.gmra.mxu0 %vm501_vm0, %v1407_v51  ;;  %v1613_v5 = vmul.f32 %v3306_v32, %v3177_v57  ;;  %v3521_v25 = vrot.slane %v1657_v44, 1  ;;  %v2032_v6 = vshll.u32 %v2015_v18, 16  ;;  %v2030_v30 = vshrl.u32 %v2015_v18, 16 }
  0xfe   : > { %2446 = vmatmul.msk.bf16.gmra.mxu2 %vm501_vm0, %v1264_v38  ;;  %v2037_v38 = vshll.u32 %v3517_v22, 16  ;;  %v1793_v34 = vor.u32 %v1792_v20, %v1789_v8  ;;  %v1796_v35 = vshrl.u32 %v1758_v24, 16  ;;  %v1799_v27 = vshll.u32 %v1758_v24, 16 }
  0xff   : > { %v2034_v39 = vrot.slane %v2032_v6, 1  ;;  %v1618_v40 = vmul.f32 %v1609_v21, %v3375_v43  ;;  %v1661_v50 = vshrl.u32 %v1622_v48, 16  ;;  %v1415_v52 = vor.u32 %v1414_v10, %v1411_v33 }
 0x100   : > { %v2039_v51 = vrot.slane %v2037_v38, 1  ;;  %v3526_v62 = vsel %vm1044_vm4, %v1784_v56, %v1793_v34  ;;  %v1798_v57 = vrot.slane %v1796_v35, 3  ;;  %v1801_v32 = vrot.slane %v1799_v27, 4 }
 0x101   : > { %v2035_v36 = vor.u32 %v2034_v39, %v2030_v30  ;;  %v1623_v31 = vpack.c.bf16 %v1618_v40, %v1618_v40  ;;  %v1663_v42 = vor.u32 %v1661_v50, %v3521_v25  ;;  %v2010_v45 = vmul.f32 %v3373_v63, %v3245_v29 }
 0x102   : > { %v1802_v17 = vor.u32 %v1801_v32, %v1798_v57  ;;  %v2011_v54 = vmul.f32 %v3465_v13, %v3263_v37  ;;  %v1745_v59 = vunpack.c.l.bf16 %v1743_v12  ;;  %v2004_v48 = vunpack.c.l.bf16 %v1995_v49 }
 0x103   : > { %v3534_v28 = vsel %vm1236_vm5, %v2035_v36, %v2039_v51  ;;  %v1665_v56 = vshll.u32 %v1623_v31, 16  ;;  %v2012_v9 = vmul.f32 %v3473_v23, %v3391_v53  ;;  %v2005_v60 = vunpack.c.l.bf16 %v1996_v14  ;;  %v2691_v31 = vld [vmem:[#allocation2 + $0xc] sm:$0xff] }
 0x104   : > { %v3539_v1 = vsel %vm1044_vm4, %v1793_v34, %v1802_v17  ;;  %v2017_v11 = vpack.c.bf16 %v2011_v54, %v2010_v45  ;;  %v1754_v33 = vmul.f32 %v1745_v59, %v3325_v55  ;;  %v2013_v15 = vmul.f32 %v2004_v48, %v3395_v19 }
 0x105   : > { %v1088_v13 = vsel %vm1044_vm4, %v3458_v7, %v1087_v58  ;;  %v1271_v44 = vrot.slane %v3507_v4, 1  ;;  %v1667_v18 = vrot.slane %v1665_v56, 1  ;;  %v2014_v53 = vmul.f32 %v2005_v60, %v3375_v43  ;;  %v2693_v60 = vld [vmem:[#allocation2 + $0x1c] sm:$0xff] }
 0x106   : > { %v1416_v23 = vsel %vm1044_vm4, %v3467_v41, %v1415_v52  ;;  %v2045_v55 = vshll.u32 %v2017_v11, 16  ;;  %v1759_v24 = vpack.c.bf16 %v1754_v33, %v1754_v33  ;;  %v2018_v19 = vpack.c.bf16 %v2013_v15, %v2012_v9 }
 0x107   : > { %v1620_v47 = vpack.c.bf16 %v1613_v5, %v1612_v3  ;;  %v1668_v7 = vsel %vm1236_vm5, %v1663_v42, %v1667_v18  ;;  %v2041_v43 = vshrl.u32 %v3517_v22, 16  ;;  %v2019_v58 = vpack.c.bf16 %v2014_v53, %v2014_v53  ;;  %v2677_v42 = vld [vmem:[#allocation2 + $0x18] sm:$0xff] }
 0x108   : > { %v1272_v41 = vsel %vm1236_vm5, %v3490_v61, %v1271_v44  ;;  %v2047_v4 = vrot.slane %v2045_v55, 1  ;;  %v1805_v10 = vshrl.u32 %v1759_v24, 16  ;;  %v1808_v8 = vshll.u32 %v1759_v24, 16 }
 0x109   : > { %v2043_v20 = vor.u32 %v2041_v43, %v2039_v51  ;;  %v2053_v21 = vshll.u32 %v2018_v19, 16  ;;  %v2057_v6 = vshrl.u32 %v2018_v19, 16  ;;  %v2061_v3 = vshll.u32 %v2019_v58, 16 }
 0x10a   : > { %v1807_v5 = vrot.slane %v1805_v10, 3  ;;  %v1810_v38 = vrot.slane %v1808_v8, 4  ;;  %v2049_v34 = vshrl.u32 %v2017_v11, 16  ;;  %v1636_v30 = vshll.u32 %v3452_v46, 16  ;;  %v2698_v11 = vld [vmem:[#allocation2 + $0x24] sm:$0xff] }
 0x10b   : > { %v2048_v22 = vsel %vm1236_vm5, %v2043_v20, %v2047_v4  ;;  %v2055_v35 = vrot.slane %v2053_v21, 1  ;;  %v2063_v27 = vrot.slane %v2061_v3, 1  ;;  %v1641_v39 = vshll.u32 %v1620_v47, 16 }
 0x10c   : > { %2419 = vmatmul.msk.bf16.gmra.mxu1 %vm501_vm0, %v1088_v13  ;;  %2517 = vmatmul.msk.bf16.gmra.mxu3 %vm501_vm0, %v2676_v2  ;;  %v1811_v61 = vor.u32 %v1810_v38, %v1807_v5  ;;  %v2051_v12 = vor.u32 %v2049_v34, %v2047_v4  ;;  %v1638_v50 = vrot.slane %v1636_v30, 1  ;;  %v1634_v57 = vshrl.u32 %v3452_v46, 16 }
 0x10d   : > { %2475 = vmatmul.msk.bf16.gmra.mxu0 %vm501_vm0, %v1416_v23  ;;  %v2059_v40 = vor.u32 %v2057_v6, %v2055_v35  ;;  %v1643_v32 = vrot.slane %v1641_v39, 1  ;;  %v1614_v45 = vmul.f32 %v3371_v26, %v3245_v29  ;;  %v1615_v54 = vmul.f32 %v3373_v63, %v3263_v37  ;;  %v2692_v29 = vld [vmem:[#allocation2 + $0x14] sm:$0xff]  ;;  %v2682_v26 = vld [vmem:[#allocation2 + $0x20] sm:$0xff] }
 0x10e   : > { %2447 = vmatmul.msk.bf16.gmra.mxu2 %vm501_vm0, %v1272_v41  ;;  %v1812_v51 = vsel %vm1044_vm4, %v1802_v17, %v1811_v61  ;;  %v2056_v49 = vsel %vm1236_vm5, %v2051_v12, %v2055_v35  ;;  %v1639_v14 = vor.u32 %v1638_v50, %v1634_v57  ;;  %v1645_v59 = vshrl.u32 %v1620_v47, 16 }
 0x10f   : > { %v2064_v52 = vsel %vm1236_vm5, %v2059_v40, %v2063_v27  ;;  %v1621_v17 = vpack.c.bf16 %v1615_v54, %v1614_v45 }
 0x110   : > { %v1644_v36 = vsel %vm1236_vm5, %v1639_v14, %v1643_v32  ;;  %v1647_v56 = vor.u32 %v1645_v59, %v1643_v32 }
 0x111   : > { %v1649_v46 = vshll.u32 %v1621_v17, 16  ;;  %v1653_v37 = vshrl.u32 %v1621_v17, 16 }
 0x113   : > { %v1651_v48 = vrot.slane %v1649_v46, 1 }
 0x115   : > { %v1652_v9 = vsel %vm1236_vm5, %v1647_v56, %v1651_v48  ;;  %v1655_v63 = vor.u32 %v1653_v37, %v1651_v48 }
 0x11c   : > { %2544 = vmatmul.msk.bf16.vlgmr.msrb.gmra.mxu1 %vm501_vm0, %v1644_v36  ;;  %2518 = vmatmul.msk.bf16.gmra.mxu3 %vm501_vm0, %v2677_v42 }
 0x11d   : > { %2616 = vmatmul.msk.bf16.vlgmr.msra.gmra.mxu0 %vm501_vm0, %v2691_v31 }
 0x11e   : > { %2572 = vmatmul.msk.bf16.vlgmr.msrb.gmra.mxu2 %vm501_vm0, %v3503_v0  ;;  %v1660_v0 = vsel %vm1236_vm5, %v1655_v63, %v3521_v25  ;;  %v3646_v63 = vld [vmem:[%s3715_s6] ss:$0 sm:$0xff] }
 0x12c   : > { %2545 = vmatmul.msk.bf16.gmra.mxu1 %vm501_vm0, %v1652_v9  ;;  %2519 = vmatmul.msk.bf16.gmra.mxu3 %vm501_vm0, %v2682_v26 }
 0x12d   : > { %2617 = vmatmul.msk.bf16.gmra.mxu0 %vm501_vm0, %v2692_v29 }
 0x12e   : > { %2573 = vmatmul.msk.bf16.gmra.mxu2 %vm501_vm0, %v3526_v62 }
 0x13c   : > { %2546 = vmatmul.msk.bf16.gmra.mxu1 %vm501_vm0, %v1660_v0  ;;  %2644 = vmatmul.msk.bf16.vlgmr.msra.gmra.mxu3 %vm501_vm0, %v3534_v28 }
 0x13d   : > { %2618 = vmatmul.msk.bf16.gmra.mxu0 %vm501_vm0, %v2693_v60 }
 0x13e   : > { %2574 = vmatmul.msk.bf16.gmra.mxu2 %vm501_vm0, %v3539_v1 }
 0x14c   : > { %2547 = vmatmul.msk.bf16.gmra.mxu1 %vm501_vm0, %v1668_v7  ;;  %2645 = vmatmul.msk.bf16.gmra.mxu3 %vm501_vm0, %v2048_v22 }
 0x14d   : > { %2619 = vmatmul.msk.bf16.gmra.mxu0 %vm501_vm0, %v2698_v11 }
 0x14e   : > { %2575 = vmatmul.msk.bf16.gmra.mxu2 %vm501_vm0, %v1812_v51  ;;  %v1029_v25 = vpop.f32.mrf.mxu3 }
 0x151   : > { %v1024_v62 = vpop.f32.mrf.mxu2 }
 0x156   : > { %v3597_v33 = vpop.f32.mrf.mxu3 }
 0x159   : > { %v1134_v15 = vpop.f32.mrf.mxu1  ;;  %v1026_v13 = vpop.f32.mrf.mxu2 }
 0x15a   : > { %v1462_v28 = vpop.f32.mrf.mxu0  ;;  %v1135_v50 = vadd.f32 %v1134_v15, %v1024_v62 }
 0x15c   : > { %2646 = vmatmul.msk.bf16.gmra.mxu3 %vm501_vm0, %v2056_v49 }
 0x15f   : > { %v3600_v2 = vpop.f32.mrf.mxu3 }
 0x161   : > { %v1136_v1 = vpop.f32.mrf.mxu1  ;;  %v1318_v44 = vpop.f32.mrf.mxu2 }
 0x162   : > { %v1464_v53 = vpop.f32.mrf.mxu0  ;;  %v1338_v57 = vadd.f32 %v1318_v44, %v1135_v50  ;;  %v1137_v31 = vadd.f32 %v1136_v1, %v1026_v13 }
 0x164   : > { %v1482_v36 = vadd.f32 %v1462_v28, %v1338_v57 }
 0x167   : > { %v3602_v18 = vpop.f32.mrf.mxu3 }
 0x169   : > { %v1320_v23 = vpop.f32.mrf.mxu2  ;;  %v1139_v55 = vpop.f32.mrf.mxu1 }
 0x16a   : > { %v1467_v47 = vpop.f32.mrf.mxu0  ;;  %v1339_v54 = vadd.f32 %v1320_v23, %v1137_v31  ;;  %v1140_v29 = vadd.f32 %v1139_v55, %v1029_v25 }
 0x16c   : > { %2647 = vmatmul.msk.bf16.gmra.mxu3 %vm501_vm0, %v2064_v52  ;;  %v1483_v56 = vadd.f32 %v1464_v53, %v1339_v54 }
 0x16f   : > { %v3605_v24 = vpop.f32.mrf.mxu3 }
 0x171   : > { %v1323_v19 = vpop.f32.mrf.mxu2  ;;  %v1141_v16 = vpop.f32.mrf.mxu1 }
 0x172   : > { %v3609_v58 = vpop.f32.mrf.mxu0  ;;  %v1340_v60 = vadd.f32 %v1323_v19, %v1140_v29  ;;  %v1142_v53 = vadd.f32 %v1141_v16, %v3597_v33 }
 0x174   : > { %v1484_v25 = vadd.f32 %v1467_v47, %v1340_v60 }
 0x177   : > { %v3607_v7 = vpop.f32.mrf.mxu3 }
 0x179   : > { %v1325_v43 = vpop.f32.mrf.mxu2  ;;  %v3611_v41 = vpop.f32.mrf.mxu1 }
 0x17a   : > { %v3615_v8 = vpop.f32.mrf.mxu0  ;;  %v1145_v33 = vadd.f32 %v3611_v41, %v3600_v2 }
 0x17f   : > { %v1564_v4 = vpop.f32.mrf.mxu3 }
 0x180   : > { %v1584_v42 = vadd.f32 %v1564_v4, %v1482_v36 }
 0x181   : > { %v3613_v10 = vpop.f32.mrf.mxu2  ;;  %v3617_v21 = vpop.f32.mrf.mxu1 }
 0x182   : > { %v3621_v5 = vpop.f32.mrf.mxu0  ;;  %v1147_v2 = vadd.f32 %v3617_v21, %v3602_v18 }
 0x187   : > { %v1566_v20 = vpop.f32.mrf.mxu3 }
 0x188   : > { %v1585_v26 = vadd.f32 %v1566_v20, %v1483_v56  ;;  %v1341_v20 = vadd.f32 %v1325_v43, %v1142_v53  ;;  %v1342_v43 = vadd.f32 %v3613_v10, %v1145_v33 }
 0x189   : > { %v3619_v6 = vpop.f32.mrf.mxu2  ;;  %v3623_v38 = vpop.f32.mrf.mxu1 }
 0x18a   : > { %v3627_v22 = vpop.f32.mrf.mxu0  ;;  %v1485_v57 = vadd.f32 %v3609_v58, %v1341_v20  ;;  %v1343_v56 = vadd.f32 %v3619_v6, %v1147_v2  ;;  %v1150_v21 = vadd.f32 %v3623_v38, %v3605_v24 }
 0x18c   : > { %v1487_v60 = vadd.f32 %v3621_v5, %v1343_v56 }
 0x18f   : > { %v1569_v3 = vpop.f32.mrf.mxu3 }
 0x190   : > { %v1586_v23 = vadd.f32 %v1569_v3, %v1484_v25 }
 0x191   : > { %v3625_v34 = vpop.f32.mrf.mxu2  ;;  %v3629_v35 = vpop.f32.mrf.mxu1 }
 0x192   : > { %v3635_v12 = vpop.f32.mrf.mxu0  ;;  %v1152_v38 = vadd.f32 %v3629_v35, %v3607_v7 }
 0x197   : > { %v1571_v30 = vpop.f32.mrf.mxu3 }
 0x198   : > { %v1587_v16 = vadd.f32 %v1571_v30, %v1485_v57 }
 0x199   : > { %v3631_v27 = vpop.f32.mrf.mxu2  ;;  %v1714_v39 = vpop.f32.mrf.mxu1 }
 0x19a   : > { %v1960_v49 = vpop.f32.mrf.mxu0  ;;  %v1734_v17 = vadd.f32 %v1714_v39, %v1584_v42 }
 0x19f   : > { %v3633_v61 = vpop.f32.mrf.mxu3 }
 0x1a1   : > { %v1858_v51 = vpop.f32.mrf.mxu2  ;;  %v1716_v32 = vpop.f32.mrf.mxu1 }
 0x1a2   : > { %v1962_v46 = vpop.f32.mrf.mxu0  ;;  %v1878_v59 = vadd.f32 %v1858_v51, %v1734_v17  ;;  %v1735_v11 = vadd.f32 %v1716_v32, %v1585_v26 }
 0x1a4   : > { %v1980_v37 = vadd.f32 %v1960_v49, %v1878_v59 }
 0x1a7   : > { %v3637_v40 = vpop.f32.mrf.mxu3 }
 0x1a9   : > { %v1860_v14 = vpop.f32.mrf.mxu2  ;;  %v1719_v48 = vpop.f32.mrf.mxu1 }
 0x1aa   : > { %v1879_v15 = vadd.f32 %v1860_v14, %v1735_v11  ;;  %v1965_v28 = vpop.f32.mrf.mxu0  ;;  %v1736_v39 = vadd.f32 %v1719_v48, %v1586_v23 }
 0x1ac   : > { %v1981_v55 = vadd.f32 %v1962_v46, %v1879_v15  ;;  %v1486_v46 = vadd.f32 %v3615_v8, %v1342_v43 }
 0x1ae   : > { %v1588_v41 = vadd.f32 %v3633_v61, %v1486_v46  ;;  %v1589_v61 = vadd.f32 %v3637_v40, %v1487_v60 }
 0x1af   : > { %v3639_v52 = vpop.f32.mrf.mxu3 }
 0x1b1   : > { %v1863_v9 = vpop.f32.mrf.mxu2  ;;  %v1721_v44 = vpop.f32.mrf.mxu1 }
 0x1b2   : > { %v1880_v50 = vadd.f32 %v1863_v9, %v1736_v39  ;;  %v1967_v32 = vpop.f32.mrf.mxu0  ;;  %v1737_v31 = vadd.f32 %v1721_v44, %v1587_v16 }
 0x1b4   : > { %v1982_v3 = vadd.f32 %v1965_v28, %v1880_v50 }
 0x1b7   : > { %v3641_v45 = vpop.f32.mrf.mxu3 }
 0x1b9   : > { %v1865_v19 = vpop.f32.mrf.mxu2  ;;  %v1724_v14 = vpop.f32.mrf.mxu1 }
 0x1ba   : > { %v1881_v17 = vadd.f32 %v1865_v19, %v1737_v31  ;;  %v1970_v48 = vpop.f32.mrf.mxu0  ;;  %v1738_v9 = vadd.f32 %v1724_v14, %v1588_v41 }
 0x1bc   : > { %v1983_v30 = vadd.f32 %v1967_v32, %v1881_v17 }
 0x1bf   : > { %v2110_v0 = vpop.f32.mrf.mxu3 }
 0x1c0   : > { %v2130_v62 = vadd.f32 %v2110_v0, %v1980_v37 }
 0x1c1   : > { %v1868_v54 = vpop.f32.mrf.mxu2  ;;  %v1726_v26 = vpop.f32.mrf.mxu1 }
 0x1c2   : > { %v2142_v13 = vadd.f32 %v3646_v63, %v2130_v62  ;;  %v1882_v37 = vadd.f32 %v1868_v54, %v1738_v9  ;;  %v1344_v62 = vadd.f32 %v3625_v34, %v1150_v21  ;;  %v1739_v15 = vadd.f32 %v1726_v26, %v1589_v61  ;;  %v1972_v28 = vpop.f32.mrf.mxu0 }
 0x1c4   : > { %v2150_v1 = vpack.c.bf16 %v2142_v13, %v2142_v13  ;;  %v1984_v11 = vadd.f32 %v1970_v48, %v1882_v37  ;;  %v1488_v44 = vadd.f32 %v3627_v22, %v1344_v62 }
 0x1c6   : > { %2158 = vst.msk [vmem:[%s3653_s29] sm:$0xf] %vm623_vm1, %v2150_v1  ;;  %v1590_v40 = vadd.f32 %v3639_v52, %v1488_v44 }
 0x1c7   : > { %v2112_v4 = vpop.f32.mrf.mxu3 }
 0x1c8   : > { %v2131_v51 = vadd.f32 %v2112_v4, %v1981_v55  ;;  %v1345_v55 = vadd.f32 %v3631_v27, %v1152_v38 }
 0x1c9   : > { %v1870_v0 = vpop.f32.mrf.mxu2  ;;  %v1729_v5 = vpop.f32.mrf.mxu1 }
 0x1ca   : > { %v2143_v49 = vadd.f32 %v3646_v63, %v2131_v51  ;;  %v1883_v25 = vadd.f32 %v1870_v0, %v1739_v15  ;;  %v1740_v19 = vadd.f32 %v1729_v5, %v1590_v40  ;;  %v1975_v22 = vpop.f32.mrf.mxu0  ;;  %v1489_v51 = vadd.f32 %v3635_v12, %v1345_v55 }
 0x1cc   : > { %v2151_v47 = vpack.c.bf16 %v2143_v49, %v2143_v49  ;;  %v1985_v34 = vadd.f32 %v1972_v28, %v1883_v25  ;;  %v1591_v7 = vadd.f32 %v3641_v45, %v1489_v51 }
 0x1ce   : > { %2159 = vst.msk [vmem:[%s3653_s29 + $0x4] sm:$0xf] %vm623_vm1, %v2151_v47 }
 0x1cf   : > { %v2115_v36 = vpop.f32.mrf.mxu3 }
 0x1d0   : > { %v2132_v42 = vadd.f32 %v2115_v36, %v1982_v3 }
 0x1d1   : > { %v1873_v24 = vpop.f32.mrf.mxu2  ;;  %v1731_v49 = vpop.f32.mrf.mxu1 }
 0x1d2   : > { %v2144_v58 = vadd.f32 %v3646_v63, %v2132_v42  ;;  %v1884_v20 = vadd.f32 %v1873_v24, %v1740_v19  ;;  %v1741_v27 = vadd.f32 %v1731_v49, %v1591_v7  ;;  %v1977_v3 = vpop.f32.mrf.mxu0 }
 0x1d4   : > { %v2152_v59 = vpack.c.bf16 %v2144_v58, %v2144_v58  ;;  %v1986_v35 = vadd.f32 %v1975_v22, %v1884_v20 }
 0x1d6   : > { %2160 = vst.msk [vmem:[%s3653_s29 + $0x8] sm:$0xf] %vm623_vm1, %v2152_v59 }
 0x1d7   : > { %v2117_v10 = vpop.f32.mrf.mxu3 }
 0x1d8   : > { %v2133_v29 = vadd.f32 %v2117_v10, %v1983_v30 }
 0x1d9   : > { %v1875_v52 = vpop.f32.mrf.mxu2 }
 0x1da   : > { %v2145_v8 = vadd.f32 %v3646_v63, %v2133_v29  ;;  %v1885_v32 = vadd.f32 %v1875_v52, %v1741_v27 }
 0x1dc   : > { %v2153_v18 = vpack.c.bf16 %v2145_v8, %v2145_v8  ;;  %v1987_v12 = vadd.f32 %v1977_v3, %v1885_v32 }
 0x1de   : > { %2161 = vst.msk [vmem:[%s3653_s29 + $0xc] sm:$0xf] %vm623_vm1, %v2153_v18 }
 0x1df   : > { %v2120_v6 = vpop.f32.mrf.mxu3 }
 0x1e0   : > { %v2134_v13 = vadd.f32 %v2120_v6, %v1984_v11 }
 0x1e2   : > { %v2146_v1 = vadd.f32 %v3646_v63, %v2134_v13 }
 0x1e4   : > { %v2154_v53 = vpack.c.bf16 %v2146_v1, %v2146_v1 }
 0x1e6   : > { %2162 = vst.msk [vmem:[%s3653_s29 + $0x10] sm:$0xf] %vm623_vm1, %v2154_v53 }
 0x1e7   : > { %v2122_v23 = vpop.f32.mrf.mxu3 }
 0x1e8   : > { %v2135_v4 = vadd.f32 %v2122_v23, %v1985_v34 }
 0x1ea   : > { %v2147_v39 = vadd.f32 %v3646_v63, %v2135_v4 }
 0x1ec   : > { %v2155_v50 = vpack.c.bf16 %v2147_v39, %v2147_v39 }
 0x1ee   : > { %2163 = vst.msk [vmem:[%s3653_s29 + $0x14] sm:$0xf] %vm623_vm1, %v2155_v50 }
 0x1ef   : > { %v2125_v57 = vpop.f32.mrf.mxu3 }
 0x1f0   : > { %v2136_v47 = vadd.f32 %v2125_v57, %v1986_v35 }
 0x1f2   : > { %v2148_v33 = vadd.f32 %v3646_v63, %v2136_v47 }
 0x1f4   : > { %v2156_v16 = vpack.c.bf16 %v2148_v33, %v2148_v33 }
 0x1f6   : > { %2164 = vst.msk [vmem:[%s3653_s29 + $0x18] sm:$0xf] %vm623_vm1, %v2156_v16 }
 0x1f7   : > { %v2127_v14 = vpop.f32.mrf.mxu3 }
 0x1f8   : > { %v2137_v36 = vadd.f32 %v2127_v14, %v1987_v12 }
 0x1fa   : > { %v2149_v45 = vadd.f32 %v3646_v63, %v2137_v36 }
 0x1fc   : > { %v2157_v43 = vpack.c.bf16 %v2149_v45, %v2149_v45 }
 0x1fe   : > { %2165 = vst.msk [vmem:[%s3653_s29 + $0x1c] sm:$0xf] %vm623_vm1, %v2157_v43 }
 0x1ff PF: > { %s17_s26 = sadd.s32 1, %s2840_s26   ;;  %s3745_s24 = smov %s2836_s25 }
 0x200   : > { %p14_p5 = scmp.ge.s32.totalorder %s17_s26, 4   ;;  %s3746_s25 = smov %s3748_s27 }
 0x202   :  { %16 = sbr.rel (!%p14_p5) target bundleno = 2 (0x2), region = 92 }

</bundles_post_ra>
